<compile_context>
chip_gen: v7x
topology: tpu7x:2x2x1
jax: 0.10.0
libtpu: 0.0.40
codegen_flags: <defaults>
</compile_context>

<pallas_src>
import functools
import math

import jax
import jax.numpy as jnp
from jax import lax
from jax.experimental import pallas as pl
from jax.experimental.pallas import tpu as pltpu


def _layernorm(x, scale, shift, eps=1e-5):
    # Matches torch: mean / biased var along last dim, then scale * norm + shift.
    mean = jnp.mean(x, axis=-1, keepdims=True)
    var = jnp.mean(jnp.square(x - mean), axis=-1, keepdims=True)
    return (x - mean) * lax.rsqrt(var + eps) * scale + shift


def _gelu_tanh(x):
    c = math.sqrt(2.0 / math.pi)
    return 0.5 * x * (1.0 + jnp.tanh(c * (x + 0.044715 * x * x * x)))


def _block_kernel(x_ref, bias_ref, wqkv_ref, wo_ref, bo_ref,
                  ln1_s_ref, ln1_b_ref, ln2_s_ref, ln2_b_ref,
                  w1_ref, b1_ref, w2_ref, b2_ref,
                  out_ref, ctx_ref, *, num_heads, gelu_bf16):
    bb, t, d = x_ref.shape
    hd = d // num_heads
    bf16 = jnp.bfloat16
    f32 = jnp.float32

    # Leading-dim-only reshape (lane layout unchanged).
    x = x_ref[...].astype(f32).reshape(bb * t, d)
    causal_bias = bias_ref[...]                        # (t, t) f32, read once

    # ---- LayerNorm 1 (f32, VPU/XLU/EUP) ----
    h = _layernorm(x, ln1_s_ref[...], ln1_b_ref[...])

    # ---- fused QKV projection (softmax scale pre-folded into Q columns).
    # Cast to bf16 ONCE; do not keep the f32 (bb*t, 3d) accumulation live.
    qkv = jnp.dot(h.astype(bf16), wqkv_ref[...],
                  preferred_element_type=f32).astype(bf16)       # (bb*t, 3d)

    # ---- causal attention per (batch-row-in-block, head); results go straight
    # into the bf16 VMEM ctx scratch (no concatenates, bounded live ranges) ----
    for b in range(bb):                                 # static unroll (small)
        qkv_b = qkv[b * t:(b + 1) * t, :]               # sublane-aligned rows
        for hh in range(num_heads):                     # static unroll (small)
            q = qkv_b[:, hh * hd:(hh + 1) * hd]
            k = qkv_b[:, d + hh * hd:d + (hh + 1) * hd]
            v = qkv_b[:, 2 * d + hh * hd:2 * d + (hh + 1) * hd]
            # q @ k^T without transposing k (contract last dims on the MXU).
            s = lax.dot_general(q, k, (((1,), (1,)), ((), ())),
                                preferred_element_type=f32)      # (t, t)
            s = s + causal_bias                                  # single VPU add
            m = jnp.max(s, axis=-1, keepdims=True)
            e = jnp.exp(s - m)                                   # unnormalized
            denom = jnp.sum(e, axis=-1, keepdims=True)
            ctx_h = jnp.dot(e.astype(bf16), v,
                            preferred_element_type=f32)          # (t, hd)
            # Normalize AFTER the PV matmul; reciprocal goes to the EUP slot.
            ctx_h = ctx_h * pl.reciprocal(denom, approx=True)
            ctx_ref[b * t:(b + 1) * t, hh * hd:(hh + 1) * hd] = ctx_h.astype(bf16)

    # ---- output projection: single (bb*t, d) @ (d, d) matmul + bias ----
    attn = jnp.dot(ctx_ref[...], wo_ref[...],
                   preferred_element_type=f32) + bo_ref[...]
    x1 = x + attn                                       # residual (dropout = id)

    # ---- LayerNorm 2 + FeedForward (GELU tanh approx) ----
    h2 = _layernorm(x1, ln2_s_ref[...], ln2_b_ref[...])
    ff_h = jnp.dot(h2.astype(bf16), w1_ref[...],
                   preferred_element_type=f32) + b1_ref[...]     # (bb*t, 4d)
    if gelu_bf16:
        # v6e/v7x: bf16 VALU/EUP -> halve elementwise width of the largest
        # pointwise tensor in the kernel.  (Accuracy already bounded by the
        # bf16 w2 matmul input.)
        act = _gelu_tanh(ff_h.astype(bf16))
    else:
        # v5e: no bf16 VPU/EUP -> stay f32, cast only for the MXU.
        act = _gelu_tanh(ff_h).astype(bf16)
    ff = jnp.dot(act, w2_ref[...],
                 preferred_element_type=f32) + b2_ref[...]       # (bb*t, d)

    out = x1 + ff                                       # residual (dropout = id)
    out_ref[...] = out.reshape(out_ref.shape).astype(out_ref.dtype)


def transformer_block(x, params, *, num_heads, block_b=None):
    """x: (B, T, D). params hold PyTorch-layout weights ((out, in) Linears)."""
    b, t, d = x.shape
    assert d % num_heads == 0
    hd = d // num_heads
    f32, bf16 = jnp.float32, jnp.bfloat16

    # ---- per-generation knobs (host-side glue) ----
    kind = jax.devices()[0].device_kind.lower()
    two_tc = "v7" in kind                                # v7x: 2 TensorCores/chip
    gelu_bf16 = ("v6" in kind) or ("v7" in kind)         # bf16 VALU/EUP available
    if block_b is None:
        if two_tc and b >= 2:
            # Keep the grid >= 2 steps so both TensorCores get work.
            block_b = next(c for c in range(b // 2, 0, -1) if b % c == 0)
        else:
            # Single TC (v5e/v6e): fewer, fatter grid steps (per-step overhead
            # ~0.35us; small-M matmuls under-fill the MXU).
            block_b = b
    assert b % block_b == 0
    vmem_limit = (48 << 20) if two_tc else (96 << 20)    # v7x: 64 MiB physical

    # ---- pre-pack weights; fold 1/sqrt(head_dim) into the Q columns ----
    wqkv = jnp.concatenate(
        [params["wq"].T / math.sqrt(hd), params["wk"].T, params["wv"].T],
        axis=1).astype(bf16)                             # (d, 3d)
    wo_t = params["wo"].T.astype(bf16)                   # (d, d)
    w1_t = params["w1"].T.astype(bf16)                   # (d, 4d)
    w2_t = params["w2"].T.astype(bf16)                   # (4d, d)
    d_ff = w1_t.shape[1]

    rowv = lambda v: v.reshape(1, -1).astype(f32)
    bo = rowv(params["bo"])
    ln1_s, ln1_b = rowv(params["ln1_scale"]), rowv(params["ln1_shift"])
    ln2_s, ln2_b = rowv(params["ln2_scale"]), rowv(params["ln2_shift"])
    b1, b2 = rowv(params["b1"]), rowv(params["b2"])

    # Hoisted additive causal bias: computed once on the host, not per grid step.
    row = lax.broadcasted_iota(jnp.int32, (t, t), 0)
    col = lax.broadcasted_iota(jnp.int32, (t, t), 1)
    causal_bias = jnp.where(col <= row, 0.0, -1e30).astype(f32)

    kernel = functools.partial(_block_kernel, num_heads=num_heads,
                               gelu_bf16=gelu_bf16)

    def build(buffered_consts):
        if buffered_consts:
            # Constant operands: index_map is identical for every grid step, so
            # single-buffer them (default double-buffering keeps a useless
            # second copy of all weights resident in VMEM).
            const = lambda shape: pl.BlockSpec(shape, lambda i: (0, 0),
                                               pipeline_mode=pl.Buffered(1))
        else:
            const = lambda shape: pl.BlockSpec(shape, lambda i: (0, 0))
        return pl.pallas_call(
            kernel,
            out_shape=jax.ShapeDtypeStruct((b, t, d), x.dtype),
            grid_spec=pltpu.PrefetchScalarGridSpec(
                num_scalar_prefetch=0,
                grid=(b // block_b,),
                in_specs=[
                    pl.BlockSpec((block_b, t, d), lambda i: (i, 0, 0)),  # x
                    const((t, t)),           # causal additive bias
                    const((d, 3 * d)),       # wqkv (Q cols pre-scaled)
                    const((d, d)),           # wo^T
                    const((1, d)),           # bo
                    const((1, d)),           # ln1 scale
                    const((1, d)),           # ln1 shift
                    const((1, d)),           # ln2 scale
                    const((1, d)),           # ln2 shift
                    const((d, d_ff)),        # w1^T
                    const((1, d_ff)),        # b1
                    const((d_ff, d)),        # w2^T
                    const((1, d)),           # b2
                ],
                out_specs=pl.BlockSpec((block_b, t, d), lambda i: (i, 0, 0)),
                scratch_shapes=[pltpu.VMEM((block_b * t, d), bf16)],  # ctx
            ),
            compiler_params=pltpu.CompilerParams(
                dimension_semantics=("parallel",),
                vmem_limit_bytes=vmem_limit),
        )

    args = (x, causal_bias, wqkv, wo_t, bo, ln1_s, ln1_b, ln2_s, ln2_b,
            w1_t, b1, w2_t, b2)
    try:
        return build(True)(*args)
    except Exception:
        # pipeline_mode=pl.Buffered(1) not supported by this jax build; fall
        # back to default (double-buffered) constant specs.
        return build(False)(*args)


def _reference(x, p, *, num_heads):
    """Pure-JAX f32 reference mirroring the PyTorch TransformerBlock forward
    (dropout = identity)."""
    def ln(y, s, b, eps=1e-5):
        mean = y.mean(-1, keepdims=True)
        var = jnp.square(y - mean).mean(-1, keepdims=True)
        return s * (y - mean) / jnp.sqrt(var + eps) + b

    def gelu(y):
        return 0.5 * y * (1.0 + jnp.tanh(
            jnp.sqrt(2.0 / jnp.pi) * (y + 0.044715 * y ** 3)))

    b, t, d = x.shape
    hd = d // num_heads

    save = x
    h = ln(x, p["ln1_scale"], p["ln1_shift"])
    q = (h @ p["wq"].T).reshape(b, t, num_heads, hd).transpose(0, 2, 1, 3)
    k = (h @ p["wk"].T).reshape(b, t, num_heads, hd).transpose(0, 2, 1, 3)
    v = (h @ p["wv"].T).reshape(b, t, num_heads, hd).transpose(0, 2, 1, 3)
    s = jnp.einsum("bhqd,bhkd->bhqk", q, k)
    mask = jnp.triu(jnp.ones((t, t), dtype=bool), k=1)
    s = jnp.where(mask[None, None], -jnp.inf, s)
    w = jax.nn.softmax(s / math.sqrt(hd), axis=-1)
    ctx = jnp.einsum("bhqk,bhkd->bhqd", w, v).transpose(0, 2, 1, 3).reshape(b, t, d)
    x1 = ctx @ p["wo"].T + p["bo"] + save

    save = x1
    h2 = ln(x1, p["ln2_scale"], p["ln2_shift"])
    ff = gelu(h2 @ p["w1"].T + p["b1"]) @ p["w2"].T + p["b2"]
    return ff + save


if __name__ == "__main__":
    # cfg: emb_dim=32, context_length=8, n_heads=4, drop_rate=0.0, qkv_bias=False
    B, T, D, H = 2, 8, 32, 4
    D_FF = 4 * D

    key = jax.random.PRNGKey(0)
    ks = jax.random.split(key, 16)
    n = lambda k, shape, s=0.1: jax.random.normal(k, shape, jnp.float32) * s

    x = jax.random.normal(ks[0], (B, T, D), jnp.float32)
    params = dict(
        wq=n(ks[1], (D, D)), wk=n(ks[2], (D, D)), wv=n(ks[3], (D, D)),
        wo=n(ks[4], (D, D)), bo=n(ks[5], (D,)),
        ln1_scale=1.0 + n(ks[6], (D,)), ln1_shift=n(ks[7], (D,)),
        ln2_scale=1.0 + n(ks[8], (D,)), ln2_shift=n(ks[9], (D,)),
        w1=n(ks[10], (D_FF, D)), b1=n(ks[11], (D_FF,)),
        w2=n(ks[12], (D, D_FF)), b2=n(ks[13], (D,)),
    )

    out = transformer_block(x, params, num_heads=H)
    out = jax.block_until_ready(out)

    ref = _reference(x, params, num_heads=H)
    assert out.shape == (B, T, D)
    # Loose tolerance: MXU operands are bf16 (f32 accumulation) + approximate
    # EUP reciprocal on the softmax denominator, by design.
    assert jnp.allclose(out, ref, atol=3e-2, rtol=3e-2), (
        f"mismatch vs reference: max abs err = {jnp.max(jnp.abs(out - ref))}")

    print("KERNEL_OK")
</pallas_src>

<mosaic_0001>
module attributes {stable_mosaic.version = 11 : i64} {
  func.func @_block_kernel(%arg0: i32, %arg1: memref<2x8x32xf32, #tpu.memory_space<vmem>>, %arg2: memref<8x8xf32, #tpu.memory_space<vmem>>, %arg3: memref<32x96xbf16, #tpu.memory_space<vmem>>, %arg4: memref<32x32xbf16, #tpu.memory_space<vmem>>, %arg5: memref<1x32xf32, #tpu.memory_space<vmem>>, %arg6: memref<1x32xf32, #tpu.memory_space<vmem>>, %arg7: memref<1x32xf32, #tpu.memory_space<vmem>>, %arg8: memref<1x32xf32, #tpu.memory_space<vmem>>, %arg9: memref<1x32xf32, #tpu.memory_space<vmem>>, %arg10: memref<32x128xbf16, #tpu.memory_space<vmem>>, %arg11: memref<1x128xf32, #tpu.memory_space<vmem>>, %arg12: memref<128x32xbf16, #tpu.memory_space<vmem>>, %arg13: memref<1x32xf32, #tpu.memory_space<vmem>>, %arg14: memref<2x8x32xf32, #tpu.memory_space<vmem>>, %arg15: memref<16x32xbf16, #tpu.memory_space<vmem>>) attributes {dimension_semantics = [#tpu.dimension_semantics<parallel>], iteration_bounds = array<i64: 1>, scalar_prefetch = 0 : i64, scratch_operands = 1 : i64, tpu.core_type = #tpu.core_type<tc>, window_params = [{transform_indices = @transform_0, window_bounds = array<i64: 2, 8, 32>}, {pipeline_mode = #tpu.pipeline_mode<synchronous>, transform_indices = @transform_1, window_bounds = array<i64: 8, 8>}, {pipeline_mode = #tpu.pipeline_mode<synchronous>, transform_indices = @transform_2, window_bounds = array<i64: 32, 96>}, {pipeline_mode = #tpu.pipeline_mode<synchronous>, transform_indices = @transform_3, window_bounds = array<i64: 32, 32>}, {pipeline_mode = #tpu.pipeline_mode<synchronous>, transform_indices = @transform_4, window_bounds = array<i64: 1, 32>}, {pipeline_mode = #tpu.pipeline_mode<synchronous>, transform_indices = @transform_5, window_bounds = array<i64: 1, 32>}, {pipeline_mode = #tpu.pipeline_mode<synchronous>, transform_indices = @transform_6, window_bounds = array<i64: 1, 32>}, {pipeline_mode = #tpu.pipeline_mode<synchronous>, transform_indices = @transform_7, window_bounds = array<i64: 1, 32>}, {pipeline_mode = #tpu.pipeline_mode<synchronous>, transform_indices = @transform_8, window_bounds = array<i64: 1, 32>}, {pipeline_mode = #tpu.pipeline_mode<synchronous>, transform_indices = @transform_9, window_bounds = array<i64: 32, 128>}, {pipeline_mode = #tpu.pipeline_mode<synchronous>, transform_indices = @transform_10, window_bounds = array<i64: 1, 128>}, {pipeline_mode = #tpu.pipeline_mode<synchronous>, transform_indices = @transform_11, window_bounds = array<i64: 128, 32>}, {pipeline_mode = #tpu.pipeline_mode<synchronous>, transform_indices = @transform_12, window_bounds = array<i64: 1, 32>}, {transform_indices = @transform_13, window_bounds = array<i64: 2, 8, 32>}]} {
    %c0 = arith.constant 0 : index
    %c0_0 = arith.constant 0 : index
    %c0_1 = arith.constant 0 : index
    %0 = vector.load %arg1[%c0, %c0_0, %c0_1] : memref<2x8x32xf32, #tpu.memory_space<vmem>>, vector<2x8x32xf32>
    %1 = vector.shape_cast %0 : vector<2x8x32xf32> to vector<16x32xf32>
    %c0_2 = arith.constant 0 : index
    %c0_3 = arith.constant 0 : index
    %2 = vector.load %arg2[%c0_2, %c0_3] : memref<8x8xf32, #tpu.memory_space<vmem>>, vector<8x8xf32>
    %c0_4 = arith.constant 0 : index
    %c0_5 = arith.constant 0 : index
    %3 = vector.load %arg6[%c0_4, %c0_5] : memref<1x32xf32, #tpu.memory_space<vmem>>, vector<1x32xf32>
    %c0_6 = arith.constant 0 : index
    %c0_7 = arith.constant 0 : index
    %4 = vector.load %arg7[%c0_6, %c0_7] : memref<1x32xf32, #tpu.memory_space<vmem>>, vector<1x32xf32>
    %cst = arith.constant dense<0.000000e+00> : vector<16xf32>
    %5 = vector.multi_reduction <add>, %1, %cst [1] : vector<16x32xf32> to vector<16xf32>
    %6 = vector.shape_cast %5 : vector<16xf32> to vector<16x1xf32>
    %cst_8 = arith.constant 3.200000e+01 : f32
    %7 = vector.broadcast %cst_8 : f32 to vector<16x1xf32>
    %8 = arith.divf %6, %7 : vector<16x1xf32>
    %9 = vector.broadcast %8 : vector<16x1xf32> to vector<16x32xf32>
    %10 = arith.subf %1, %9 : vector<16x32xf32>
    %11 = arith.mulf %10, %10 : vector<16x32xf32>
    %cst_9 = arith.constant dense<0.000000e+00> : vector<16xf32>
    %12 = vector.multi_reduction <add>, %11, %cst_9 [1] : vector<16x32xf32> to vector<16xf32>
    %13 = vector.shape_cast %12 : vector<16xf32> to vector<16x1xf32>
    %cst_10 = arith.constant 3.200000e+01 : f32
    %14 = vector.broadcast %cst_10 : f32 to vector<16x1xf32>
    %15 = arith.divf %13, %14 : vector<16x1xf32>
    %16 = vector.broadcast %8 : vector<16x1xf32> to vector<16x32xf32>
    %17 = arith.subf %1, %16 : vector<16x32xf32>
    %cst_11 = arith.constant 9.99999974E-6 : f32
    %18 = vector.broadcast %cst_11 : f32 to vector<16x1xf32>
    %19 = arith.addf %15, %18 : vector<16x1xf32>
    %20 = math.rsqrt %19 : vector<16x1xf32>
    %21 = vector.broadcast %20 : vector<16x1xf32> to vector<16x32xf32>
    %22 = arith.mulf %17, %21 : vector<16x32xf32>
    %23 = vector.broadcast %3 : vector<1x32xf32> to vector<16x32xf32>
    %24 = arith.mulf %22, %23 : vector<16x32xf32>
    %25 = vector.broadcast %4 : vector<1x32xf32> to vector<16x32xf32>
    %26 = arith.addf %24, %25 : vector<16x32xf32>
    %27 = arith.truncf %26 : vector<16x32xf32> to vector<16x32xbf16>
    %c0_12 = arith.constant 0 : index
    %c0_13 = arith.constant 0 : index
    %28 = vector.load %arg3[%c0_12, %c0_13] : memref<32x96xbf16, #tpu.memory_space<vmem>>, vector<32x96xbf16>
    %cst_14 = arith.constant dense<0.000000e+00> : vector<16x96xf32>
    %29 = tpu.matmul %27, %28, %cst_14 {dimension_numbers = #tpu.dot_dimension_numbers<[1], [0], [0], [1], [0, 0, 1, 1], [], []>} : vector<16x32xbf16>, vector<32x96xbf16>, vector<16x96xf32> -> vector<16x96xf32>
    %30 = arith.truncf %29 : vector<16x96xf32> to vector<16x96xbf16>
    %31 = vector.extract_strided_slice %30 {offsets = [0, 0], sizes = [8, 96], strides = [1, 1]} : vector<16x96xbf16> to vector<8x96xbf16>
    %32 = vector.extract_strided_slice %31 {offsets = [0, 0], sizes = [8, 8], strides = [1, 1]} : vector<8x96xbf16> to vector<8x8xbf16>
    %33 = vector.extract_strided_slice %31 {offsets = [0, 32], sizes = [8, 8], strides = [1, 1]} : vector<8x96xbf16> to vector<8x8xbf16>
    %34 = vector.extract_strided_slice %31 {offsets = [0, 64], sizes = [8, 8], strides = [1, 1]} : vector<8x96xbf16> to vector<8x8xbf16>
    %cst_15 = arith.constant dense<0.000000e+00> : vector<8x8xf32>
    %35 = tpu.matmul %32, %33, %cst_15 {dimension_numbers = #tpu.dot_dimension_numbers<[1], [1], [0], [0], [0, 0, 1, 0], [], []>} : vector<8x8xbf16>, vector<8x8xbf16>, vector<8x8xf32> -> vector<8x8xf32>
    %36 = arith.addf %35, %2 : vector<8x8xf32>
    %cst_16 = arith.constant dense<0xFF800000> : vector<8xf32>
    %37 = vector.multi_reduction <maximumf>, %36, %cst_16 [1] : vector<8x8xf32> to vector<8xf32>
    %38 = vector.shape_cast %37 : vector<8xf32> to vector<8x1xf32>
    %39 = vector.broadcast %38 : vector<8x1xf32> to vector<8x8xf32>
    %40 = arith.subf %36, %39 : vector<8x8xf32>
    %41 = math.exp %40 : vector<8x8xf32>
    %cst_17 = arith.constant dense<0.000000e+00> : vector<8xf32>
    %42 = vector.multi_reduction <add>, %41, %cst_17 [1] : vector<8x8xf32> to vector<8xf32>
    %43 = vector.shape_cast %42 : vector<8xf32> to vector<8x1xf32>
    %44 = arith.truncf %41 : vector<8x8xf32> to vector<8x8xbf16>
    %cst_18 = arith.constant dense<0.000000e+00> : vector<8x8xf32>
    %45 = tpu.matmul %44, %34, %cst_18 {dimension_numbers = #tpu.dot_dimension_numbers<[1], [0], [0], [1], [0, 0, 1, 1], [], []>} : vector<8x8xbf16>, vector<8x8xbf16>, vector<8x8xf32> -> vector<8x8xf32>
    %46 = tpu.reciprocal %43 {approx = true} : vector<8x1xf32> -> vector<8x1xf32>
    %47 = vector.broadcast %46 : vector<8x1xf32> to vector<8x8xf32>
    %48 = arith.mulf %45, %47 : vector<8x8xf32>
    %49 = arith.truncf %48 : vector<8x8xf32> to vector<8x8xbf16>
    %c0_19 = arith.constant 0 : index
    %c0_20 = arith.constant 0 : index
    %50 = vector.load %arg15[%c0_19, %c0_20] : memref<16x32xbf16, #tpu.memory_space<vmem>>, vector<8x8xbf16>
    tpu.vector_store %arg15[%c0_19, %c0_20], %49 {strides = array<i32>} : memref<16x32xbf16, #tpu.memory_space<vmem>>, vector<8x8xbf16>,
    %51 = vector.extract_strided_slice %31 {offsets = [0, 8], sizes = [8, 8], strides = [1, 1]} : vector<8x96xbf16> to vector<8x8xbf16>
    %52 = vector.extract_strided_slice %31 {offsets = [0, 40], sizes = [8, 8], strides = [1, 1]} : vector<8x96xbf16> to vector<8x8xbf16>
    %53 = vector.extract_strided_slice %31 {offsets = [0, 72], sizes = [8, 8], strides = [1, 1]} : vector<8x96xbf16> to vector<8x8xbf16>
    %cst_21 = arith.constant dense<0.000000e+00> : vector<8x8xf32>
    %54 = tpu.matmul %51, %52, %cst_21 {dimension_numbers = #tpu.dot_dimension_numbers<[1], [1], [0], [0], [0, 0, 1, 0], [], []>} : vector<8x8xbf16>, vector<8x8xbf16>, vector<8x8xf32> -> vector<8x8xf32>
    %55 = arith.addf %54, %2 : vector<8x8xf32>
    %cst_22 = arith.constant dense<0xFF800000> : vector<8xf32>
    %56 = vector.multi_reduction <maximumf>, %55, %cst_22 [1] : vector<8x8xf32> to vector<8xf32>
    %57 = vector.shape_cast %56 : vector<8xf32> to vector<8x1xf32>
    %58 = vector.broadcast %57 : vector<8x1xf32> to vector<8x8xf32>
    %59 = arith.subf %55, %58 : vector<8x8xf32>
    %60 = math.exp %59 : vector<8x8xf32>
    %cst_23 = arith.constant dense<0.000000e+00> : vector<8xf32>
    %61 = vector.multi_reduction <add>, %60, %cst_23 [1] : vector<8x8xf32> to vector<8xf32>
    %62 = vector.shape_cast %61 : vector<8xf32> to vector<8x1xf32>
    %63 = arith.truncf %60 : vector<8x8xf32> to vector<8x8xbf16>
    %cst_24 = arith.constant dense<0.000000e+00> : vector<8x8xf32>
    %64 = tpu.matmul %63, %53, %cst_24 {dimension_numbers = #tpu.dot_dimension_numbers<[1], [0], [0], [1], [0, 0, 1, 1], [], []>} : vector<8x8xbf16>, vector<8x8xbf16>, vector<8x8xf32> -> vector<8x8xf32>
    %65 = tpu.reciprocal %62 {approx = true} : vector<8x1xf32> -> vector<8x1xf32>
    %66 = vector.broadcast %65 : vector<8x1xf32> to vector<8x8xf32>
    %67 = arith.mulf %64, %66 : vector<8x8xf32>
    %68 = arith.truncf %67 : vector<8x8xf32> to vector<8x8xbf16>
    %c0_25 = arith.constant 0 : index
    %c8 = arith.constant 8 : index
    %69 = vector.load %arg15[%c0_25, %c8] : memref<16x32xbf16, #tpu.memory_space<vmem>>, vector<8x8xbf16>
    tpu.vector_store %arg15[%c0_25, %c8], %68 {strides = array<i32>} : memref<16x32xbf16, #tpu.memory_space<vmem>>, vector<8x8xbf16>,
    %70 = vector.extract_strided_slice %31 {offsets = [0, 16], sizes = [8, 8], strides = [1, 1]} : vector<8x96xbf16> to vector<8x8xbf16>
    %71 = vector.extract_strided_slice %31 {offsets = [0, 48], sizes = [8, 8], strides = [1, 1]} : vector<8x96xbf16> to vector<8x8xbf16>
    %72 = vector.extract_strided_slice %31 {offsets = [0, 80], sizes = [8, 8], strides = [1, 1]} : vector<8x96xbf16> to vector<8x8xbf16>
    %cst_26 = arith.constant dense<0.000000e+00> : vector<8x8xf32>
    %73 = tpu.matmul %70, %71, %cst_26 {dimension_numbers = #tpu.dot_dimension_numbers<[1], [1], [0], [0], [0, 0, 1, 0], [], []>} : vector<8x8xbf16>, vector<8x8xbf16>, vector<8x8xf32> -> vector<8x8xf32>
    %74 = arith.addf %73, %2 : vector<8x8xf32>
    %cst_27 = arith.constant dense<0xFF800000> : vector<8xf32>
    %75 = vector.multi_reduction <maximumf>, %74, %cst_27 [1] : vector<8x8xf32> to vector<8xf32>
    %76 = vector.shape_cast %75 : vector<8xf32> to vector<8x1xf32>
    %77 = vector.broadcast %76 : vector<8x1xf32> to vector<8x8xf32>
    %78 = arith.subf %74, %77 : vector<8x8xf32>
    %79 = math.exp %78 : vector<8x8xf32>
    %cst_28 = arith.constant dense<0.000000e+00> : vector<8xf32>
    %80 = vector.multi_reduction <add>, %79, %cst_28 [1] : vector<8x8xf32> to vector<8xf32>
    %81 = vector.shape_cast %80 : vector<8xf32> to vector<8x1xf32>
    %82 = arith.truncf %79 : vector<8x8xf32> to vector<8x8xbf16>
    %cst_29 = arith.constant dense<0.000000e+00> : vector<8x8xf32>
    %83 = tpu.matmul %82, %72, %cst_29 {dimension_numbers = #tpu.dot_dimension_numbers<[1], [0], [0], [1], [0, 0, 1, 1], [], []>} : vector<8x8xbf16>, vector<8x8xbf16>, vector<8x8xf32> -> vector<8x8xf32>
    %84 = tpu.reciprocal %81 {approx = true} : vector<8x1xf32> -> vector<8x1xf32>
    %85 = vector.broadcast %84 : vector<8x1xf32> to vector<8x8xf32>
    %86 = arith.mulf %83, %85 : vector<8x8xf32>
    %87 = arith.truncf %86 : vector<8x8xf32> to vector<8x8xbf16>
    %c0_30 = arith.constant 0 : index
    %c16 = arith.constant 16 : index
    %88 = vector.load %arg15[%c0_30, %c16] : memref<16x32xbf16, #tpu.memory_space<vmem>>, vector<8x8xbf16>
    tpu.vector_store %arg15[%c0_30, %c16], %87 {strides = array<i32>} : memref<16x32xbf16, #tpu.memory_space<vmem>>, vector<8x8xbf16>,
    %89 = vector.extract_strided_slice %31 {offsets = [0, 24], sizes = [8, 8], strides = [1, 1]} : vector<8x96xbf16> to vector<8x8xbf16>
    %90 = vector.extract_strided_slice %31 {offsets = [0, 56], sizes = [8, 8], strides = [1, 1]} : vector<8x96xbf16> to vector<8x8xbf16>
    %91 = vector.extract_strided_slice %31 {offsets = [0, 88], sizes = [8, 8], strides = [1, 1]} : vector<8x96xbf16> to vector<8x8xbf16>
    %cst_31 = arith.constant dense<0.000000e+00> : vector<8x8xf32>
    %92 = tpu.matmul %89, %90, %cst_31 {dimension_numbers = #tpu.dot_dimension_numbers<[1], [1], [0], [0], [0, 0, 1, 0], [], []>} : vector<8x8xbf16>, vector<8x8xbf16>, vector<8x8xf32> -> vector<8x8xf32>
    %93 = arith.addf %92, %2 : vector<8x8xf32>
    %cst_32 = arith.constant dense<0xFF800000> : vector<8xf32>
    %94 = vector.multi_reduction <maximumf>, %93, %cst_32 [1] : vector<8x8xf32> to vector<8xf32>
    %95 = vector.shape_cast %94 : vector<8xf32> to vector<8x1xf32>
    %96 = vector.broadcast %95 : vector<8x1xf32> to vector<8x8xf32>
    %97 = arith.subf %93, %96 : vector<8x8xf32>
    %98 = math.exp %97 : vector<8x8xf32>
    %cst_33 = arith.constant dense<0.000000e+00> : vector<8xf32>
    %99 = vector.multi_reduction <add>, %98, %cst_33 [1] : vector<8x8xf32> to vector<8xf32>
    %100 = vector.shape_cast %99 : vector<8xf32> to vector<8x1xf32>
    %101 = arith.truncf %98 : vector<8x8xf32> to vector<8x8xbf16>
    %cst_34 = arith.constant dense<0.000000e+00> : vector<8x8xf32>
    %102 = tpu.matmul %101, %91, %cst_34 {dimension_numbers = #tpu.dot_dimension_numbers<[1], [0], [0], [1], [0, 0, 1, 1], [], []>} : vector<8x8xbf16>, vector<8x8xbf16>, vector<8x8xf32> -> vector<8x8xf32>
    %103 = tpu.reciprocal %100 {approx = true} : vector<8x1xf32> -> vector<8x1xf32>
    %104 = vector.broadcast %103 : vector<8x1xf32> to vector<8x8xf32>
    %105 = arith.mulf %102, %104 : vector<8x8xf32>
    %106 = arith.truncf %105 : vector<8x8xf32> to vector<8x8xbf16>
    %c0_35 = arith.constant 0 : index
    %c24 = arith.constant 24 : index
    %107 = vector.load %arg15[%c0_35, %c24] : memref<16x32xbf16, #tpu.memory_space<vmem>>, vector<8x8xbf16>
    tpu.vector_store %arg15[%c0_35, %c24], %106 {strides = array<i32>} : memref<16x32xbf16, #tpu.memory_space<vmem>>, vector<8x8xbf16>,
    %108 = vector.extract_strided_slice %30 {offsets = [8, 0], sizes = [8, 96], strides = [1, 1]} : vector<16x96xbf16> to vector<8x96xbf16>
    %109 = vector.extract_strided_slice %108 {offsets = [0, 0], sizes = [8, 8], strides = [1, 1]} : vector<8x96xbf16> to vector<8x8xbf16>
    %110 = vector.extract_strided_slice %108 {offsets = [0, 32], sizes = [8, 8], strides = [1, 1]} : vector<8x96xbf16> to vector<8x8xbf16>
    %111 = vector.extract_strided_slice %108 {offsets = [0, 64], sizes = [8, 8], strides = [1, 1]} : vector<8x96xbf16> to vector<8x8xbf16>
    %cst_36 = arith.constant dense<0.000000e+00> : vector<8x8xf32>
    %112 = tpu.matmul %109, %110, %cst_36 {dimension_numbers = #tpu.dot_dimension_numbers<[1], [1], [0], [0], [0, 0, 1, 0], [], []>} : vector<8x8xbf16>, vector<8x8xbf16>, vector<8x8xf32> -> vector<8x8xf32>
    %113 = arith.addf %112, %2 : vector<8x8xf32>
    %cst_37 = arith.constant dense<0xFF800000> : vector<8xf32>
    %114 = vector.multi_reduction <maximumf>, %113, %cst_37 [1] : vector<8x8xf32> to vector<8xf32>
    %115 = vector.shape_cast %114 : vector<8xf32> to vector<8x1xf32>
    %116 = vector.broadcast %115 : vector<8x1xf32> to vector<8x8xf32>
    %117 = arith.subf %113, %116 : vector<8x8xf32>
    %118 = math.exp %117 : vector<8x8xf32>
    %cst_38 = arith.constant dense<0.000000e+00> : vector<8xf32>
    %119 = vector.multi_reduction <add>, %118, %cst_38 [1] : vector<8x8xf32> to vector<8xf32>
    %120 = vector.shape_cast %119 : vector<8xf32> to vector<8x1xf32>
    %121 = arith.truncf %118 : vector<8x8xf32> to vector<8x8xbf16>
    %cst_39 = arith.constant dense<0.000000e+00> : vector<8x8xf32>
    %122 = tpu.matmul %121, %111, %cst_39 {dimension_numbers = #tpu.dot_dimension_numbers<[1], [0], [0], [1], [0, 0, 1, 1], [], []>} : vector<8x8xbf16>, vector<8x8xbf16>, vector<8x8xf32> -> vector<8x8xf32>
    %123 = tpu.reciprocal %120 {approx = true} : vector<8x1xf32> -> vector<8x1xf32>
    %124 = vector.broadcast %123 : vector<8x1xf32> to vector<8x8xf32>
    %125 = arith.mulf %122, %124 : vector<8x8xf32>
    %126 = arith.truncf %125 : vector<8x8xf32> to vector<8x8xbf16>
    %c8_40 = arith.constant 8 : index
    %c0_41 = arith.constant 0 : index
    %127 = vector.load %arg15[%c8_40, %c0_41] : memref<16x32xbf16, #tpu.memory_space<vmem>>, vector<8x8xbf16>
    tpu.vector_store %arg15[%c8_40, %c0_41], %126 {strides = array<i32>} : memref<16x32xbf16, #tpu.memory_space<vmem>>, vector<8x8xbf16>,
    %128 = vector.extract_strided_slice %108 {offsets = [0, 8], sizes = [8, 8], strides = [1, 1]} : vector<8x96xbf16> to vector<8x8xbf16>
    %129 = vector.extract_strided_slice %108 {offsets = [0, 40], sizes = [8, 8], strides = [1, 1]} : vector<8x96xbf16> to vector<8x8xbf16>
    %130 = vector.extract_strided_slice %108 {offsets = [0, 72], sizes = [8, 8], strides = [1, 1]} : vector<8x96xbf16> to vector<8x8xbf16>
    %cst_42 = arith.constant dense<0.000000e+00> : vector<8x8xf32>
    %131 = tpu.matmul %128, %129, %cst_42 {dimension_numbers = #tpu.dot_dimension_numbers<[1], [1], [0], [0], [0, 0, 1, 0], [], []>} : vector<8x8xbf16>, vector<8x8xbf16>, vector<8x8xf32> -> vector<8x8xf32>
    %132 = arith.addf %131, %2 : vector<8x8xf32>
    %cst_43 = arith.constant dense<0xFF800000> : vector<8xf32>
    %133 = vector.multi_reduction <maximumf>, %132, %cst_43 [1] : vector<8x8xf32> to vector<8xf32>
    %134 = vector.shape_cast %133 : vector<8xf32> to vector<8x1xf32>
    %135 = vector.broadcast %134 : vector<8x1xf32> to vector<8x8xf32>
    %136 = arith.subf %132, %135 : vector<8x8xf32>
    %137 = math.exp %136 : vector<8x8xf32>
    %cst_44 = arith.constant dense<0.000000e+00> : vector<8xf32>
    %138 = vector.multi_reduction <add>, %137, %cst_44 [1] : vector<8x8xf32> to vector<8xf32>
    %139 = vector.shape_cast %138 : vector<8xf32> to vector<8x1xf32>
    %140 = arith.truncf %137 : vector<8x8xf32> to vector<8x8xbf16>
    %cst_45 = arith.constant dense<0.000000e+00> : vector<8x8xf32>
    %141 = tpu.matmul %140, %130, %cst_45 {dimension_numbers = #tpu.dot_dimension_numbers<[1], [0], [0], [1], [0, 0, 1, 1], [], []>} : vector<8x8xbf16>, vector<8x8xbf16>, vector<8x8xf32> -> vector<8x8xf32>
    %142 = tpu.reciprocal %139 {approx = true} : vector<8x1xf32> -> vector<8x1xf32>
    %143 = vector.broadcast %142 : vector<8x1xf32> to vector<8x8xf32>
    %144 = arith.mulf %141, %143 : vector<8x8xf32>
    %145 = arith.truncf %144 : vector<8x8xf32> to vector<8x8xbf16>
    %c8_46 = arith.constant 8 : index
    %c8_47 = arith.constant 8 : index
    %146 = vector.load %arg15[%c8_46, %c8_47] : memref<16x32xbf16, #tpu.memory_space<vmem>>, vector<8x8xbf16>
    tpu.vector_store %arg15[%c8_46, %c8_47], %145 {strides = array<i32>} : memref<16x32xbf16, #tpu.memory_space<vmem>>, vector<8x8xbf16>,
    %147 = vector.extract_strided_slice %108 {offsets = [0, 16], sizes = [8, 8], strides = [1, 1]} : vector<8x96xbf16> to vector<8x8xbf16>
    %148 = vector.extract_strided_slice %108 {offsets = [0, 48], sizes = [8, 8], strides = [1, 1]} : vector<8x96xbf16> to vector<8x8xbf16>
    %149 = vector.extract_strided_slice %108 {offsets = [0, 80], sizes = [8, 8], strides = [1, 1]} : vector<8x96xbf16> to vector<8x8xbf16>
    %cst_48 = arith.constant dense<0.000000e+00> : vector<8x8xf32>
    %150 = tpu.matmul %147, %148, %cst_48 {dimension_numbers = #tpu.dot_dimension_numbers<[1], [1], [0], [0], [0, 0, 1, 0], [], []>} : vector<8x8xbf16>, vector<8x8xbf16>, vector<8x8xf32> -> vector<8x8xf32>
    %151 = arith.addf %150, %2 : vector<8x8xf32>
    %cst_49 = arith.constant dense<0xFF800000> : vector<8xf32>
    %152 = vector.multi_reduction <maximumf>, %151, %cst_49 [1] : vector<8x8xf32> to vector<8xf32>
    %153 = vector.shape_cast %152 : vector<8xf32> to vector<8x1xf32>
    %154 = vector.broadcast %153 : vector<8x1xf32> to vector<8x8xf32>
    %155 = arith.subf %151, %154 : vector<8x8xf32>
    %156 = math.exp %155 : vector<8x8xf32>
    %cst_50 = arith.constant dense<0.000000e+00> : vector<8xf32>
    %157 = vector.multi_reduction <add>, %156, %cst_50 [1] : vector<8x8xf32> to vector<8xf32>
    %158 = vector.shape_cast %157 : vector<8xf32> to vector<8x1xf32>
    %159 = arith.truncf %156 : vector<8x8xf32> to vector<8x8xbf16>
    %cst_51 = arith.constant dense<0.000000e+00> : vector<8x8xf32>
    %160 = tpu.matmul %159, %149, %cst_51 {dimension_numbers = #tpu.dot_dimension_numbers<[1], [0], [0], [1], [0, 0, 1, 1], [], []>} : vector<8x8xbf16>, vector<8x8xbf16>, vector<8x8xf32> -> vector<8x8xf32>
    %161 = tpu.reciprocal %158 {approx = true} : vector<8x1xf32> -> vector<8x1xf32>
    %162 = vector.broadcast %161 : vector<8x1xf32> to vector<8x8xf32>
    %163 = arith.mulf %160, %162 : vector<8x8xf32>
    %164 = arith.truncf %163 : vector<8x8xf32> to vector<8x8xbf16>
    %c8_52 = arith.constant 8 : index
    %c16_53 = arith.constant 16 : index
    %165 = vector.load %arg15[%c8_52, %c16_53] : memref<16x32xbf16, #tpu.memory_space<vmem>>, vector<8x8xbf16>
    tpu.vector_store %arg15[%c8_52, %c16_53], %164 {strides = array<i32>} : memref<16x32xbf16, #tpu.memory_space<vmem>>, vector<8x8xbf16>,
    %166 = vector.extract_strided_slice %108 {offsets = [0, 24], sizes = [8, 8], strides = [1, 1]} : vector<8x96xbf16> to vector<8x8xbf16>
    %167 = vector.extract_strided_slice %108 {offsets = [0, 56], sizes = [8, 8], strides = [1, 1]} : vector<8x96xbf16> to vector<8x8xbf16>
    %168 = vector.extract_strided_slice %108 {offsets = [0, 88], sizes = [8, 8], strides = [1, 1]} : vector<8x96xbf16> to vector<8x8xbf16>
    %cst_54 = arith.constant dense<0.000000e+00> : vector<8x8xf32>
    %169 = tpu.matmul %166, %167, %cst_54 {dimension_numbers = #tpu.dot_dimension_numbers<[1], [1], [0], [0], [0, 0, 1, 0], [], []>} : vector<8x8xbf16>, vector<8x8xbf16>, vector<8x8xf32> -> vector<8x8xf32>
    %170 = arith.addf %169, %2 : vector<8x8xf32>
    %cst_55 = arith.constant dense<0xFF800000> : vector<8xf32>
    %171 = vector.multi_reduction <maximumf>, %170, %cst_55 [1] : vector<8x8xf32> to vector<8xf32>
    %172 = vector.shape_cast %171 : vector<8xf32> to vector<8x1xf32>
    %173 = vector.broadcast %172 : vector<8x1xf32> to vector<8x8xf32>
    %174 = arith.subf %170, %173 : vector<8x8xf32>
    %175 = math.exp %174 : vector<8x8xf32>
    %cst_56 = arith.constant dense<0.000000e+00> : vector<8xf32>
    %176 = vector.multi_reduction <add>, %175, %cst_56 [1] : vector<8x8xf32> to vector<8xf32>
    %177 = vector.shape_cast %176 : vector<8xf32> to vector<8x1xf32>
    %178 = arith.truncf %175 : vector<8x8xf32> to vector<8x8xbf16>
    %cst_57 = arith.constant dense<0.000000e+00> : vector<8x8xf32>
    %179 = tpu.matmul %178, %168, %cst_57 {dimension_numbers = #tpu.dot_dimension_numbers<[1], [0], [0], [1], [0, 0, 1, 1], [], []>} : vector<8x8xbf16>, vector<8x8xbf16>, vector<8x8xf32> -> vector<8x8xf32>
    %180 = tpu.reciprocal %177 {approx = true} : vector<8x1xf32> -> vector<8x1xf32>
    %181 = vector.broadcast %180 : vector<8x1xf32> to vector<8x8xf32>
    %182 = arith.mulf %179, %181 : vector<8x8xf32>
    %183 = arith.truncf %182 : vector<8x8xf32> to vector<8x8xbf16>
    %c8_58 = arith.constant 8 : index
    %c24_59 = arith.constant 24 : index
    %184 = vector.load %arg15[%c8_58, %c24_59] : memref<16x32xbf16, #tpu.memory_space<vmem>>, vector<8x8xbf16>
    tpu.vector_store %arg15[%c8_58, %c24_59], %183 {strides = array<i32>} : memref<16x32xbf16, #tpu.memory_space<vmem>>, vector<8x8xbf16>,
    %c0_60 = arith.constant 0 : index
    %c0_61 = arith.constant 0 : index
    %185 = vector.load %arg15[%c0_60, %c0_61] : memref<16x32xbf16, #tpu.memory_space<vmem>>, vector<16x32xbf16>
    %c0_62 = arith.constant 0 : index
    %c0_63 = arith.constant 0 : index
    %186 = vector.load %arg4[%c0_62, %c0_63] : memref<32x32xbf16, #tpu.memory_space<vmem>>, vector<32x32xbf16>
    %cst_64 = arith.constant dense<0.000000e+00> : vector<16x32xf32>
    %187 = tpu.matmul %185, %186, %cst_64 {dimension_numbers = #tpu.dot_dimension_numbers<[1], [0], [0], [1], [0, 0, 1, 1], [], []>} : vector<16x32xbf16>, vector<32x32xbf16>, vector<16x32xf32> -> vector<16x32xf32>
    %c0_65 = arith.constant 0 : index
    %c0_66 = arith.constant 0 : index
    %188 = vector.load %arg5[%c0_65, %c0_66] : memref<1x32xf32, #tpu.memory_space<vmem>>, vector<1x32xf32>
    %189 = vector.broadcast %188 : vector<1x32xf32> to vector<16x32xf32>
    %190 = arith.addf %187, %189 : vector<16x32xf32>
    %191 = arith.addf %1, %190 : vector<16x32xf32>
    %c0_67 = arith.constant 0 : index
    %c0_68 = arith.constant 0 : index
    %192 = vector.load %arg8[%c0_67, %c0_68] : memref<1x32xf32, #tpu.memory_space<vmem>>, vector<1x32xf32>
    %c0_69 = arith.constant 0 : index
    %c0_70 = arith.constant 0 : index
    %193 = vector.load %arg9[%c0_69, %c0_70] : memref<1x32xf32, #tpu.memory_space<vmem>>, vector<1x32xf32>
    %cst_71 = arith.constant dense<0.000000e+00> : vector<16xf32>
    %194 = vector.multi_reduction <add>, %191, %cst_71 [1] : vector<16x32xf32> to vector<16xf32>
    %195 = vector.shape_cast %194 : vector<16xf32> to vector<16x1xf32>
    %cst_72 = arith.constant 3.200000e+01 : f32
    %196 = vector.broadcast %cst_72 : f32 to vector<16x1xf32>
    %197 = arith.divf %195, %196 : vector<16x1xf32>
    %198 = vector.broadcast %197 : vector<16x1xf32> to vector<16x32xf32>
    %199 = arith.subf %191, %198 : vector<16x32xf32>
    %200 = arith.mulf %199, %199 : vector<16x32xf32>
    %cst_73 = arith.constant dense<0.000000e+00> : vector<16xf32>
    %201 = vector.multi_reduction <add>, %200, %cst_73 [1] : vector<16x32xf32> to vector<16xf32>
    %202 = vector.shape_cast %201 : vector<16xf32> to vector<16x1xf32>
    %cst_74 = arith.constant 3.200000e+01 : f32
    %203 = vector.broadcast %cst_74 : f32 to vector<16x1xf32>
    %204 = arith.divf %202, %203 : vector<16x1xf32>
    %205 = vector.broadcast %197 : vector<16x1xf32> to vector<16x32xf32>
    %206 = arith.subf %191, %205 : vector<16x32xf32>
    %cst_75 = arith.constant 9.99999974E-6 : f32
    %207 = vector.broadcast %cst_75 : f32 to vector<16x1xf32>
    %208 = arith.addf %204, %207 : vector<16x1xf32>
    %209 = math.rsqrt %208 : vector<16x1xf32>
    %210 = vector.broadcast %209 : vector<16x1xf32> to vector<16x32xf32>
    %211 = arith.mulf %206, %210 : vector<16x32xf32>
    %212 = vector.broadcast %192 : vector<1x32xf32> to vector<16x32xf32>
    %213 = arith.mulf %211, %212 : vector<16x32xf32>
    %214 = vector.broadcast %193 : vector<1x32xf32> to vector<16x32xf32>
    %215 = arith.addf %213, %214 : vector<16x32xf32>
    %216 = arith.truncf %215 : vector<16x32xf32> to vector<16x32xbf16>
    %c0_76 = arith.constant 0 : index
    %c0_77 = arith.constant 0 : index
    %217 = vector.load %arg10[%c0_76, %c0_77] : memref<32x128xbf16, #tpu.memory_space<vmem>>, vector<32x128xbf16>
    %cst_78 = arith.constant dense<0.000000e+00> : vector<16x128xf32>
    %218 = tpu.matmul %216, %217, %cst_78 {dimension_numbers = #tpu.dot_dimension_numbers<[1], [0], [0], [1], [0, 0, 1, 1], [], []>} : vector<16x32xbf16>, vector<32x128xbf16>, vector<16x128xf32> -> vector<16x128xf32>
    %c0_79 = arith.constant 0 : index
    %c0_80 = arith.constant 0 : index
    %219 = vector.load %arg11[%c0_79, %c0_80] : memref<1x128xf32, #tpu.memory_space<vmem>>, vector<1x128xf32>
    %220 = vector.broadcast %219 : vector<1x128xf32> to vector<16x128xf32>
    %221 = arith.addf %218, %220 : vector<16x128xf32>
    %cst_81 = arith.constant 5.000000e-01 : f32
    %222 = vector.broadcast %cst_81 : f32 to vector<16x128xf32>
    %223 = arith.mulf %222, %221 : vector<16x128xf32>
    %cst_82 = arith.constant 4.471500e-02 : f32
    %224 = vector.broadcast %cst_82 : f32 to vector<16x128xf32>
    %225 = arith.mulf %224, %221 : vector<16x128xf32>
    %226 = arith.mulf %225, %221 : vector<16x128xf32>
    %227 = arith.mulf %226, %221 : vector<16x128xf32>
    %228 = arith.addf %221, %227 : vector<16x128xf32>
    %cst_83 = arith.constant 0.797884583 : f32
    %229 = vector.broadcast %cst_83 : f32 to vector<16x128xf32>
    %230 = arith.mulf %229, %228 : vector<16x128xf32>
    %231 = math.tanh %230 : vector<16x128xf32>
    %cst_84 = arith.constant 1.000000e+00 : f32
    %232 = vector.broadcast %cst_84 : f32 to vector<16x128xf32>
    %233 = arith.addf %232, %231 : vector<16x128xf32>
    %234 = arith.mulf %223, %233 : vector<16x128xf32>
    %235 = arith.truncf %234 : vector<16x128xf32> to vector<16x128xbf16>
    %c0_85 = arith.constant 0 : index
    %c0_86 = arith.constant 0 : index
    %236 = vector.load %arg12[%c0_85, %c0_86] : memref<128x32xbf16, #tpu.memory_space<vmem>>, vector<128x32xbf16>
    %cst_87 = arith.constant dense<0.000000e+00> : vector<16x32xf32>
    %237 = tpu.matmul %235, %236, %cst_87 {dimension_numbers = #tpu.dot_dimension_numbers<[1], [0], [0], [1], [0, 0, 1, 1], [], []>} : vector<16x128xbf16>, vector<128x32xbf16>, vector<16x32xf32> -> vector<16x32xf32>
    %c0_88 = arith.constant 0 : index
    %c0_89 = arith.constant 0 : index
    %238 = vector.load %arg13[%c0_88, %c0_89] : memref<1x32xf32, #tpu.memory_space<vmem>>, vector<1x32xf32>
    %239 = vector.broadcast %238 : vector<1x32xf32> to vector<16x32xf32>
    %240 = arith.addf %237, %239 : vector<16x32xf32>
    %241 = arith.addf %191, %240 : vector<16x32xf32>
    %242 = vector.shape_cast %241 : vector<16x32xf32> to vector<2x8x32xf32>
    %c0_90 = arith.constant 0 : index
    %c0_91 = arith.constant 0 : index
    %c0_92 = arith.constant 0 : index
    %243 = vector.load %arg14[%c0_90, %c0_91, %c0_92] : memref<2x8x32xf32, #tpu.memory_space<vmem>>, vector<2x8x32xf32>
    tpu.vector_store %arg14[%c0_90, %c0_91, %c0_92], %242 {strides = array<i32>} : memref<2x8x32xf32, #tpu.memory_space<vmem>>, vector<2x8x32xf32>,
    return
  }
  func.func @transform_0(%arg0: i32) -> (i32, i32, i32) {
    %c0_i32 = arith.constant 0 : i32
    %c0_i32_0 = arith.constant 0 : i32
    %c0_i32_1 = arith.constant 0 : i32
    return %arg0, %c0_i32, %c0_i32_0 : i32, i32, i32
  }
  func.func @transform_1(%arg0: i32) -> (i32, i32) {
    %c0_i32 = arith.constant 0 : i32
    %c0_i32_0 = arith.constant 0 : i32
    %c0_i32_1 = arith.constant 0 : i32
    return %c0_i32, %c0_i32_0 : i32, i32
  }
  func.func @transform_2(%arg0: i32) -> (i32, i32) {
    %c0_i32 = arith.constant 0 : i32
    %c0_i32_0 = arith.constant 0 : i32
    %c0_i32_1 = arith.constant 0 : i32
    return %c0_i32, %c0_i32_0 : i32, i32
  }
  func.func @transform_3(%arg0: i32) -> (i32, i32) {
    %c0_i32 = arith.constant 0 : i32
    %c0_i32_0 = arith.constant 0 : i32
    %c0_i32_1 = arith.constant 0 : i32
    return %c0_i32, %c0_i32_0 : i32, i32
  }
  func.func @transform_4(%arg0: i32) -> (i32, i32) {
    %c0_i32 = arith.constant 0 : i32
    %c0_i32_0 = arith.constant 0 : i32
    %c0_i32_1 = arith.constant 0 : i32
    return %c0_i32, %c0_i32_0 : i32, i32
  }
  func.func @transform_5(%arg0: i32) -> (i32, i32) {
    %c0_i32 = arith.constant 0 : i32
    %c0_i32_0 = arith.constant 0 : i32
    %c0_i32_1 = arith.constant 0 : i32
    return %c0_i32, %c0_i32_0 : i32, i32
  }
  func.func @transform_6(%arg0: i32) -> (i32, i32) {
    %c0_i32 = arith.constant 0 : i32
    %c0_i32_0 = arith.constant 0 : i32
    %c0_i32_1 = arith.constant 0 : i32
    return %c0_i32, %c0_i32_0 : i32, i32
  }
  func.func @transform_7(%arg0: i32) -> (i32, i32) {
    %c0_i32 = arith.constant 0 : i32
    %c0_i32_0 = arith.constant 0 : i32
    %c0_i32_1 = arith.constant 0 : i32
    return %c0_i32, %c0_i32_0 : i32, i32
  }
  func.func @transform_8(%arg0: i32) -> (i32, i32) {
    %c0_i32 = arith.constant 0 : i32
    %c0_i32_0 = arith.constant 0 : i32
    %c0_i32_1 = arith.constant 0 : i32
    return %c0_i32, %c0_i32_0 : i32, i32
  }
  func.func @transform_9(%arg0: i32) -> (i32, i32) {
    %c0_i32 = arith.constant 0 : i32
    %c0_i32_0 = arith.constant 0 : i32
    %c0_i32_1 = arith.constant 0 : i32
    return %c0_i32, %c0_i32_0 : i32, i32
  }
  func.func @transform_10(%arg0: i32) -> (i32, i32) {
    %c0_i32 = arith.constant 0 : i32
    %c0_i32_0 = arith.constant 0 : i32
    %c0_i32_1 = arith.constant 0 : i32
    return %c0_i32, %c0_i32_0 : i32, i32
  }
  func.func @transform_11(%arg0: i32) -> (i32, i32) {
    %c0_i32 = arith.constant 0 : i32
    %c0_i32_0 = arith.constant 0 : i32
    %c0_i32_1 = arith.constant 0 : i32
    return %c0_i32, %c0_i32_0 : i32, i32
  }
  func.func @transform_12(%arg0: i32) -> (i32, i32) {
    %c0_i32 = arith.constant 0 : i32
    %c0_i32_0 = arith.constant 0 : i32
    %c0_i32_1 = arith.constant 0 : i32
    return %c0_i32, %c0_i32_0 : i32, i32
  }
  func.func @transform_13(%arg0: i32) -> (i32, i32, i32) {
    %c0_i32 = arith.constant 0 : i32
    %c0_i32_0 = arith.constant 0 : i32
    %c0_i32_1 = arith.constant 0 : i32
    return %arg0, %c0_i32, %c0_i32_0 : i32, i32, i32
  }
}

module attributes {stable_mosaic.version = 11 : i64} {
  func.func @_block_kernel(%arg0: i32, %arg1: memref<2x8x32xf32, #tpu.memory_space<vmem>>, %arg2: memref<8x8xf32, #tpu.memory_space<vmem>>, %arg3: memref<32x96xbf16, #tpu.memory_space<vmem>>, %arg4: memref<32x32xbf16, #tpu.memory_space<vmem>>, %arg5: memref<1x32xf32, #tpu.memory_space<vmem>>, %arg6: memref<1x32xf32, #tpu.memory_space<vmem>>, %arg7: memref<1x32xf32, #tpu.memory_space<vmem>>, %arg8: memref<1x32xf32, #tpu.memory_space<vmem>>, %arg9: memref<1x32xf32, #tpu.memory_space<vmem>>, %arg10: memref<32x128xbf16, #tpu.memory_space<vmem>>, %arg11: memref<1x128xf32, #tpu.memory_space<vmem>>, %arg12: memref<128x32xbf16, #tpu.memory_space<vmem>>, %arg13: memref<1x32xf32, #tpu.memory_space<vmem>>, %arg14: memref<2x8x32xf32, #tpu.memory_space<vmem>>, %arg15: memref<16x32xbf16, #tpu.memory_space<vmem>>) attributes {dimension_semantics = [#tpu.dimension_semantics<parallel>], iteration_bounds = array<i64: 1>, scalar_prefetch = 0 : i64, scratch_operands = 1 : i64, tpu.core_type = #tpu.core_type<tc>, window_params = [{transform_indices = @transform_0, window_bounds = array<i64: 2, 8, 32>}, {pipeline_mode = #tpu.pipeline_mode<synchronous>, transform_indices = @transform_1, window_bounds = array<i64: 8, 8>}, {pipeline_mode = #tpu.pipeline_mode<synchronous>, transform_indices = @transform_2, window_bounds = array<i64: 32, 96>}, {pipeline_mode = #tpu.pipeline_mode<synchronous>, transform_indices = @transform_3, window_bounds = array<i64: 32, 32>}, {pipeline_mode = #tpu.pipeline_mode<synchronous>, transform_indices = @transform_4, window_bounds = array<i64: 1, 32>}, {pipeline_mode = #tpu.pipeline_mode<synchronous>, transform_indices = @transform_5, window_bounds = array<i64: 1, 32>}, {pipeline_mode = #tpu.pipeline_mode<synchronous>, transform_indices = @transform_6, window_bounds = array<i64: 1, 32>}, {pipeline_mode = #tpu.pipeline_mode<synchronous>, transform_indices = @transform_7, window_bounds = array<i64: 1, 32>}, {pipeline_mode = #tpu.pipeline_mode<synchronous>, transform_indices = @transform_8, window_bounds = array<i64: 1, 32>}, {pipeline_mode = #tpu.pipeline_mode<synchronous>, transform_indices = @transform_9, window_bounds = array<i64: 32, 128>}, {pipeline_mode = #tpu.pipeline_mode<synchronous>, transform_indices = @transform_10, window_bounds = array<i64: 1, 128>}, {pipeline_mode = #tpu.pipeline_mode<synchronous>, transform_indices = @transform_11, window_bounds = array<i64: 128, 32>}, {pipeline_mode = #tpu.pipeline_mode<synchronous>, transform_indices = @transform_12, window_bounds = array<i64: 1, 32>}, {transform_indices = @transform_13, window_bounds = array<i64: 2, 8, 32>}]} {
    %c0 = arith.constant 0 : index
    %c0_0 = arith.constant 0 : index
    %c0_1 = arith.constant 0 : index
    %0 = vector.load %arg1[%c0, %c0_0, %c0_1] : memref<2x8x32xf32, #tpu.memory_space<vmem>>, vector<2x8x32xf32>
    %1 = vector.shape_cast %0 : vector<2x8x32xf32> to vector<16x32xf32>
    %c0_2 = arith.constant 0 : index
    %c0_3 = arith.constant 0 : index
    %2 = vector.load %arg2[%c0_2, %c0_3] : memref<8x8xf32, #tpu.memory_space<vmem>>, vector<8x8xf32>
    %c0_4 = arith.constant 0 : index
    %c0_5 = arith.constant 0 : index
    %3 = vector.load %arg6[%c0_4, %c0_5] : memref<1x32xf32, #tpu.memory_space<vmem>>, vector<1x32xf32>
    %c0_6 = arith.constant 0 : index
    %c0_7 = arith.constant 0 : index
    %4 = vector.load %arg7[%c0_6, %c0_7] : memref<1x32xf32, #tpu.memory_space<vmem>>, vector<1x32xf32>
    %cst = arith.constant dense<0.000000e+00> : vector<16xf32>
    %5 = vector.multi_reduction <add>, %1, %cst [1] : vector<16x32xf32> to vector<16xf32>
    %6 = vector.shape_cast %5 : vector<16xf32> to vector<16x1xf32>
    %cst_8 = arith.constant 3.200000e+01 : f32
    %7 = vector.broadcast %cst_8 : f32 to vector<16x1xf32>
    %8 = arith.divf %6, %7 : vector<16x1xf32>
    %9 = vector.broadcast %8 : vector<16x1xf32> to vector<16x32xf32>
    %10 = arith.subf %1, %9 : vector<16x32xf32>
    %11 = arith.mulf %10, %10 : vector<16x32xf32>
    %cst_9 = arith.constant dense<0.000000e+00> : vector<16xf32>
    %12 = vector.multi_reduction <add>, %11, %cst_9 [1] : vector<16x32xf32> to vector<16xf32>
    %13 = vector.shape_cast %12 : vector<16xf32> to vector<16x1xf32>
    %cst_10 = arith.constant 3.200000e+01 : f32
    %14 = vector.broadcast %cst_10 : f32 to vector<16x1xf32>
    %15 = arith.divf %13, %14 : vector<16x1xf32>
    %16 = vector.broadcast %8 : vector<16x1xf32> to vector<16x32xf32>
    %17 = arith.subf %1, %16 : vector<16x32xf32>
    %cst_11 = arith.constant 9.99999974E-6 : f32
    %18 = vector.broadcast %cst_11 : f32 to vector<16x1xf32>
    %19 = arith.addf %15, %18 : vector<16x1xf32>
    %20 = math.rsqrt %19 : vector<16x1xf32>
    %21 = vector.broadcast %20 : vector<16x1xf32> to vector<16x32xf32>
    %22 = arith.mulf %17, %21 : vector<16x32xf32>
    %23 = vector.broadcast %3 : vector<1x32xf32> to vector<16x32xf32>
    %24 = arith.mulf %22, %23 : vector<16x32xf32>
    %25 = vector.broadcast %4 : vector<1x32xf32> to vector<16x32xf32>
    %26 = arith.addf %24, %25 : vector<16x32xf32>
    %27 = arith.truncf %26 : vector<16x32xf32> to vector<16x32xbf16>
    %c0_12 = arith.constant 0 : index
    %c0_13 = arith.constant 0 : index
    %28 = vector.load %arg3[%c0_12, %c0_13] : memref<32x96xbf16, #tpu.memory_space<vmem>>, vector<32x96xbf16>
    %cst_14 = arith.constant dense<0.000000e+00> : vector<16x96xf32>
    %29 = tpu.matmul %27, %28, %cst_14 {dimension_numbers = #tpu.dot_dimension_numbers<[1], [0], [0], [1], [0, 0, 1, 1], [], []>} : vector<16x32xbf16>, vector<32x96xbf16>, vector<16x96xf32> -> vector<16x96xf32>
    %30 = arith.truncf %29 : vector<16x96xf32> to vector<16x96xbf16>
    %31 = vector.extract_strided_slice %30 {offsets = [0, 0], sizes = [8, 96], strides = [1, 1]} : vector<16x96xbf16> to vector<8x96xbf16>
    %32 = vector.extract_strided_slice %31 {offsets = [0, 0], sizes = [8, 8], strides = [1, 1]} : vector<8x96xbf16> to vector<8x8xbf16>
    %33 = vector.extract_strided_slice %31 {offsets = [0, 32], sizes = [8, 8], strides = [1, 1]} : vector<8x96xbf16> to vector<8x8xbf16>
    %34 = vector.extract_strided_slice %31 {offsets = [0, 64], sizes = [8, 8], strides = [1, 1]} : vector<8x96xbf16> to vector<8x8xbf16>
    %cst_15 = arith.constant dense<0.000000e+00> : vector<8x8xf32>
    %35 = tpu.matmul %32, %33, %cst_15 {dimension_numbers = #tpu.dot_dimension_numbers<[1], [1], [0], [0], [0, 0, 1, 0], [], []>} : vector<8x8xbf16>, vector<8x8xbf16>, vector<8x8xf32> -> vector<8x8xf32>
    %36 = arith.addf %35, %2 : vector<8x8xf32>
    %cst_16 = arith.constant dense<0xFF800000> : vector<8xf32>
    %37 = vector.multi_reduction <maximumf>, %36, %cst_16 [1] : vector<8x8xf32> to vector<8xf32>
    %38 = vector.shape_cast %37 : vector<8xf32> to vector<8x1xf32>
    %39 = vector.broadcast %38 : vector<8x1xf32> to vector<8x8xf32>
    %40 = arith.subf %36, %39 : vector<8x8xf32>
    %41 = math.exp %40 : vector<8x8xf32>
    %cst_17 = arith.constant dense<0.000000e+00> : vector<8xf32>
    %42 = vector.multi_reduction <add>, %41, %cst_17 [1] : vector<8x8xf32> to vector<8xf32>
    %43 = vector.shape_cast %42 : vector<8xf32> to vector<8x1xf32>
    %44 = arith.truncf %41 : vector<8x8xf32> to vector<8x8xbf16>
    %cst_18 = arith.constant dense<0.000000e+00> : vector<8x8xf32>
    %45 = tpu.matmul %44, %34, %cst_18 {dimension_numbers = #tpu.dot_dimension_numbers<[1], [0], [0], [1], [0, 0, 1, 1], [], []>} : vector<8x8xbf16>, vector<8x8xbf16>, vector<8x8xf32> -> vector<8x8xf32>
    %46 = tpu.reciprocal %43 {approx = true} : vector<8x1xf32> -> vector<8x1xf32>
    %47 = vector.broadcast %46 : vector<8x1xf32> to vector<8x8xf32>
    %48 = arith.mulf %45, %47 : vector<8x8xf32>
    %49 = arith.truncf %48 : vector<8x8xf32> to vector<8x8xbf16>
    %c0_19 = arith.constant 0 : index
    %c0_20 = arith.constant 0 : index
    %50 = vector.load %arg15[%c0_19, %c0_20] : memref<16x32xbf16, #tpu.memory_space<vmem>>, vector<8x8xbf16>
    tpu.vector_store %arg15[%c0_19, %c0_20], %49 {strides = array<i32>} : memref<16x32xbf16, #tpu.memory_space<vmem>>, vector<8x8xbf16>,
    %51 = vector.extract_strided_slice %31 {offsets = [0, 8], sizes = [8, 8], strides = [1, 1]} : vector<8x96xbf16> to vector<8x8xbf16>
    %52 = vector.extract_strided_slice %31 {offsets = [0, 40], sizes = [8, 8], strides = [1, 1]} : vector<8x96xbf16> to vector<8x8xbf16>
    %53 = vector.extract_strided_slice %31 {offsets = [0, 72], sizes = [8, 8], strides = [1, 1]} : vector<8x96xbf16> to vector<8x8xbf16>
    %cst_21 = arith.constant dense<0.000000e+00> : vector<8x8xf32>
    %54 = tpu.matmul %51, %52, %cst_21 {dimension_numbers = #tpu.dot_dimension_numbers<[1], [1], [0], [0], [0, 0, 1, 0], [], []>} : vector<8x8xbf16>, vector<8x8xbf16>, vector<8x8xf32> -> vector<8x8xf32>
    %55 = arith.addf %54, %2 : vector<8x8xf32>
    %cst_22 = arith.constant dense<0xFF800000> : vector<8xf32>
    %56 = vector.multi_reduction <maximumf>, %55, %cst_22 [1] : vector<8x8xf32> to vector<8xf32>
    %57 = vector.shape_cast %56 : vector<8xf32> to vector<8x1xf32>
    %58 = vector.broadcast %57 : vector<8x1xf32> to vector<8x8xf32>
    %59 = arith.subf %55, %58 : vector<8x8xf32>
    %60 = math.exp %59 : vector<8x8xf32>
    %cst_23 = arith.constant dense<0.000000e+00> : vector<8xf32>
    %61 = vector.multi_reduction <add>, %60, %cst_23 [1] : vector<8x8xf32> to vector<8xf32>
    %62 = vector.shape_cast %61 : vector<8xf32> to vector<8x1xf32>
    %63 = arith.truncf %60 : vector<8x8xf32> to vector<8x8xbf16>
    %cst_24 = arith.constant dense<0.000000e+00> : vector<8x8xf32>
    %64 = tpu.matmul %63, %53, %cst_24 {dimension_numbers = #tpu.dot_dimension_numbers<[1], [0], [0], [1], [0, 0, 1, 1], [], []>} : vector<8x8xbf16>, vector<8x8xbf16>, vector<8x8xf32> -> vector<8x8xf32>
    %65 = tpu.reciprocal %62 {approx = true} : vector<8x1xf32> -> vector<8x1xf32>
    %66 = vector.broadcast %65 : vector<8x1xf32> to vector<8x8xf32>
    %67 = arith.mulf %64, %66 : vector<8x8xf32>
    %68 = arith.truncf %67 : vector<8x8xf32> to vector<8x8xbf16>
    %c0_25 = arith.constant 0 : index
    %c8 = arith.constant 8 : index
    %69 = vector.load %arg15[%c0_25, %c8] : memref<16x32xbf16, #tpu.memory_space<vmem>>, vector<8x8xbf16>
    tpu.vector_store %arg15[%c0_25, %c8], %68 {strides = array<i32>} : memref<16x32xbf16, #tpu.memory_space<vmem>>, vector<8x8xbf16>,
    %70 = vector.extract_strided_slice %31 {offsets = [0, 16], sizes = [8, 8], strides = [1, 1]} : vector<8x96xbf16> to vector<8x8xbf16>
    %71 = vector.extract_strided_slice %31 {offsets = [0, 48], sizes = [8, 8], strides = [1, 1]} : vector<8x96xbf16> to vector<8x8xbf16>
    %72 = vector.extract_strided_slice %31 {offsets = [0, 80], sizes = [8, 8], strides = [1, 1]} : vector<8x96xbf16> to vector<8x8xbf16>
    %cst_26 = arith.constant dense<0.000000e+00> : vector<8x8xf32>
    %73 = tpu.matmul %70, %71, %cst_26 {dimension_numbers = #tpu.dot_dimension_numbers<[1], [1], [0], [0], [0, 0, 1, 0], [], []>} : vector<8x8xbf16>, vector<8x8xbf16>, vector<8x8xf32> -> vector<8x8xf32>
    %74 = arith.addf %73, %2 : vector<8x8xf32>
    %cst_27 = arith.constant dense<0xFF800000> : vector<8xf32>
    %75 = vector.multi_reduction <maximumf>, %74, %cst_27 [1] : vector<8x8xf32> to vector<8xf32>
    %76 = vector.shape_cast %75 : vector<8xf32> to vector<8x1xf32>
    %77 = vector.broadcast %76 : vector<8x1xf32> to vector<8x8xf32>
    %78 = arith.subf %74, %77 : vector<8x8xf32>
    %79 = math.exp %78 : vector<8x8xf32>
    %cst_28 = arith.constant dense<0.000000e+00> : vector<8xf32>
    %80 = vector.multi_reduction <add>, %79, %cst_28 [1] : vector<8x8xf32> to vector<8xf32>
    %81 = vector.shape_cast %80 : vector<8xf32> to vector<8x1xf32>
    %82 = arith.truncf %79 : vector<8x8xf32> to vector<8x8xbf16>
    %cst_29 = arith.constant dense<0.000000e+00> : vector<8x8xf32>
    %83 = tpu.matmul %82, %72, %cst_29 {dimension_numbers = #tpu.dot_dimension_numbers<[1], [0], [0], [1], [0, 0, 1, 1], [], []>} : vector<8x8xbf16>, vector<8x8xbf16>, vector<8x8xf32> -> vector<8x8xf32>
    %84 = tpu.reciprocal %81 {approx = true} : vector<8x1xf32> -> vector<8x1xf32>
    %85 = vector.broadcast %84 : vector<8x1xf32> to vector<8x8xf32>
    %86 = arith.mulf %83, %85 : vector<8x8xf32>
    %87 = arith.truncf %86 : vector<8x8xf32> to vector<8x8xbf16>
    %c0_30 = arith.constant 0 : index
    %c16 = arith.constant 16 : index
    %88 = vector.load %arg15[%c0_30, %c16] : memref<16x32xbf16, #tpu.memory_space<vmem>>, vector<8x8xbf16>
    tpu.vector_store %arg15[%c0_30, %c16], %87 {strides = array<i32>} : memref<16x32xbf16, #tpu.memory_space<vmem>>, vector<8x8xbf16>,
    %89 = vector.extract_strided_slice %31 {offsets = [0, 24], sizes = [8, 8], strides = [1, 1]} : vector<8x96xbf16> to vector<8x8xbf16>
    %90 = vector.extract_strided_slice %31 {offsets = [0, 56], sizes = [8, 8], strides = [1, 1]} : vector<8x96xbf16> to vector<8x8xbf16>
    %91 = vector.extract_strided_slice %31 {offsets = [0, 88], sizes = [8, 8], strides = [1, 1]} : vector<8x96xbf16> to vector<8x8xbf16>
    %cst_31 = arith.constant dense<0.000000e+00> : vector<8x8xf32>
    %92 = tpu.matmul %89, %90, %cst_31 {dimension_numbers = #tpu.dot_dimension_numbers<[1], [1], [0], [0], [0, 0, 1, 0], [], []>} : vector<8x8xbf16>, vector<8x8xbf16>, vector<8x8xf32> -> vector<8x8xf32>
    %93 = arith.addf %92, %2 : vector<8x8xf32>
    %cst_32 = arith.constant dense<0xFF800000> : vector<8xf32>
    %94 = vector.multi_reduction <maximumf>, %93, %cst_32 [1] : vector<8x8xf32> to vector<8xf32>
    %95 = vector.shape_cast %94 : vector<8xf32> to vector<8x1xf32>
    %96 = vector.broadcast %95 : vector<8x1xf32> to vector<8x8xf32>
    %97 = arith.subf %93, %96 : vector<8x8xf32>
    %98 = math.exp %97 : vector<8x8xf32>
    %cst_33 = arith.constant dense<0.000000e+00> : vector<8xf32>
    %99 = vector.multi_reduction <add>, %98, %cst_33 [1] : vector<8x8xf32> to vector<8xf32>
    %100 = vector.shape_cast %99 : vector<8xf32> to vector<8x1xf32>
    %101 = arith.truncf %98 : vector<8x8xf32> to vector<8x8xbf16>
    %cst_34 = arith.constant dense<0.000000e+00> : vector<8x8xf32>
    %102 = tpu.matmul %101, %91, %cst_34 {dimension_numbers = #tpu.dot_dimension_numbers<[1], [0], [0], [1], [0, 0, 1, 1], [], []>} : vector<8x8xbf16>, vector<8x8xbf16>, vector<8x8xf32> -> vector<8x8xf32>
    %103 = tpu.reciprocal %100 {approx = true} : vector<8x1xf32> -> vector<8x1xf32>
    %104 = vector.broadcast %103 : vector<8x1xf32> to vector<8x8xf32>
    %105 = arith.mulf %102, %104 : vector<8x8xf32>
    %106 = arith.truncf %105 : vector<8x8xf32> to vector<8x8xbf16>
    %c0_35 = arith.constant 0 : index
    %c24 = arith.constant 24 : index
    %107 = vector.load %arg15[%c0_35, %c24] : memref<16x32xbf16, #tpu.memory_space<vmem>>, vector<8x8xbf16>
    tpu.vector_store %arg15[%c0_35, %c24], %106 {strides = array<i32>} : memref<16x32xbf16, #tpu.memory_space<vmem>>, vector<8x8xbf16>,
    %108 = vector.extract_strided_slice %30 {offsets = [8, 0], sizes = [8, 96], strides = [1, 1]} : vector<16x96xbf16> to vector<8x96xbf16>
    %109 = vector.extract_strided_slice %108 {offsets = [0, 0], sizes = [8, 8], strides = [1, 1]} : vector<8x96xbf16> to vector<8x8xbf16>
    %110 = vector.extract_strided_slice %108 {offsets = [0, 32], sizes = [8, 8], strides = [1, 1]} : vector<8x96xbf16> to vector<8x8xbf16>
    %111 = vector.extract_strided_slice %108 {offsets = [0, 64], sizes = [8, 8], strides = [1, 1]} : vector<8x96xbf16> to vector<8x8xbf16>
    %cst_36 = arith.constant dense<0.000000e+00> : vector<8x8xf32>
    %112 = tpu.matmul %109, %110, %cst_36 {dimension_numbers = #tpu.dot_dimension_numbers<[1], [1], [0], [0], [0, 0, 1, 0], [], []>} : vector<8x8xbf16>, vector<8x8xbf16>, vector<8x8xf32> -> vector<8x8xf32>
    %113 = arith.addf %112, %2 : vector<8x8xf32>
    %cst_37 = arith.constant dense<0xFF800000> : vector<8xf32>
    %114 = vector.multi_reduction <maximumf>, %113, %cst_37 [1] : vector<8x8xf32> to vector<8xf32>
    %115 = vector.shape_cast %114 : vector<8xf32> to vector<8x1xf32>
    %116 = vector.broadcast %115 : vector<8x1xf32> to vector<8x8xf32>
    %117 = arith.subf %113, %116 : vector<8x8xf32>
    %118 = math.exp %117 : vector<8x8xf32>
    %cst_38 = arith.constant dense<0.000000e+00> : vector<8xf32>
    %119 = vector.multi_reduction <add>, %118, %cst_38 [1] : vector<8x8xf32> to vector<8xf32>
    %120 = vector.shape_cast %119 : vector<8xf32> to vector<8x1xf32>
    %121 = arith.truncf %118 : vector<8x8xf32> to vector<8x8xbf16>
    %cst_39 = arith.constant dense<0.000000e+00> : vector<8x8xf32>
    %122 = tpu.matmul %121, %111, %cst_39 {dimension_numbers = #tpu.dot_dimension_numbers<[1], [0], [0], [1], [0, 0, 1, 1], [], []>} : vector<8x8xbf16>, vector<8x8xbf16>, vector<8x8xf32> -> vector<8x8xf32>
    %123 = tpu.reciprocal %120 {approx = true} : vector<8x1xf32> -> vector<8x1xf32>
    %124 = vector.broadcast %123 : vector<8x1xf32> to vector<8x8xf32>
    %125 = arith.mulf %122, %124 : vector<8x8xf32>
    %126 = arith.truncf %125 : vector<8x8xf32> to vector<8x8xbf16>
    %c8_40 = arith.constant 8 : index
    %c0_41 = arith.constant 0 : index
    %127 = vector.load %arg15[%c8_40, %c0_41] : memref<16x32xbf16, #tpu.memory_space<vmem>>, vector<8x8xbf16>
    tpu.vector_store %arg15[%c8_40, %c0_41], %126 {strides = array<i32>} : memref<16x32xbf16, #tpu.memory_space<vmem>>, vector<8x8xbf16>,
    %128 = vector.extract_strided_slice %108 {offsets = [0, 8], sizes = [8, 8], strides = [1, 1]} : vector<8x96xbf16> to vector<8x8xbf16>
    %129 = vector.extract_strided_slice %108 {offsets = [0, 40], sizes = [8, 8], strides = [1, 1]} : vector<8x96xbf16> to vector<8x8xbf16>
    %130 = vector.extract_strided_slice %108 {offsets = [0, 72], sizes = [8, 8], strides = [1, 1]} : vector<8x96xbf16> to vector<8x8xbf16>
    %cst_42 = arith.constant dense<0.000000e+00> : vector<8x8xf32>
    %131 = tpu.matmul %128, %129, %cst_42 {dimension_numbers = #tpu.dot_dimension_numbers<[1], [1], [0], [0], [0, 0, 1, 0], [], []>} : vector<8x8xbf16>, vector<8x8xbf16>, vector<8x8xf32> -> vector<8x8xf32>
    %132 = arith.addf %131, %2 : vector<8x8xf32>
    %cst_43 = arith.constant dense<0xFF800000> : vector<8xf32>
    %133 = vector.multi_reduction <maximumf>, %132, %cst_43 [1] : vector<8x8xf32> to vector<8xf32>
    %134 = vector.shape_cast %133 : vector<8xf32> to vector<8x1xf32>
    %135 = vector.broadcast %134 : vector<8x1xf32> to vector<8x8xf32>
    %136 = arith.subf %132, %135 : vector<8x8xf32>
    %137 = math.exp %136 : vector<8x8xf32>
    %cst_44 = arith.constant dense<0.000000e+00> : vector<8xf32>
    %138 = vector.multi_reduction <add>, %137, %cst_44 [1] : vector<8x8xf32> to vector<8xf32>
    %139 = vector.shape_cast %138 : vector<8xf32> to vector<8x1xf32>
    %140 = arith.truncf %137 : vector<8x8xf32> to vector<8x8xbf16>
    %cst_45 = arith.constant dense<0.000000e+00> : vector<8x8xf32>
    %141 = tpu.matmul %140, %130, %cst_45 {dimension_numbers = #tpu.dot_dimension_numbers<[1], [0], [0], [1], [0, 0, 1, 1], [], []>} : vector<8x8xbf16>, vector<8x8xbf16>, vector<8x8xf32> -> vector<8x8xf32>
    %142 = tpu.reciprocal %139 {approx = true} : vector<8x1xf32> -> vector<8x1xf32>
    %143 = vector.broadcast %142 : vector<8x1xf32> to vector<8x8xf32>
    %144 = arith.mulf %141, %143 : vector<8x8xf32>
    %145 = arith.truncf %144 : vector<8x8xf32> to vector<8x8xbf16>
    %c8_46 = arith.constant 8 : index
    %c8_47 = arith.constant 8 : index
    %146 = vector.load %arg15[%c8_46, %c8_47] : memref<16x32xbf16, #tpu.memory_space<vmem>>, vector<8x8xbf16>
    tpu.vector_store %arg15[%c8_46, %c8_47], %145 {strides = array<i32>} : memref<16x32xbf16, #tpu.memory_space<vmem>>, vector<8x8xbf16>,
    %147 = vector.extract_strided_slice %108 {offsets = [0, 16], sizes = [8, 8], strides = [1, 1]} : vector<8x96xbf16> to vector<8x8xbf16>
    %148 = vector.extract_strided_slice %108 {offsets = [0, 48], sizes = [8, 8], strides = [1, 1]} : vector<8x96xbf16> to vector<8x8xbf16>
    %149 = vector.extract_strided_slice %108 {offsets = [0, 80], sizes = [8, 8], strides = [1, 1]} : vector<8x96xbf16> to vector<8x8xbf16>
    %cst_48 = arith.constant dense<0.000000e+00> : vector<8x8xf32>
    %150 = tpu.matmul %147, %148, %cst_48 {dimension_numbers = #tpu.dot_dimension_numbers<[1], [1], [0], [0], [0, 0, 1, 0], [], []>} : vector<8x8xbf16>, vector<8x8xbf16>, vector<8x8xf32> -> vector<8x8xf32>
    %151 = arith.addf %150, %2 : vector<8x8xf32>
    %cst_49 = arith.constant dense<0xFF800000> : vector<8xf32>
    %152 = vector.multi_reduction <maximumf>, %151, %cst_49 [1] : vector<8x8xf32> to vector<8xf32>
    %153 = vector.shape_cast %152 : vector<8xf32> to vector<8x1xf32>
    %154 = vector.broadcast %153 : vector<8x1xf32> to vector<8x8xf32>
    %155 = arith.subf %151, %154 : vector<8x8xf32>
    %156 = math.exp %155 : vector<8x8xf32>
    %cst_50 = arith.constant dense<0.000000e+00> : vector<8xf32>
    %157 = vector.multi_reduction <add>, %156, %cst_50 [1] : vector<8x8xf32> to vector<8xf32>
    %158 = vector.shape_cast %157 : vector<8xf32> to vector<8x1xf32>
    %159 = arith.truncf %156 : vector<8x8xf32> to vector<8x8xbf16>
    %cst_51 = arith.constant dense<0.000000e+00> : vector<8x8xf32>
    %160 = tpu.matmul %159, %149, %cst_51 {dimension_numbers = #tpu.dot_dimension_numbers<[1], [0], [0], [1], [0, 0, 1, 1], [], []>} : vector<8x8xbf16>, vector<8x8xbf16>, vector<8x8xf32> -> vector<8x8xf32>
    %161 = tpu.reciprocal %158 {approx = true} : vector<8x1xf32> -> vector<8x1xf32>
    %162 = vector.broadcast %161 : vector<8x1xf32> to vector<8x8xf32>
    %163 = arith.mulf %160, %162 : vector<8x8xf32>
    %164 = arith.truncf %163 : vector<8x8xf32> to vector<8x8xbf16>
    %c8_52 = arith.constant 8 : index
    %c16_53 = arith.constant 16 : index
    %165 = vector.load %arg15[%c8_52, %c16_53] : memref<16x32xbf16, #tpu.memory_space<vmem>>, vector<8x8xbf16>
    tpu.vector_store %arg15[%c8_52, %c16_53], %164 {strides = array<i32>} : memref<16x32xbf16, #tpu.memory_space<vmem>>, vector<8x8xbf16>,
    %166 = vector.extract_strided_slice %108 {offsets = [0, 24], sizes = [8, 8], strides = [1, 1]} : vector<8x96xbf16> to vector<8x8xbf16>
    %167 = vector.extract_strided_slice %108 {offsets = [0, 56], sizes = [8, 8], strides = [1, 1]} : vector<8x96xbf16> to vector<8x8xbf16>
    %168 = vector.extract_strided_slice %108 {offsets = [0, 88], sizes = [8, 8], strides = [1, 1]} : vector<8x96xbf16> to vector<8x8xbf16>
    %cst_54 = arith.constant dense<0.000000e+00> : vector<8x8xf32>
    %169 = tpu.matmul %166, %167, %cst_54 {dimension_numbers = #tpu.dot_dimension_numbers<[1], [1], [0], [0], [0, 0, 1, 0], [], []>} : vector<8x8xbf16>, vector<8x8xbf16>, vector<8x8xf32> -> vector<8x8xf32>
    %170 = arith.addf %169, %2 : vector<8x8xf32>
    %cst_55 = arith.constant dense<0xFF800000> : vector<8xf32>
    %171 = vector.multi_reduction <maximumf>, %170, %cst_55 [1] : vector<8x8xf32> to vector<8xf32>
    %172 = vector.shape_cast %171 : vector<8xf32> to vector<8x1xf32>
    %173 = vector.broadcast %172 : vector<8x1xf32> to vector<8x8xf32>
    %174 = arith.subf %170, %173 : vector<8x8xf32>
    %175 = math.exp %174 : vector<8x8xf32>
    %cst_56 = arith.constant dense<0.000000e+00> : vector<8xf32>
    %176 = vector.multi_reduction <add>, %175, %cst_56 [1] : vector<8x8xf32> to vector<8xf32>
    %177 = vector.shape_cast %176 : vector<8xf32> to vector<8x1xf32>
    %178 = arith.truncf %175 : vector<8x8xf32> to vector<8x8xbf16>
    %cst_57 = arith.constant dense<0.000000e+00> : vector<8x8xf32>
    %179 = tpu.matmul %178, %168, %cst_57 {dimension_numbers = #tpu.dot_dimension_numbers<[1], [0], [0], [1], [0, 0, 1, 1], [], []>} : vector<8x8xbf16>, vector<8x8xbf16>, vector<8x8xf32> -> vector<8x8xf32>
    %180 = tpu.reciprocal %177 {approx = true} : vector<8x1xf32> -> vector<8x1xf32>
    %181 = vector.broadcast %180 : vector<8x1xf32> to vector<8x8xf32>
    %182 = arith.mulf %179, %181 : vector<8x8xf32>
    %183 = arith.truncf %182 : vector<8x8xf32> to vector<8x8xbf16>
    %c8_58 = arith.constant 8 : index
    %c24_59 = arith.constant 24 : index
    %184 = vector.load %arg15[%c8_58, %c24_59] : memref<16x32xbf16, #tpu.memory_space<vmem>>, vector<8x8xbf16>
    tpu.vector_store %arg15[%c8_58, %c24_59], %183 {strides = array<i32>} : memref<16x32xbf16, #tpu.memory_space<vmem>>, vector<8x8xbf16>,
    %c0_60 = arith.constant 0 : index
    %c0_61 = arith.constant 0 : index
    %185 = vector.load %arg15[%c0_60, %c0_61] : memref<16x32xbf16, #tpu.memory_space<vmem>>, vector<16x32xbf16>
    %c0_62 = arith.constant 0 : index
    %c0_63 = arith.constant 0 : index
    %186 = vector.load %arg4[%c0_62, %c0_63] : memref<32x32xbf16, #tpu.memory_space<vmem>>, vector<32x32xbf16>
    %cst_64 = arith.constant dense<0.000000e+00> : vector<16x32xf32>
    %187 = tpu.matmul %185, %186, %cst_64 {dimension_numbers = #tpu.dot_dimension_numbers<[1], [0], [0], [1], [0, 0, 1, 1], [], []>} : vector<16x32xbf16>, vector<32x32xbf16>, vector<16x32xf32> -> vector<16x32xf32>
    %c0_65 = arith.constant 0 : index
    %c0_66 = arith.constant 0 : index
    %188 = vector.load %arg5[%c0_65, %c0_66] : memref<1x32xf32, #tpu.memory_space<vmem>>, vector<1x32xf32>
    %189 = vector.broadcast %188 : vector<1x32xf32> to vector<16x32xf32>
    %190 = arith.addf %187, %189 : vector<16x32xf32>
    %191 = arith.addf %1, %190 : vector<16x32xf32>
    %c0_67 = arith.constant 0 : index
    %c0_68 = arith.constant 0 : index
    %192 = vector.load %arg8[%c0_67, %c0_68] : memref<1x32xf32, #tpu.memory_space<vmem>>, vector<1x32xf32>
    %c0_69 = arith.constant 0 : index
    %c0_70 = arith.constant 0 : index
    %193 = vector.load %arg9[%c0_69, %c0_70] : memref<1x32xf32, #tpu.memory_space<vmem>>, vector<1x32xf32>
    %cst_71 = arith.constant dense<0.000000e+00> : vector<16xf32>
    %194 = vector.multi_reduction <add>, %191, %cst_71 [1] : vector<16x32xf32> to vector<16xf32>
    %195 = vector.shape_cast %194 : vector<16xf32> to vector<16x1xf32>
    %cst_72 = arith.constant 3.200000e+01 : f32
    %196 = vector.broadcast %cst_72 : f32 to vector<16x1xf32>
    %197 = arith.divf %195, %196 : vector<16x1xf32>
    %198 = vector.broadcast %197 : vector<16x1xf32> to vector<16x32xf32>
    %199 = arith.subf %191, %198 : vector<16x32xf32>
    %200 = arith.mulf %199, %199 : vector<16x32xf32>
    %cst_73 = arith.constant dense<0.000000e+00> : vector<16xf32>
    %201 = vector.multi_reduction <add>, %200, %cst_73 [1] : vector<16x32xf32> to vector<16xf32>
    %202 = vector.shape_cast %201 : vector<16xf32> to vector<16x1xf32>
    %cst_74 = arith.constant 3.200000e+01 : f32
    %203 = vector.broadcast %cst_74 : f32 to vector<16x1xf32>
    %204 = arith.divf %202, %203 : vector<16x1xf32>
    %205 = vector.broadcast %197 : vector<16x1xf32> to vector<16x32xf32>
    %206 = arith.subf %191, %205 : vector<16x32xf32>
    %cst_75 = arith.constant 9.99999974E-6 : f32
    %207 = vector.broadcast %cst_75 : f32 to vector<16x1xf32>
    %208 = arith.addf %204, %207 : vector<16x1xf32>
    %209 = math.rsqrt %208 : vector<16x1xf32>
    %210 = vector.broadcast %209 : vector<16x1xf32> to vector<16x32xf32>
    %211 = arith.mulf %206, %210 : vector<16x32xf32>
    %212 = vector.broadcast %192 : vector<1x32xf32> to vector<16x32xf32>
    %213 = arith.mulf %211, %212 : vector<16x32xf32>
    %214 = vector.broadcast %193 : vector<1x32xf32> to vector<16x32xf32>
    %215 = arith.addf %213, %214 : vector<16x32xf32>
    %216 = arith.truncf %215 : vector<16x32xf32> to vector<16x32xbf16>
    %c0_76 = arith.constant 0 : index
    %c0_77 = arith.constant 0 : index
    %217 = vector.load %arg10[%c0_76, %c0_77] : memref<32x128xbf16, #tpu.memory_space<vmem>>, vector<32x128xbf16>
    %cst_78 = arith.constant dense<0.000000e+00> : vector<16x128xf32>
    %218 = tpu.matmul %216, %217, %cst_78 {dimension_numbers = #tpu.dot_dimension_numbers<[1], [0], [0], [1], [0, 0, 1, 1], [], []>} : vector<16x32xbf16>, vector<32x128xbf16>, vector<16x128xf32> -> vector<16x128xf32>
    %c0_79 = arith.constant 0 : index
    %c0_80 = arith.constant 0 : index
    %219 = vector.load %arg11[%c0_79, %c0_80] : memref<1x128xf32, #tpu.memory_space<vmem>>, vector<1x128xf32>
    %220 = vector.broadcast %219 : vector<1x128xf32> to vector<16x128xf32>
    %221 = arith.addf %218, %220 : vector<16x128xf32>
    %cst_81 = arith.constant 5.000000e-01 : f32
    %222 = vector.broadcast %cst_81 : f32 to vector<16x128xf32>
    %223 = arith.mulf %222, %221 : vector<16x128xf32>
    %cst_82 = arith.constant 4.471500e-02 : f32
    %224 = vector.broadcast %cst_82 : f32 to vector<16x128xf32>
    %225 = arith.mulf %224, %221 : vector<16x128xf32>
    %226 = arith.mulf %225, %221 : vector<16x128xf32>
    %227 = arith.mulf %226, %221 : vector<16x128xf32>
    %228 = arith.addf %221, %227 : vector<16x128xf32>
    %cst_83 = arith.constant 0.797884583 : f32
    %229 = vector.broadcast %cst_83 : f32 to vector<16x128xf32>
    %230 = arith.mulf %229, %228 : vector<16x128xf32>
    %231 = math.tanh %230 : vector<16x128xf32>
    %cst_84 = arith.constant 1.000000e+00 : f32
    %232 = vector.broadcast %cst_84 : f32 to vector<16x128xf32>
    %233 = arith.addf %232, %231 : vector<16x128xf32>
    %234 = arith.mulf %223, %233 : vector<16x128xf32>
    %235 = arith.truncf %234 : vector<16x128xf32> to vector<16x128xbf16>
    %c0_85 = arith.constant 0 : index
    %c0_86 = arith.constant 0 : index
    %236 = vector.load %arg12[%c0_85, %c0_86] : memref<128x32xbf16, #tpu.memory_space<vmem>>, vector<128x32xbf16>
    %cst_87 = arith.constant dense<0.000000e+00> : vector<16x32xf32>
    %237 = tpu.matmul %235, %236, %cst_87 {dimension_numbers = #tpu.dot_dimension_numbers<[1], [0], [0], [1], [0, 0, 1, 1], [], []>} : vector<16x128xbf16>, vector<128x32xbf16>, vector<16x32xf32> -> vector<16x32xf32>
    %c0_88 = arith.constant 0 : index
    %c0_89 = arith.constant 0 : index
    %238 = vector.load %arg13[%c0_88, %c0_89] : memref<1x32xf32, #tpu.memory_space<vmem>>, vector<1x32xf32>
    %239 = vector.broadcast %238 : vector<1x32xf32> to vector<16x32xf32>
    %240 = arith.addf %237, %239 : vector<16x32xf32>
    %241 = arith.addf %191, %240 : vector<16x32xf32>
    %242 = vector.shape_cast %241 : vector<16x32xf32> to vector<2x8x32xf32>
    %c0_90 = arith.constant 0 : index
    %c0_91 = arith.constant 0 : index
    %c0_92 = arith.constant 0 : index
    %243 = vector.load %arg14[%c0_90, %c0_91, %c0_92] : memref<2x8x32xf32, #tpu.memory_space<vmem>>, vector<2x8x32xf32>
    tpu.vector_store %arg14[%c0_90, %c0_91, %c0_92], %242 {strides = array<i32>} : memref<2x8x32xf32, #tpu.memory_space<vmem>>, vector<2x8x32xf32>,
    return
  }
  func.func @transform_0(%arg0: i32) -> (i32, i32, i32) {
    %c0_i32 = arith.constant 0 : i32
    %c0_i32_0 = arith.constant 0 : i32
    %c0_i32_1 = arith.constant 0 : i32
    return %arg0, %c0_i32, %c0_i32_0 : i32, i32, i32
  }
  func.func @transform_1(%arg0: i32) -> (i32, i32) {
    %c0_i32 = arith.constant 0 : i32
    %c0_i32_0 = arith.constant 0 : i32
    %c0_i32_1 = arith.constant 0 : i32
    return %c0_i32, %c0_i32_0 : i32, i32
  }
  func.func @transform_2(%arg0: i32) -> (i32, i32) {
    %c0_i32 = arith.constant 0 : i32
    %c0_i32_0 = arith.constant 0 : i32
    %c0_i32_1 = arith.constant 0 : i32
    return %c0_i32, %c0_i32_0 : i32, i32
  }
  func.func @transform_3(%arg0: i32) -> (i32, i32) {
    %c0_i32 = arith.constant 0 : i32
    %c0_i32_0 = arith.constant 0 : i32
    %c0_i32_1 = arith.constant 0 : i32
    return %c0_i32, %c0_i32_0 : i32, i32
  }
  func.func @transform_4(%arg0: i32) -> (i32, i32) {
    %c0_i32 = arith.constant 0 : i32
    %c0_i32_0 = arith.constant 0 : i32
    %c0_i32_1 = arith.constant 0 : i32
    return %c0_i32, %c0_i32_0 : i32, i32
  }
  func.func @transform_5(%arg0: i32) -> (i32, i32) {
    %c0_i32 = arith.constant 0 : i32
    %c0_i32_0 = arith.constant 0 : i32
    %c0_i32_1 = arith.constant 0 : i32
    return %c0_i32, %c0_i32_0 : i32, i32
  }
  func.func @transform_6(%arg0: i32) -> (i32, i32) {
    %c0_i32 = arith.constant 0 : i32
    %c0_i32_0 = arith.constant 0 : i32
    %c0_i32_1 = arith.constant 0 : i32
    return %c0_i32, %c0_i32_0 : i32, i32
  }
  func.func @transform_7(%arg0: i32) -> (i32, i32) {
    %c0_i32 = arith.constant 0 : i32
    %c0_i32_0 = arith.constant 0 : i32
    %c0_i32_1 = arith.constant 0 : i32
    return %c0_i32, %c0_i32_0 : i32, i32
  }
  func.func @transform_8(%arg0: i32) -> (i32, i32) {
    %c0_i32 = arith.constant 0 : i32
    %c0_i32_0 = arith.constant 0 : i32
    %c0_i32_1 = arith.constant 0 : i32
    return %c0_i32, %c0_i32_0 : i32, i32
  }
  func.func @transform_9(%arg0: i32) -> (i32, i32) {
    %c0_i32 = arith.constant 0 : i32
    %c0_i32_0 = arith.constant 0 : i32
    %c0_i32_1 = arith.constant 0 : i32
    return %c0_i32, %c0_i32_0 : i32, i32
  }
  func.func @transform_10(%arg0: i32) -> (i32, i32) {
    %c0_i32 = arith.constant 0 : i32
    %c0_i32_0 = arith.constant 0 : i32
    %c0_i32_1 = arith.constant 0 : i32
    return %c0_i32, %c0_i32_0 : i32, i32
  }
  func.func @transform_11(%arg0: i32) -> (i32, i32) {
    %c0_i32 = arith.constant 0 : i32
    %c0_i32_0 = arith.constant 0 : i32
    %c0_i32_1 = arith.constant 0 : i32
    return %c0_i32, %c0_i32_0 : i32, i32
  }
  func.func @transform_12(%arg0: i32) -> (i32, i32) {
    %c0_i32 = arith.constant 0 : i32
    %c0_i32_0 = arith.constant 0 : i32
    %c0_i32_1 = arith.constant 0 : i32
    return %c0_i32, %c0_i32_0 : i32, i32
  }
  func.func @transform_13(%arg0: i32) -> (i32, i32, i32) {
    %c0_i32 = arith.constant 0 : i32
    %c0_i32_0 = arith.constant 0 : i32
    %c0_i32_1 = arith.constant 0 : i32
    return %arg0, %c0_i32, %c0_i32_0 : i32, i32, i32
  }
}

</mosaic_0001>

<bundles_post_ra>
// kernel: tpu_custom_call.1
= control target key start
LH: loop header
LB: loop body
LE: loop exit
PB: predicated region body
PF: predicated region fallthrough
CT: control target
= control target key end

     0   :  { %18 = vsyncpa [#allocation4], 0  ;;  %s2751_s0 = inlined_call_operand.hbm [shape: f32[2,8,32], index: 0, kind: input, shape index: {}]   ;;  %s2752_s1 = inlined_call_operand.hbm [shape: f32[8,8], index: 1, kind: input, shape index: {}]   ;;  %s2753_s2 = inlined_call_operand.hbm [shape: bf16[32,96], index: 2, kind: input, shape index: {}]   ;;  %s2754_s3 = inlined_call_operand.hbm [shape: bf16[32,32], index: 3, kind: input, shape index: {}]   ;;  %s2755_s4 = inlined_call_operand.hbm [shape: f32[1,32], index: 4, kind: input, shape index: {}]   ;;  %s2756_s5 = inlined_call_operand.hbm [shape: f32[1,32], index: 5, kind: input, shape index: {}]   ;;  %s2757_s6 = inlined_call_operand.hbm [shape: f32[1,32], index: 6, kind: input, shape index: {}]   ;;  %s2758_s7 = inlined_call_operand.hbm [shape: f32[1,32], index: 7, kind: input, shape index: {}]   ;;  %s2759_s8 = inlined_call_operand.hbm [shape: f32[1,32], index: 8, kind: input, shape index: {}]   ;;  %s2760_s9 = inlined_call_operand.hbm [shape: bf16[32,128], index: 9, kind: input, shape index: {}]   ;;  %s2761_s10 = inlined_call_operand.hbm [shape: f32[1,128], index: 10, kind: input, shape index: {}]   ;;  %s2762_s11 = inlined_call_operand.hbm [shape: bf16[128,32], index: 11, kind: input, shape index: {}]   ;;  %s2763_s12 = inlined_call_operand.hbm [shape: f32[1,32], index: 12, kind: input, shape index: {}]   ;;  %s2764_s13 = inlined_call_operand.hbm [shape: f32[2,8,32], index: 13, kind: output, shape index: {}]  }
   0x1   :  { %19 = vsyncpa [#allocation7], 0 }
   0x2   :  { %20 = vsyncpa [#allocation10], 0 }
   0x3   :  { %21 = vsyncpa [#allocation13], 0 }
   0x4   :  { %22 = vsyncpa [#allocation16], 0 }
   0x5   :  { %23 = vsyncpa [#allocation19], 0 }
   0x6   :  { %24 = vsyncpa [#allocation22], 0 }
   0x7   :  { %25 = vsyncpa [#allocation5], 0  ;;  %s2235_s25 = smov [#allocation6]   ;;  %s1911_s29 = scalar_lea.hbm %s2752_s1, 128 }
   0x8   :  { %s44_s26 = sshll.u32 %s2235_s25, 4  ;;  %p1912_p0 = scmp.ne.s32.totalorder %s2752_s1, %s1911_s29  ;;  %s45_s26 = int_to_ptr.vmem [resolvable:$true] %s44_s26 }
   0x9   :  { %p1915_p1 = scmp.lt.u32.totalorder %s1911_s29, %s2752_s1 }
   0xb   :  { %p1917_p2 = pnand %p1915_p1, %p1912_p0 }
   0xd   :  { %1920 = shalt.err (!%p1917_p2)
}
   0xe   :  { %s1921_s17 = scalar_lea.vmem %s45_s26, 128  ;;  %p1926_p4 = scmp.lt.s32.totalorder %s45_s26, %s45_s26 }
   0xf   :  { %p1922_p3 = scmp.ne.s32.totalorder %s45_s26, %s1921_s17  ;;  %p1927_p5 = scmp.lt.s32.totalorder %s1921_s17, %s1921_s17 }
  0x11   :  { %p1928_p6 = por %p1927_p5, %p1926_p4 }
  0x13   :  { %p1929_p7 = pnand %p1928_p6, %p1922_p3 }
  0x15   :  { %1932 = shalt.err (!%p1929_p7)
}
  0x16   :  { %47 = dma.hbm_to_vmem [thread:$0]  %s2752_s1, 128, %s45_s26, [#allocation7]  }
  0x17   :  { %s2236_s20 = smov [#allocation9]   ;;  %s2237_s22 = smov [#allocation12]  }
  0x18   :  { %s65_s21 = sshll.u32 %s2236_s20, 4  ;;  %s88_s23 = sshll.u32 %s2237_s22, 4  ;;  %s66_s21 = int_to_ptr.vmem [resolvable:$true] %s65_s21  ;;  %s89_s23 = int_to_ptr.vmem [resolvable:$true] %s88_s23 }
  0x19   :  { %s1933_s27 = scalar_lea.hbm %s2754_s3, 256 }
  0x1a   :  { %p1934_p8 = scmp.ne.s32.totalorder %s2754_s3, %s1933_s27  ;;  %p1937_p9 = scmp.lt.u32.totalorder %s1933_s27, %s2754_s3 }
  0x1c   :  { %p1939_p10 = pnand %p1937_p9, %p1934_p8 }
  0x1e   :  { %1942 = shalt.err (!%p1939_p10)
}
  0x1f   :  { %s1943_s1 = scalar_lea.vmem %s66_s21, 256  ;;  %p1948_p12 = scmp.lt.s32.totalorder %s66_s21, %s66_s21 }
  0x20   :  { %p1944_p11 = scmp.ne.s32.totalorder %s66_s21, %s1943_s1  ;;  %p1949_p13 = scmp.lt.s32.totalorder %s1943_s1, %s1943_s1 }
  0x22   :  { %p1950_p0 = por %p1949_p13, %p1948_p12 }
  0x24   :  { %p1951_p1 = pnand %p1950_p0, %p1944_p11 }
  0x26   :  { %1954 = shalt.err (!%p1951_p1)
}
  0x27   :  { %s2238_s26 = smov 64   ;;  %s2239_s15 = smov 4  }
  0x28   :  { %71 = dma.hbm_to_vmem [thread:$0]  %s2754_s3, 256, %s66_s21, [#allocation10], %s2238_s26, %s2238_s26, %s2239_s15  }
  0x29   :  { %s1955_s20 = scalar_lea.hbm %s2756_s5, 16 }
  0x2a   :  { %p1956_p2 = scmp.ne.s32.totalorder %s2756_s5, %s1955_s20  ;;  %p1959_p3 = scmp.lt.u32.totalorder %s1955_s20, %s2756_s5 }
  0x2c   :  { %p1961_p4 = pnand %p1959_p3, %p1956_p2 }
  0x2e   :  { %1964 = shalt.err (!%p1961_p4)
}
  0x2f   :  { %s1965_s28 = scalar_lea.vmem %s89_s23, 16  ;;  %s1969_s29 = scalar_lea.vmem %s89_s23, 32 }
  0x30   :  { %p1966_p5 = scmp.ne.s32.totalorder %s89_s23, %s1965_s28  ;;  %p1970_p6 = scmp.lt.s32.totalorder %s89_s23, %s89_s23 }
  0x31   :  { %p1971_p7 = scmp.lt.s32.totalorder %s1969_s29, %s1965_s28 }
  0x33   :  { %p1972_p8 = por %p1971_p7, %p1970_p6 }
  0x35   :  { %p1973_p9 = pnand %p1972_p8, %p1966_p5 }
  0x37   :  { %1976 = shalt.err (!%p1973_p9)
}
  0x38   :  { %91 = dma.hbm_to_vmem [thread:$0]  %s2756_s5, 16, %s89_s23, [#allocation13]  }
  0x39   :  { %s2240_s30 = smov [#allocation15]   ;;  %s2241_s1 = smov [#allocation18]  }
  0x3a   :  { %s108_s14 = sshll.u32 %s2240_s30, 4  ;;  %s127_s16 = sshll.u32 %s2241_s1, 4  ;;  %s109_s14 = int_to_ptr.vmem [resolvable:$true] %s108_s14  ;;  %s128_s16 = int_to_ptr.vmem [resolvable:$true] %s127_s16 }
  0x3b   :  { %s1977_s19 = scalar_lea.hbm %s2758_s7, 16 }
  0x3c   :  { %p1978_p10 = scmp.ne.s32.totalorder %s2758_s7, %s1977_s19  ;;  %p1981_p11 = scmp.lt.u32.totalorder %s1977_s19, %s2758_s7 }
  0x3e   :  { %p1983_p12 = pnand %p1981_p11, %p1978_p10 }
  0x40   :  { %1986 = shalt.err (!%p1983_p12)
}
  0x41   :  { %s1987_s5 = scalar_lea.vmem %s109_s14, 16  ;;  %s1991_s23 = scalar_lea.vmem %s109_s14, 32 }
  0x42   :  { %p1988_p13 = scmp.ne.s32.totalorder %s109_s14, %s1987_s5  ;;  %p1992_p0 = scmp.lt.s32.totalorder %s109_s14, %s109_s14 }
  0x43   :  { %p1993_p1 = scmp.lt.s32.totalorder %s1991_s23, %s1987_s5 }
  0x45   :  { %p1994_p2 = por %p1993_p1, %p1992_p0 }
  0x47   :  { %p1995_p3 = pnand %p1994_p2, %p1988_p13 }
  0x49   :  { %1998 = shalt.err (!%p1995_p3)
}
  0x4a   :  { %111 = dma.hbm_to_vmem [thread:$0]  %s2758_s7, 16, %s109_s14, [#allocation16]  }
  0x4b   :  { %s1999_s21 = scalar_lea.hbm %s2760_s9, 256 }
  0x4c   :  { %p2000_p4 = scmp.ne.s32.totalorder %s2760_s9, %s1999_s21  ;;  %p2003_p5 = scmp.lt.u32.totalorder %s1999_s21, %s2760_s9 }
  0x4e   :  { %p2005_p6 = pnand %p2003_p5, %p2000_p4 }
  0x50   :  { %2008 = shalt.err (!%p2005_p6)
}
  0x51   :  { %s2009_s19 = scalar_lea.vmem %s128_s16, 256  ;;  %p2014_p8 = scmp.lt.s32.totalorder %s128_s16, %s128_s16 }
  0x52   :  { %p2010_p7 = scmp.ne.s32.totalorder %s128_s16, %s2009_s19  ;;  %p2015_p9 = scmp.lt.s32.totalorder %s2009_s19, %s2009_s19 }
  0x54   :  { %p2016_p10 = por %p2015_p9, %p2014_p8 }
  0x56   :  { %p2017_p11 = pnand %p2016_p10, %p2010_p7 }
  0x58   :  { %2020 = shalt.err (!%p2017_p11)
}
  0x59   :  { %133 = dma.hbm_to_vmem [thread:$0]  %s2760_s9, 256, %s128_s16, [#allocation19], %s2238_s26, %s2238_s26, %s2239_s15  }
  0x5a   :  { %s2242_s20 = smov [#allocation21]   ;;  %s2243_s24 = smov [#allocation3]  }
  0x5b   :  { %s149_s22 = sshll.u32 %s2242_s20, 4  ;;  %s31_s25 = sshll.u32 %s2243_s24, 4  ;;  %s150_s22 = int_to_ptr.vmem [resolvable:$true] %s149_s22  ;;  %s32_s25 = int_to_ptr.vmem [resolvable:$true] %s31_s25 }
  0x5c   :  { %s2021_s27 = scalar_lea.hbm %s2762_s11, 1024 }
  0x5d   :  { %p2022_p12 = scmp.ne.s32.totalorder %s2762_s11, %s2021_s27  ;;  %p2025_p13 = scmp.lt.u32.totalorder %s2021_s27, %s2762_s11 }
  0x5f   :  { %p2027_p0 = pnand %p2025_p13, %p2022_p12 }
  0x61   :  { %2030 = shalt.err (!%p2027_p0)
}
  0x62   :  { %s2031_s9 = scalar_lea.vmem %s150_s22, 1024  ;;  %p2036_p2 = scmp.lt.s32.totalorder %s150_s22, %s150_s22 }
  0x63   :  { %p2032_p1 = scmp.ne.s32.totalorder %s150_s22, %s2031_s9  ;;  %p2037_p3 = scmp.lt.s32.totalorder %s2031_s9, %s2031_s9 }
  0x65   :  { %p2038_p4 = por %p2037_p3, %p2036_p2 }
  0x67   :  { %p2039_p5 = pnand %p2038_p4, %p2032_p1 }
  0x69   :  { %2042 = shalt.err (!%p2039_p5)
}
  0x6a   :  { %155 = dma.hbm_to_vmem [thread:$0]  %s2762_s11, 1024, %s150_s22, [#allocation22], %s2238_s26, %s2238_s26, %s2239_s15  }
  0x6b   :  { %s2043_s18 = scalar_lea.hbm %s2751_s0, 256 }
  0x6c   :  { %p2044_p6 = scmp.ne.s32.totalorder %s2751_s0, %s2043_s18  ;;  %p2047_p7 = scmp.lt.u32.totalorder %s2043_s18, %s2751_s0 }
  0x6e   :  { %p2049_p8 = pnand %p2047_p7, %p2044_p6 }
  0x70   :  { %2052 = shalt.err (!%p2049_p8)
}
  0x71   :  { %s2053_s24 = scalar_lea.vmem %s32_s25, 256  ;;  %p2058_p10 = scmp.lt.s32.totalorder %s32_s25, %s32_s25 }
  0x72   :  { %p2054_p9 = scmp.ne.s32.totalorder %s32_s25, %s2053_s24  ;;  %p2059_p11 = scmp.lt.s32.totalorder %s2053_s24, %s2053_s24 }
  0x74   :  { %p2060_p12 = por %p2059_p11, %p2058_p10 }
  0x76   :  { %p2061_p13 = pnand %p2060_p12, %p2054_p9 }
  0x78   :  { %2064 = shalt.err (!%p2061_p13)
}
  0x79   :  { %s2244_s11 = smov 128   ;;  %s2245_s22 = smov 8  }
  0x7a   :  { %37 = dma.hbm_to_vmem [thread:$0]  %s2751_s0, 256, %s32_s25, [#allocation4], %s2244_s11, %s2244_s11, %s2245_s22  }
  0x7b   :  { %s2246_s27 = smov [#allocation8]   ;;  %s2247_s29 = smov [#allocation11]  }
  0x7c   :  { %s53_s28 = sshll.u32 %s2246_s27, 4  ;;  %s78_s3 = sshll.u32 %s2247_s29, 4  ;;  %s54_s28 = int_to_ptr.vmem [resolvable:$true] %s53_s28  ;;  %s79_s3 = int_to_ptr.vmem [resolvable:$true] %s78_s3 }
  0x7d   :  { %s2065_s16 = scalar_lea.hbm %s2753_s2, 256 }
  0x7e   :  { %p2066_p0 = scmp.ne.s32.totalorder %s2753_s2, %s2065_s16  ;;  %p2069_p1 = scmp.lt.u32.totalorder %s2065_s16, %s2753_s2 }
  0x80   :  { %p2071_p2 = pnand %p2069_p1, %p2066_p0 }
  0x82   :  { %2074 = shalt.err (!%p2071_p2)
}
  0x83   :  { %s2075_s0 = scalar_lea.vmem %s54_s28, 256  ;;  %p2080_p4 = scmp.lt.s32.totalorder %s54_s28, %s54_s28 }
  0x84   :  { %p2076_p3 = scmp.ne.s32.totalorder %s54_s28, %s2075_s0  ;;  %p2081_p5 = scmp.lt.s32.totalorder %s2075_s0, %s2075_s0 }
  0x86   :  { %p2082_p6 = por %p2081_p5, %p2080_p4 }
  0x88   :  { %p2083_p7 = pnand %p2082_p6, %p2076_p3 }
  0x8a   :  { %2086 = shalt.err (!%p2083_p7)
}
  0x8b   :  { %59 = dma.hbm_to_vmem [thread:$0]  %s2753_s2, 256, %s54_s28, [#allocation7], %s2238_s26, %s2238_s26, %s2239_s15  }
  0x8c   :  { %s2087_s20 = scalar_lea.hbm %s2755_s4, 16 }
  0x8d   :  { %p2088_p8 = scmp.ne.s32.totalorder %s2755_s4, %s2087_s20  ;;  %p2091_p9 = scmp.lt.u32.totalorder %s2087_s20, %s2755_s4 }
  0x8f   :  { %p2093_p10 = pnand %p2091_p9, %p2088_p8 }
  0x91   :  { %2096 = shalt.err (!%p2093_p10)
}
  0x92   :  { %s2097_s29 = scalar_lea.vmem %s79_s3, 16  ;;  %s2101_s21 = scalar_lea.vmem %s79_s3, 32 }
  0x93   :  { %p2098_p11 = scmp.ne.s32.totalorder %s79_s3, %s2097_s29  ;;  %p2102_p12 = scmp.lt.s32.totalorder %s79_s3, %s79_s3 }
  0x94   :  { %p2103_p13 = scmp.lt.s32.totalorder %s2101_s21, %s2097_s29 }
  0x96   :  { %p2104_p0 = por %p2103_p13, %p2102_p12 }
  0x98   :  { %p2105_p1 = pnand %p2104_p0, %p2098_p11 }
  0x9a   :  { %2108 = shalt.err (!%p2105_p1)
}
  0x9b   :  { %81 = dma.hbm_to_vmem [thread:$0]  %s2755_s4, 16, %s79_s3, [#allocation10]  }
  0x9c   :  { %s2248_s28 = smov [#allocation14]   ;;  %s2249_s16 = smov [#allocation17]  }
  0x9d   :  { %s98_s9 = sshll.u32 %s2248_s28, 4  ;;  %s118_s30 = sshll.u32 %s2249_s16, 4  ;;  %s99_s9 = int_to_ptr.vmem [resolvable:$true] %s98_s9  ;;  %s119_s30 = int_to_ptr.vmem [resolvable:$true] %s118_s30 }
  0x9e   :  { %s2109_s18 = scalar_lea.hbm %s2757_s6, 16 }
  0x9f   :  { %p2110_p2 = scmp.ne.s32.totalorder %s2757_s6, %s2109_s18  ;;  %p2113_p3 = scmp.lt.u32.totalorder %s2109_s18, %s2757_s6 }
  0xa1   :  { %p2115_p4 = pnand %p2113_p3, %p2110_p2 }
  0xa3   :  { %2118 = shalt.err (!%p2115_p4)
}
  0xa4   :  { %s2119_s4 = scalar_lea.vmem %s99_s9, 16  ;;  %s2123_s3 = scalar_lea.vmem %s99_s9, 32 }
  0xa5   :  { %p2120_p5 = scmp.ne.s32.totalorder %s99_s9, %s2119_s4  ;;  %p2124_p6 = scmp.lt.s32.totalorder %s99_s9, %s99_s9 }
  0xa6   :  { %p2125_p7 = scmp.lt.s32.totalorder %s2123_s3, %s2119_s4 }
  0xa8   :  { %p2126_p8 = por %p2125_p7, %p2124_p6 }
  0xaa   :  { %p2127_p9 = pnand %p2126_p8, %p2120_p5 }
  0xac   :  { %2130 = shalt.err (!%p2127_p9)
}
  0xad   :  { %101 = dma.hbm_to_vmem [thread:$0]  %s2757_s6, 16, %s99_s9, [#allocation13]  }
  0xae   :  { %s2131_s23 = scalar_lea.hbm %s2759_s8, 16 }
  0xaf   :  { %p2132_p10 = scmp.ne.s32.totalorder %s2759_s8, %s2131_s23  ;;  %p2135_p11 = scmp.lt.u32.totalorder %s2131_s23, %s2759_s8 }
  0xb1   :  { %p2137_p12 = pnand %p2135_p11, %p2132_p10 }
  0xb3   :  { %2140 = shalt.err (!%p2137_p12)
}
  0xb4   :  { %s2141_s15 = scalar_lea.vmem %s119_s30, 16  ;;  %s2145_s28 = scalar_lea.vmem %s119_s30, 32 }
  0xb5   :  { %p2142_p13 = scmp.ne.s32.totalorder %s119_s30, %s2141_s15  ;;  %p2146_p0 = scmp.lt.s32.totalorder %s119_s30, %s119_s30 }
  0xb6   :  { %p2147_p1 = scmp.lt.s32.totalorder %s2145_s28, %s2141_s15 }
  0xb8   :  { %p2148_p2 = por %p2147_p1, %p2146_p0 }
  0xba   :  { %p2149_p3 = pnand %p2148_p2, %p2142_p13 }
  0xbc   :  { %2152 = shalt.err (!%p2149_p3)
}
  0xbd   :  { %121 = dma.hbm_to_vmem [thread:$0]  %s2759_s8, 16, %s119_s30, [#allocation16]  }
  0xbe   :  { %s2250_s16 = smov [#allocation20]   ;;  %s2251_s17 = smov [#allocation23]  }
  0xbf   :  { %s140_s1 = sshll.u32 %s2250_s16, 4  ;;  %s162_s18 = sshll.u32 %s2251_s17, 4  ;;  %s141_s1 = int_to_ptr.vmem [resolvable:$true] %s140_s1  ;;  %s163_s18 = int_to_ptr.vmem [resolvable:$true] %s162_s18 }
  0xc0   :  { %s2153_s19 = scalar_lea.hbm %s2761_s10, 16 }
  0xc1   :  { %p2154_p4 = scmp.ne.s32.totalorder %s2761_s10, %s2153_s19  ;;  %p2157_p5 = scmp.lt.u32.totalorder %s2153_s19, %s2761_s10 }
  0xc3   :  { %p2159_p6 = pnand %p2157_p5, %p2154_p4 }
  0xc5   :  { %2162 = shalt.err (!%p2159_p6)
}
  0xc6   :  { %s2163_s8 = scalar_lea.vmem %s141_s1, 16  ;;  %s2167_s30 = scalar_lea.vmem %s141_s1, 32 }
  0xc7   :  { %p2164_p7 = scmp.ne.s32.totalorder %s141_s1, %s2163_s8  ;;  %p2168_p8 = scmp.lt.s32.totalorder %s141_s1, %s141_s1 }
  0xc8   :  { %p2169_p9 = scmp.lt.s32.totalorder %s2167_s30, %s2163_s8 }
  0xca   :  { %p2170_p10 = por %p2169_p9, %p2168_p8 }
  0xcc   :  { %p2171_p11 = pnand %p2170_p10, %p2164_p7 }
  0xce   :  { %2174 = shalt.err (!%p2171_p11)
}
  0xcf   :  { %143 = dma.hbm_to_vmem [thread:$0]  %s2761_s10, 16, %s141_s1, [#allocation19]  }
  0xd0   :  { %s2175_s27 = scalar_lea.hbm %s2763_s12, 16 }
  0xd1   :  { %p2176_p12 = scmp.ne.s32.totalorder %s2763_s12, %s2175_s27  ;;  %p2179_p13 = scmp.lt.u32.totalorder %s2175_s27, %s2763_s12 }
  0xd3   :  { %p2181_p0 = pnand %p2179_p13, %p2176_p12 }
  0xd5   :  { %2184 = shalt.err (!%p2181_p0)
}
  0xd6   :  { %s2185_s28 = scalar_lea.vmem %s163_s18, 16  ;;  %s2189_s6 = scalar_lea.vmem %s163_s18, 32 }
  0xd7   :  { %p2186_p1 = scmp.ne.s32.totalorder %s163_s18, %s2185_s28  ;;  %p2190_p2 = scmp.lt.s32.totalorder %s163_s18, %s163_s18 }
  0xd8   :  { %p2191_p3 = scmp.lt.s32.totalorder %s2189_s6, %s2185_s28 }
  0xda   :  { %p2192_p4 = por %p2191_p3, %p2190_p2 }
  0xdc   :  { %p2193_p5 = pnand %p2192_p4, %p2186_p1 }
  0xde   :  { %2196 = shalt.err (!%p2193_p5)
}
  0xdf   :  { %165 = dma.hbm_to_vmem [thread:$0]  %s2763_s12, 16, %s163_s18, [#allocation22]  }
  0xe0   :  { %2219 = dma.done.wait [#allocation4], 256  }
  0xe1   :  { %2220 = vsyncadd [#allocation4], 4294967040 }
  0xe2   :  { %2221 = dma.done.wait [#allocation7], 384  }
  0xe3   :  { %2222 = vsyncadd [#allocation7], 4294966912 }
  0xe4   :  { %2223 = dma.done.wait [#allocation10], 272  }
  0xe5   :  { %2224 = vsyncadd [#allocation10], 4294967024 }
  0xe6   :  { %2225 = dma.done.wait [#allocation13], 32  }
  0xe7   :  { %2226 = vsyncadd [#allocation13], 4294967264 }
  0xe8   :  { %2227 = dma.done.wait [#allocation16], 32  }
  0xe9   :  { %2228 = vsyncadd [#allocation16], 4294967264 }
  0xea   :  { %2229 = dma.done.wait [#allocation19], 272  }
  0xeb   :  { %2230 = vsyncadd [#allocation19], 4294967024 }
  0xec   :  { %2231 = dma.done.wait [#allocation22], 1040  }
  0xed   :  { %2232 = vsyncadd [#allocation22], 4294966256  ;;  %vm211_vm0 = vcmask 261120   ;;  %v2508_v0 = vld [vmem:[#allocation3] sm:$0xff]  ;;  %v2510_v1 = vld [vmem:[#allocation3 + $0x8] sm:$0xff]  ;;  %v2252_v15 = vmov 0.0  }
  0xee   :  { %v212_v2 = vsel %vm211_vm0, %v2508_v0, 0.0  ;;  %v215_v3 = vsel %vm211_vm0, %v2510_v1, 0.0  ;;  %v1853_v14 = vld [vmem:[#allocation8] sm:$0xff]   ;;  %1681 = vmatprep.subr.bf16.mxu0 %v2252_v15  ;;  %1701 = vmatprep.subr.bf16.mxu1 %v2252_v15  ;;  %v1854_v16 = vld [vmem:[#allocation8 + $0x8] sm:$0xff]   ;;  %vm2253_vm1 = vmmov 0   ;;  %s2254_s12 = smov 88  }
  0xef   :  { %213 = vadd.xlane.f32.xlu0 %v212_v2  ;;  %1682 = vmatpush3.bf16.msra.mxu0 %v1853_v14  ;;  %v1591_v25 = vld [vmem:[#allocation12] ss:$0 sm:$0xff]  ;;  %v1592_v29 = vld [vmem:[#allocation14] ss:$0 sm:$0xff]  ;;  %s2255_s16 = smov 96   ;;  %s2256_s1 = smov 120  }
  0xf0   :  { %1685 = vmatprep.mubr.msk.bf16.mxu0 %vm2253_vm1, %v2252_v15  ;;  %1683 = vmatprep.subr.bf16.mxu0 %v2252_v15  ;;  %s2257_s17 = smov 112   ;;  %s2258_s18 = smov 80   ;;  %vm320_vm2 = vcmask 64512   ;;  %vm382_vm3 = vcmask 1043456   ;;  %v208_v2 = vld [vmem:[#allocation6] sm:$0xff]  ;;  %vm429_vm4 = vcmask 60416  }
  0xf1   :  { %1703 = vmatprep.mubr.msk.bf16.mxu1 %vm2253_vm1, %v2252_v15  ;;  %s2259_s0 = smov 104   ;;  %s2260_s25 = smov 72   ;;  %vm895_vm5 = vcmask 64516   ;;  %vm546_vm6 = vcmask 126016   ;;  %vm663_vm7 = vcmask 191616   ;;  %vm780_vm8 = vcmask 257216  }
  0xf2   :  { %s2261_s19 = smov 48   ;;  %s2262_s7 = smov 56   ;;  %vm1013_vm9 = vcmask 130116   ;;  %vm1131_vm10 = vcmask 195716   ;;  %vm1249_vm11 = vcmask 261316  }
  0xf3   :  { %216 = vadd.xlane.f32.xlu0 %v215_v3  ;;  %1684 = vmatpush3.bf16.msra.mxu0 %v1854_v16  ;;  %s2263_s4 = smov 40   ;;  %s2265_s3 = smov 16  }
  0xf4   :  { %1689 = vmatprep.subr.bf16.mxu0 %v2252_v15  ;;  %s2266_s14 = smov [#allocation24]  }
  0xf5   :  { %s1573_s8 = sshll.u32 %s2266_s14, 4  ;;  %s1574_s8 = int_to_ptr.vmem [resolvable:$true] %s1573_s8 }
  0xf6   :  { %s2197_s30 = scalar_lea.vmem %s1574_s8, 256  ;;  %p2202_p7 = scmp.lt.s32.totalorder %s1574_s8, %s1574_s8 }
  0xf7   :  { %p2198_p6 = scmp.ne.s32.totalorder %s1574_s8, %s2197_s30  ;;  %p2203_p8 = scmp.lt.s32.totalorder %s2197_s30, %s2197_s30 }
  0xf9   :  { %p2204_p9 = por %p2203_p8, %p2202_p7 }
  0xfb   :  { %p2205_p10 = pnand %p2204_p9, %p2198_p6 }
 0x17c   :  { %v214_v4 = vpop.xlane.xlu0 %213 }
 0x17d   :  { %v219_v5 = vmul.f32 0.03125, %v214_v4 }
 0x17f   :  { %v221_v6 = vsub.f32 %v2508_v0, %v219_v5 }
 0x180   :  { %v217_v7 = vpop.xlane.xlu0 %216 }
 0x181   :  { %v220_v8 = vmul.f32 0.03125, %v217_v7  ;;  %v223_v9 = vmul.f32 %v221_v6, %v221_v6 }
 0x183   :  { %v222_v10 = vsub.f32 %v2510_v1, %v220_v8  ;;  %v225_v11 = vsel %vm211_vm0, %v223_v9, 0.0 }
 0x184   :  { %226 = vadd.xlane.f32.xlu1 %v225_v11 }
 0x185   :  { %v224_v12 = vmul.f32 %v222_v10, %v222_v10 }
 0x187   :  { %v228_v13 = vsel %vm211_vm0, %v224_v12, 0.0 }
 0x188   :  { %229 = vadd.xlane.f32.xlu1 %v228_v13 }
 0x211   :  { %v227_v17 = vpop.xlane.xlu1 %226 }
 0x212   :  { %v231_v18 = vmul.f32 0.03125, %v227_v17 }
 0x214   :  { %v233_v19 = vadd.f32 1e-05, %v231_v18 }
 0x215   :  { %v230_v20 = vpop.xlane.xlu1 %229 }
 0x216   :  { %1867 = vrsqrt.f32 %v233_v19  ;;  %v232_v21 = vmul.f32 0.03125, %v230_v20 }
 0x218   :  { %v234_v22 = vadd.f32 1e-05, %v232_v21 }
 0x21a   :  { %1869 = vrsqrt.f32 %v234_v22 }
 0x220   :  { %v1868_v23 = vpop.eup %1867 }
 0x221   :  { %v237_v24 = vmul.f32 %v1868_v23, %v221_v6 }
 0x223   :  { %v245_v28 = vmul.f32 %v1591_v25, %v237_v24 }
 0x224   :  { %v1870_v26 = vpop.eup %1869 }
 0x225   :  { %v238_v27 = vmul.f32 %v1870_v26, %v222_v10  ;;  %v253_v31 = vadd.f32 %v1592_v29, %v245_v28 }
 0x227   :  { %v246_v30 = vmul.f32 %v1591_v25, %v238_v27 }
 0x229   :  { %v254_v32 = vadd.f32 %v1592_v29, %v246_v30 }
 0x22b   :  { %v255_v33 = vpack.c.bf16 %v254_v32, %v253_v31 }
 0x22d   :  { %1686 = vmatmul.mubr.msk.bf16.vlgmr.msra.gmra.mrb[0].mxu0 %vm211_vm0, %v255_v33 }
 0x22e   :  { %1691 = vmatprep.mubr.msk.bf16.mxu0 %vm2253_vm1, %v2252_v15 }
 0x300   :  { %v309_v34 = vpop.f32.mrb[0].mxu0 }
 0x301   :  { %v1687_v35 = vpop.f32.mrb[1].mxu0 }
 0x302   :  { %v312_v36 = vpop.f32.mrb[2].mxu0 }
 0x303   :  { %v2531_v37 = vpack.c.bf16 %v312_v36, %v309_v34  ;;  %v1688_v38 = vpop.f32.mrb[3].mxu0 }
 0x305   :  { %433 = vrot.lane.b32.xlu1 %v2531_v37, %s2254_s12  ;;  %318 = vrot.lane.b32.xlu0 %v2531_v37, %s2255_s16  ;;  %v2540_v39 = vrot.slane %v2531_v37, 4 }
 0x309   :  { %431 = vrot.lane.b32.xlu1 %v2531_v37, %s2256_s1  ;;  %548 = vrot.lane.b32.xlu0 %v2531_v37, %s2257_s17 }
 0x30d   :  { %550 = vrot.lane.b32.xlu1 %v2531_v37, %s2258_s18  ;;  %665 = vrot.lane.b32.xlu0 %v2531_v37, %s2259_s0 }
 0x311   :  { %667 = vrot.lane.b32.xlu1 %v2531_v37, %s2260_s25  ;;  %899 = vrot.lane.b32.xlu0 %v2540_v39, %s2254_s12 }
 0x315   :  { %1017 = vrot.lane.b32.xlu0 %v2540_v39, %s2258_s18  ;;  %783 = vrot.lane.b32.xlu1 %v2540_v39, %s2255_s16 }
 0x319   :  { %1135 = vrot.lane.b32.xlu0 %v2540_v39, %s2260_s25  ;;  %897 = vrot.lane.b32.xlu1 %v2540_v39, %s2256_s1 }
 0x31d   :  { %377 = vrot.lane.b32.xlu0 %v2531_v37, %s2238_s26  ;;  %1015 = vrot.lane.b32.xlu1 %v2540_v39, %s2257_s17 }
 0x321   :  { %608 = vrot.lane.b32.xlu0 %v2531_v37, %s2261_s19  ;;  %1133 = vrot.lane.b32.xlu1 %v2540_v39, %s2259_s0 }
 0x325   :  { %491 = vrot.lane.b32.xlu1 %v2531_v37, %s2262_s7 }
 0x377   :  { %v434_v40 = vpop.permute.xlu1 %433  ;;  %v319_v41 = vpop.permute.xlu0 %318 }
 0x378   :  { %v325_v42 = vsel %vm320_vm2, %v319_v41, 0  ;;  %v439_v43 = vsel %vm320_vm2, %v434_v40, 0 }
 0x379   :  { %1690 = vmatpush3.bf16.xpose.msra.mxu0 %v325_v42  ;;  %1702 = vmatpush3.bf16.xpose.msra.mxu1 %v439_v43 }
 0x37a   :  { %1713 = vmatprep.subr.bf16.mxu1 %v2252_v15  ;;  %1695 = vmatprep.subr.bf16.mxu0 %v2252_v15 }
 0x37b   :  { %v432_v44 = vpop.permute.xlu1 %431  ;;  %v549_v45 = vpop.permute.xlu0 %548 }
 0x37f   :  { %v551_v46 = vpop.permute.xlu1 %550  ;;  %v666_v47 = vpop.permute.xlu0 %665 }
 0x380   :  { %v556_v48 = vsel %vm320_vm2, %v551_v46, 0  ;;  %1692 = vmatmul.mubr.msk.bf16.vlgmr.msra.gmra.mrb[4].mxu0 %vm320_vm2, %v2531_v37  ;;  %1704 = vmatmul.mubr.msk.bf16.vlgmr.msra.gmra.mrb[0].mxu1 %vm320_vm2, %v432_v44 }
 0x381   :  { %1714 = vmatpush3.bf16.xpose.msra.mxu1 %v556_v48  ;;  %1715 = vmatprep.mubr.msk.bf16.mxu1 %vm2253_vm1, %v2252_v15 }
 0x382   :  { %1725 = vmatprep.subr.bf16.mxu1 %v2252_v15  ;;  %1697 = vmatprep.mubr.msk.bf16.mxu0 %vm2253_vm1, %v2252_v15 }
 0x383   :  { %v900_v49 = vpop.permute.xlu0 %899  ;;  %v668_v50 = vpop.permute.xlu1 %667 }
 0x384   :  { %v673_v52 = vsel %vm320_vm2, %v668_v50, 0  ;;  %v905_v58 = vsel %vm320_vm2, %v900_v49, 0 }
 0x387   :  { %v1018_v51 = vpop.permute.xlu0 %1017  ;;  %v784_v54 = vpop.permute.xlu1 %783 }
 0x388   :  { %1716 = vmatmul.mubr.msk.bf16.vlgmr.msra.gmra.mrb[4].mxu1 %vm320_vm2, %v549_v45  ;;  %v789_v56 = vsel %vm320_vm2, %v784_v54, 0  ;;  %v1023_v60 = vsel %vm320_vm2, %v1018_v51, 0 }
 0x389   :  { %1726 = vmatpush3.bf16.xpose.msra.mxu1 %v673_v52  ;;  %1727 = vmatprep.mubr.msk.bf16.mxu1 %vm2253_vm1, %v2252_v15 }
 0x38a   :  { %1737 = vmatprep.subr.bf16.mxu1 %v2252_v15 }
 0x38b   :  { %v1136_v53 = vpop.permute.xlu0 %1135  ;;  %v898_v59 = vpop.permute.xlu1 %897 }
 0x38c   :  { %v1141_v62 = vsel %vm320_vm2, %v1136_v53, 0 }
 0x38f   :  { %v378_v55 = vpop.permute.xlu0 %377  ;;  %v1016_v61 = vpop.permute.xlu1 %1015 }
 0x390   :  { %v384_v57 = vsel %vm382_vm3, %v378_v55, 0  ;;  %1728 = vmatmul.mubr.msk.bf16.vlgmr.msra.gmra.mrb[8].mxu1 %vm320_vm2, %v666_v47 }
 0x391   :  { %1696 = vmatpush3.bf16.msra.mxu0 %v384_v57  ;;  %1738 = vmatpush3.bf16.xpose.msra.mxu1 %v789_v56 }
 0x392   :  { %1739 = vmatprep.mubr.msk.bf16.mxu1 %vm2253_vm1, %v2252_v15  ;;  %1749 = vmatprep.subr.bf16.mxu1 %v2252_v15 }
 0x393   :  { %1707 = vmatprep.subr.bf16.mxu0 %v2252_v15  ;;  %v1134_v63 = vpop.permute.xlu1 %1133  ;;  %v609_v53 = vpop.permute.xlu0 %608 }
 0x397   :  { %v492_v54 = vpop.permute.xlu1 %491 }
 0x398   :  { %1740 = vmatmul.mubr.msk.bf16.vlgmr.msra.gmra.mrb[12].mxu1 %vm320_vm2, %v2540_v39 }
 0x399   :  { %1750 = vmatpush3.bf16.xpose.msra.mxu1 %v905_v58  ;;  %1751 = vmatprep.mubr.msk.bf16.mxu1 %vm2253_vm1, %v2252_v15 }
 0x39a   :  { %1761 = vmatprep.subr.bf16.mxu1 %v2252_v15 }
 0x3a0   :  { %1752 = vmatmul.mubr.msk.bf16.vlgmr.msra.gmra.mrb[16].mxu1 %vm320_vm2, %v898_v59 }
 0x3a1   :  { %1762 = vmatpush3.bf16.xpose.msra.mxu1 %v1023_v60  ;;  %1763 = vmatprep.mubr.msk.bf16.mxu1 %vm2253_vm1, %v2252_v15 }
 0x3a2   :  { %1773 = vmatprep.subr.bf16.mxu1 %v2252_v15 }
 0x3a8   :  { %1764 = vmatmul.mubr.msk.bf16.vlgmr.msra.gmra.mrb[20].mxu1 %vm320_vm2, %v1016_v61 }
 0x3a9   :  { %1774 = vmatpush3.bf16.xpose.msra.mxu1 %v1141_v62  ;;  %1775 = vmatprep.mubr.msk.bf16.mxu1 %vm2253_vm1, %v2252_v15 }
 0x3aa   :  { %1785 = vmatprep.subr.bf16.mxu1 %v2252_v15 }
 0x3b0   :  { %1776 = vmatmul.mubr.msk.bf16.vlgmr.msra.gmra.mrb[24].mxu1 %vm320_vm2, %v1134_v63 }
 0x3b1   :  { %1789 = vmatprep.mubr.msk.bf16.mxu1 %vm2253_vm1, %v2252_v15 }
 0x453   :  { %v361_v3 = vpop.f32.mrb[4].mxu0  ;;  %v475_v4 = vpop.f32.mrb[0].mxu1 }
 0x454   :  { %v2600_v5 = vadd.f32 %v361_v3, %v208_v2  ;;  %v2602_v6 = vadd.f32 %v475_v4, %v208_v2  ;;  %v1693_v7 = vpop.f32.mrb[5].mxu0  ;;  %v1705_v8 = vpop.f32.mrb[1].mxu1 }
 0x455   :  { %v364_v9 = vpop.f32.mrb[6].mxu0  ;;  %v478_v10 = vpop.f32.mrb[2].mxu1 }
 0x456   :  { %v1694_v11 = vpop.f32.mrb[7].mxu0  ;;  %v1706_v12 = vpop.f32.mrb[3].mxu1  ;;  %v481_v13 = vsel %vm320_vm2, %v2602_v6, -inf  ;;  %v367_v14 = vsel %vm320_vm2, %v2600_v5, -inf  ;;  %v614_v10 = vsel %vm382_vm3, %v609_v53, 0 }
 0x457   :  { %482 = vmax.xlane.f32.xlu1 %v481_v13  ;;  %368 = vmax.xlane.f32.xlu0 %v367_v14 }
 0x45b   :  { %v592_v16 = vpop.f32.mrb[4].mxu1 }
 0x45c   :  { %v593_v17 = vadd.f32 %v592_v16, %v208_v2  ;;  %v1717_v18 = vpop.f32.mrb[5].mxu1 }
 0x45d   :  { %v595_v19 = vpop.f32.mrb[6].mxu1 }
 0x45e   :  { %v1718_v20 = vpop.f32.mrb[7].mxu1  ;;  %v598_v21 = vsel %vm320_vm2, %v593_v17, -inf }
 0x45f   :  { %599 = vmax.xlane.f32.xlu0 %v598_v21 }
 0x463   :  { %v709_v22 = vpop.f32.mrb[8].mxu1 }
 0x464   :  { %v2609_v23 = vadd.f32 %v709_v22, %v208_v2  ;;  %v1729_v24 = vpop.f32.mrb[9].mxu1 }
 0x465   :  { %v712_v25 = vpop.f32.mrb[10].mxu1 }
 0x466   :  { %v1730_v26 = vpop.f32.mrb[11].mxu1  ;;  %v715_v27 = vsel %vm320_vm2, %v2609_v23, -inf }
 0x467   :  { %716 = vmax.xlane.f32.xlu0 %v715_v27 }
 0x468   :  { %841 = vrot.lane.b32.xlu1 %v2540_v39, %s2238_s26  ;;  %s2264_s26 = smov 24  }
 0x46b   :  { %v825_v28 = vpop.f32.mrb[12].mxu1 }
 0x46c   :  { %v1741_v29 = vpop.f32.mrb[13].mxu1  ;;  %v2620_v48 = vadd.f32 %v825_v28, %v208_v2 }
 0x46d   :  { %v828_v30 = vpop.f32.mrb[14].mxu1 }
 0x46e   :  { %v1742_v31 = vpop.f32.mrb[15].mxu1  ;;  %v831_v50 = vsel %vm320_vm2, %v2620_v48, -inf }
 0x473   :  { %v941_v32 = vpop.f32.mrb[16].mxu1 }
 0x474   :  { %v1753_v33 = vpop.f32.mrb[17].mxu1  ;;  %v2622_v49 = vadd.f32 %v941_v32, %v208_v2 }
 0x475   :  { %v944_v34 = vpop.f32.mrb[18].mxu1 }
 0x476   :  { %v1754_v35 = vpop.f32.mrb[19].mxu1  ;;  %v947_v51 = vsel %vm320_vm2, %v2622_v49, -inf }
 0x47b   :  { %v1059_v36 = vpop.f32.mrb[20].mxu1 }
 0x47c   :  { %v2615_v38 = vadd.f32 %v1059_v36, %v208_v2  ;;  %v1765_v40 = vpop.f32.mrb[21].mxu1 }
 0x47d   :  { %v1062_v41 = vpop.f32.mrb[22].mxu1  ;;  %725 = vrot.lane.b32.xlu0 %v2531_v37, %s2263_s4 }
 0x47e   :  { %v1766_v42 = vpop.f32.mrb[23].mxu1  ;;  %v1065_v37 = vsel %vm320_vm2, %v2615_v38, -inf }
 0x483   :  { %v1177_v43 = vpop.f32.mrb[24].mxu1 }
 0x484   :  { %v2618_v44 = vadd.f32 %v1177_v43, %v208_v2  ;;  %v1777_v45 = vpop.f32.mrb[25].mxu1 }
 0x485   :  { %v1180_v46 = vpop.f32.mrb[26].mxu1 }
 0x486   :  { %v1778_v47 = vpop.f32.mrb[27].mxu1  ;;  %v1183_v52 = vsel %vm320_vm2, %v2618_v44, -inf }
 0x48c   :  { %832 = vmax.xlane.f32.xlu1 %v831_v50 }
 0x490   :  { %948 = vmax.xlane.f32.xlu1 %v947_v51 }
 0x49c   :  { %1066 = vmax.xlane.f32.xlu0 %v1065_v37 }
 0x4a1   :  { %957 = vrot.lane.b32.xlu1 %v2540_v39, %s2262_s7 }
 0x4b2   :  { %1075 = vrot.lane.b32.xlu0 %v2540_v39, %s2261_s19 }
 0x4c5   :  { %1184 = vmax.xlane.f32.xlu1 %v1183_v52 }
 0x4d6   :  { %1193 = vrot.lane.b32.xlu1 %v2540_v39, %s2263_s4 }
 0x4e4   :  { %v483_v55 = vpop.xlane.xlu1 %482  ;;  %v369_v56 = vpop.xlane.xlu0 %368 }
 0x4e5   :  { %v484_v57 = vsub.f32 %v2602_v6, %v483_v55  ;;  %v370_v58 = vsub.f32 %v2600_v5, %v369_v56  ;;  %v497_v6 = vsel %vm382_vm3, %v492_v54, 0 }
 0x4e7   :  { %v485_v59 = vmul.f32 1.442695, %v484_v57  ;;  %v371_v60 = vmul.f32 1.442695, %v370_v58 }
 0x4e9   :  { %1871 = vpow2.f32 %v485_v59 }
 0x4ea   :  { %1873 = vpow2.f32 %v371_v60 }
 0x4ec   :  { %v600_v61 = vpop.xlane.xlu0 %599 }
 0x4ed   :  { %v601_v62 = vsub.f32 %v593_v17, %v600_v61  ;;  %v842_v17 = vpop.permute.xlu1 %841 }
 0x4ee   :  { %v847_v19 = vsel %vm382_vm3, %v842_v17, 0 }
 0x4ef   :  { %v602_v3 = vmul.f32 1.442695, %v601_v62 }
 0x4f1   :  { %1875 = vpow2.f32 %v602_v3 }
 0x4f3   :  { %v1872_v63 = vpop.eup %1871 }
 0x4f4   :  { %v2639_v2 = vpop.eup %1873  ;;  %v487_v39 = vsel %vm320_vm2, %v1872_v63, 0.0  ;;  %v717_v4 = vpop.xlane.xlu0 %716  ;;  %v490_v9 = vpack.c.bf16 %v1872_v63, %v1872_v63 }
 0x4f5   :  { %488 = vadd.xlane.f32.xlu0 %v487_v39  ;;  %v376_v7 = vpack.c.bf16 %v2639_v2, %v2639_v2  ;;  %v718_v5 = vsub.f32 %v2609_v23, %v717_v4  ;;  %v373_v45 = vsel %vm320_vm2, %v2639_v2, 0.0 }
 0x4f7   :  { %1698 = vmatmul.mubr.msk.bf16.vlgmr.msra.gmra.mrb[8].mxu0 %vm320_vm2, %v376_v7  ;;  %v719_v8 = vmul.f32 1.442695, %v718_v5 }
 0x4f8   :  { %1708 = vmatpush3.bf16.msra.mxu0 %v497_v6  ;;  %1709 = vmatprep.mubr.msk.bf16.mxu0 %vm2253_vm1, %v2252_v15  ;;  %v726_v12 = vpop.permute.xlu0 %725 }
 0x4f9   :  { %1719 = vmatprep.subr.bf16.mxu0 %v2252_v15  ;;  %1877 = vpow2.f32 %v719_v8  ;;  %v731_v14 = vsel %vm382_vm3, %v726_v12, 0 }
 0x4fb   :  { %v2655_v11 = vpop.eup %1875 }
 0x4fc   :  { %v607_v13 = vpack.c.bf16 %v2655_v11, %v2655_v11 }
 0x4ff   :  { %1710 = vmatmul.mubr.msk.bf16.vlgmr.msra.gmra.mrb[12].mxu0 %vm320_vm2, %v490_v9 }
 0x500   :  { %1720 = vmatpush3.bf16.msra.mxu0 %v614_v10  ;;  %1721 = vmatprep.mubr.msk.bf16.mxu0 %vm2253_vm1, %v2252_v15 }
 0x501   :  { %1731 = vmatprep.subr.bf16.mxu0 %v2252_v15 }
 0x503   :  { %v1878_v16 = vpop.eup %1877 }
 0x504   :  { %v724_v18 = vpack.c.bf16 %v1878_v16, %v1878_v16  ;;  %v721_v43 = vsel %vm320_vm2, %v1878_v16, 0.0 }
 0x507   :  { %1722 = vmatmul.mubr.msk.bf16.vlgmr.msra.gmra.mrb[16].mxu0 %vm320_vm2, %v607_v13 }
 0x508   :  { %1732 = vmatpush3.bf16.msra.mxu0 %v731_v14  ;;  %1733 = vmatprep.mubr.msk.bf16.mxu0 %vm2253_vm1, %v2252_v15 }
 0x509   :  { %1743 = vmatprep.subr.bf16.mxu0 %v2252_v15 }
 0x50f   :  { %1734 = vmatmul.mubr.msk.bf16.vlgmr.msra.gmra.mrb[20].mxu0 %vm320_vm2, %v724_v18 }
 0x510   :  { %1744 = vmatpush3.bf16.msra.mxu0 %v847_v19  ;;  %1745 = vmatprep.mubr.msk.bf16.mxu0 %vm2253_vm1, %v2252_v15 }
 0x511   :  { %1755 = vmatprep.subr.bf16.mxu0 %v2252_v15 }
 0x519   :  { %v833_v20 = vpop.xlane.xlu1 %832 }
 0x51a   :  { %v834_v21 = vsub.f32 %v2620_v48, %v833_v20 }
 0x51c   :  { %v835_v22 = vmul.f32 1.442695, %v834_v21 }
 0x51d   :  { %v949_v23 = vpop.xlane.xlu1 %948 }
 0x51e   :  { %1879 = vpow2.f32 %v835_v22  ;;  %v950_v24 = vsub.f32 %v2622_v49, %v949_v23 }
 0x520   :  { %v951_v25 = vmul.f32 1.442695, %v950_v24 }
 0x521   :  { %v958_v27 = vpop.permute.xlu1 %957 }
 0x522   :  { %1881 = vpow2.f32 %v951_v25  ;;  %v963_v31 = vsel %vm382_vm3, %v958_v27, 0 }
 0x528   :  { %v1880_v26 = vpop.eup %1879 }
 0x529   :  { %v1067_v28 = vpop.xlane.xlu0 %1066  ;;  %v840_v29 = vpack.c.bf16 %v1880_v26, %v1880_v26  ;;  %v837_v53 = vsel %vm320_vm2, %v1880_v26, 0.0 }
 0x52a   :  { %v1068_v30 = vsub.f32 %v2615_v38, %v1067_v28 }
 0x52b   :  { %1746 = vmatmul.mubr.msk.bf16.vlgmr.msra.gmra.mrb[24].mxu0 %vm320_vm2, %v840_v29 }
 0x52c   :  { %v1882_v32 = vpop.eup %1881  ;;  %v1069_v33 = vmul.f32 1.442695, %v1068_v30  ;;  %1756 = vmatpush3.bf16.msra.mxu0 %v963_v31  ;;  %1757 = vmatprep.mubr.msk.bf16.mxu0 %vm2253_vm1, %v2252_v15 }
 0x52d   :  { %v953_v34 = vsel %vm320_vm2, %v1882_v32, 0.0  ;;  %1767 = vmatprep.subr.bf16.mxu0 %v2252_v15  ;;  %v1076_v35 = vpop.permute.xlu0 %1075  ;;  %v956_v36 = vpack.c.bf16 %v1882_v32, %v1882_v32 }
 0x52e   :  { %1883 = vpow2.f32 %v1069_v33  ;;  %954 = vadd.xlane.f32.xlu0 %v953_v34  ;;  %v1081_v38 = vsel %vm382_vm3, %v1076_v35, 0 }
 0x533   :  { %1758 = vmatmul.mubr.msk.bf16.vlgmr.msra.gmra.mrb[28].mxu0 %vm320_vm2, %v956_v36 }
 0x534   :  { %1768 = vmatpush3.bf16.msra.mxu0 %v1081_v38  ;;  %1769 = vmatprep.mubr.msk.bf16.mxu0 %vm2253_vm1, %v2252_v15 }
 0x535   :  { %1779 = vmatprep.subr.bf16.mxu0 %v2252_v15 }
 0x538   :  { %v1884_v40 = vpop.eup %1883 }
 0x539   :  { %v1071_v41 = vsel %vm320_vm2, %v1884_v40, 0.0  ;;  %v1074_v42 = vpack.c.bf16 %v1884_v40, %v1884_v40 }
 0x53a   :  { %1072 = vadd.xlane.f32.xlu1 %v1071_v41 }
 0x53b   :  { %1770 = vmatmul.mubr.msk.bf16.vlgmr.msra.gmra.mrb[32].mxu0 %vm320_vm2, %v1074_v42 }
 0x53c   :  { %1781 = vmatprep.mubr.msk.bf16.mxu0 %vm2253_vm1, %v2252_v15 }
 0x53e   :  { %722 = vadd.xlane.f32.xlu1 %v721_v43 }
 0x542   :  { %374 = vadd.xlane.f32.xlu1 %v373_v45 }
 0x552   :  { %v1185_v46 = vpop.xlane.xlu1 %1184 }
 0x553   :  { %v1186_v47 = vsub.f32 %v2618_v44, %v1185_v46  ;;  %v604_v44 = vsel %vm320_vm2, %v2655_v11, 0.0 }
 0x555   :  { %v1187_v48 = vmul.f32 1.442695, %v1186_v47 }
 0x556   :  { %v1194_v49 = vpop.permute.xlu1 %1193 }
 0x557   :  { %1885 = vpow2.f32 %v1187_v48  ;;  %v1199_v50 = vsel %vm382_vm3, %v1194_v49, 0 }
 0x558   :  { %1780 = vmatpush3.bf16.msra.mxu0 %v1199_v50 }
 0x559   :  { %1793 = vmatprep.subr.bf16.mxu0 %v2252_v15 }
 0x561   :  { %v1886_v51 = vpop.eup %1885 }
 0x562   :  { %v1189_v37 = vsel %vm320_vm2, %v1886_v51, 0.0  ;;  %v1192_v52 = vpack.c.bf16 %v1886_v51, %v1886_v51 }
 0x563   :  { %1190 = vadd.xlane.f32.xlu0 %v1189_v37 }
 0x564   :  { %1782 = vmatmul.mubr.msk.bf16.vlgmr.msra.gmra.mrb[36].mxu0 %vm320_vm2, %v1192_v52 }
 0x565   :  { %1797 = vmatprep.mubr.msk.bf16.mxu0 %vm2253_vm1, %v2252_v15 }
 0x567   :  { %605 = vadd.xlane.f32.xlu0 %v604_v44 }
 0x56b   :  { %838 = vadd.xlane.f32.xlu0 %v837_v53  ;;  %v1855_v53 = vld [vmem:[#allocation9] sm:$0xff]  }
 0x56c   :  { %1786 = vmatpush3.bf16.msra.mxu1 %v1855_v53  ;;  %v1865_v53 = vld [vmem:[#allocation21 + $0x30] sm:$0xff]  }
 0x56d   :  { %1787 = vmatprep.subr.bf16.mxu1 %v2252_v15 }
 0x582   :  { %v489_v54 = vpop.xlane.xlu0 %488 }
 0x583   :  { %1887 = vrcp.f32 %v489_v54  ;;  %v1856_v54 = vld [vmem:[#allocation9 + $0x8] sm:$0xff]  }
 0x584   :  { %1788 = vmatpush3.bf16.msra.mxu1 %v1856_v54  ;;  %v1866_v54 = vld [vmem:[#allocation21 + $0x38] sm:$0xff]  }
 0x585   :  { %1801 = vmatprep.subr.bf16.mxu1 %v2252_v15 }
 0x58d   :  { %v1888_v62 = vpop.eup %1887 }
 0x5bb   :  { %v955_v21 = vpop.xlane.xlu0 %954 }
 0x5c7   :  { %v1073_v55 = vpop.xlane.xlu1 %1072 }
 0x5ca   :  { %v420_v56 = vpop.f32.mrb[8].mxu0 }
 0x5cb   :  { %v1699_v57 = vpop.f32.mrb[9].mxu0  ;;  %v723_v58 = vpop.xlane.xlu1 %722 }
 0x5cc   :  { %v423_v59 = vpop.f32.mrb[10].mxu0 }
 0x5cd   :  { %v1700_v60 = vpop.f32.mrb[11].mxu0 }
 0x5cf   :  { %v375_v61 = vpop.xlane.xlu1 %374 }
 0x5d0   :  { %1889 = vrcp.f32 %v375_v61 }
 0x5d1   :  { %1891 = vrcp.f32 %v723_v58 }
 0x5d2   :  { %v533_v63 = vpop.f32.mrb[12].mxu0 }
 0x5d3   :  { %v540_v2 = vmul.f32 %v1888_v62, %v533_v63  ;;  %v1711_v3 = vpop.f32.mrb[13].mxu0 }
 0x5d4   :  { %v536_v39 = vpop.f32.mrb[14].mxu0 }
 0x5d5   :  { %v541_v4 = vpack.c.bf16 %v540_v2, %v540_v2  ;;  %v1712_v7 = vpop.f32.mrb[15].mxu0 }
 0x5d7   :  { %543 = vrot.lane.b32.xlu0 %v541_v4, %s2245_s22 }
 0x5da   :  { %v1890_v6 = vpop.eup %1889  ;;  %v650_v5 = vpop.f32.mrb[16].mxu0 }
 0x5db   :  { %v427_v8 = vmul.f32 %v1890_v6, %v420_v56  ;;  %v1723_v9 = vpop.f32.mrb[17].mxu0  ;;  %v1892_v13 = vpop.eup %1891 }
 0x5dc   :  { %v653_v10 = vpop.f32.mrb[18].mxu0 }
 0x5dd   :  { %v1724_v11 = vpop.f32.mrb[19].mxu0  ;;  %v428_v12 = vpack.c.bf16 %v427_v8, %v427_v8 }
 0x5df   :  { %430 = vst.msk [vmem:[#allocation2] sm:$0xf] %vm429_vm4, %v428_v12 }
 0x5e2   :  { %v767_v14 = vpop.f32.mrb[20].mxu0 }
 0x5e3   :  { %v774_v16 = vmul.f32 %v1892_v13, %v767_v14  ;;  %v1735_v17 = vpop.f32.mrb[21].mxu0 }
 0x5e4   :  { %v770_v18 = vpop.f32.mrb[22].mxu0 }
 0x5e5   :  { %v775_v19 = vpack.c.bf16 %v774_v16, %v774_v16  ;;  %v1736_v20 = vpop.f32.mrb[23].mxu0 }
 0x5e7   :  { %777 = vrot.lane.b32.xlu0 %v775_v19, %s2264_s26 }
 0x5f0   :  { %v1191_v22 = vpop.xlane.xlu0 %1190 }
 0x5f4   :  { %v606_v23 = vpop.xlane.xlu0 %605 }
 0x5f5   :  { %1893 = vrcp.f32 %v606_v23 }
 0x5f8   :  { %v839_v24 = vpop.xlane.xlu0 %838 }
 0x5f9   :  { %1895 = vrcp.f32 %v839_v24 }
 0x5fa   :  { %1897 = vrcp.f32 %v955_v21 }
 0x5fb   :  { %1899 = vrcp.f32 %v1073_v55 }
 0x5fc   :  { %1901 = vrcp.f32 %v1191_v22 }
 0x5fe   :  { %v883_v25 = vpop.f32.mrb[24].mxu0 }
 0x5ff   :  { %v1894_v26 = vpop.eup %1893  ;;  %v1747_v27 = vpop.f32.mrb[25].mxu0 }
 0x600   :  { %v886_v28 = vpop.f32.mrb[26].mxu0  ;;  %v657_v29 = vmul.f32 %v1894_v26, %v650_v5  ;;  %v1612_v5 = vld [vmem:[#allocation11] ss:$0 sm:$0xff]  ;;  %v1857_v27 = vld [vmem:[#allocation18] sm:$0xff]  }
 0x601   :  { %v1748_v30 = vpop.f32.mrb[27].mxu0  ;;  %1794 = vmatpush3.bf16.msra.mxu0 %v1857_v27  ;;  %v1858_v28 = vld [vmem:[#allocation18 + $0x8] sm:$0xff]  }
 0x602   :  { %v658_v31 = vpack.c.bf16 %v657_v29, %v657_v29  ;;  %1795 = vmatprep.subr.bf16.mxu0 %v2252_v15 }
 0x603   :  { %v1896_v32 = vpop.eup %1895 }
 0x604   :  { %v890_v33 = vmul.f32 %v1896_v32, %v883_v25  ;;  %660 = vrot.lane.b32.xlu1 %v658_v31, %s2265_s3  ;;  %v1898_v34 = vpop.eup %1897 }
 0x605   :  { %v1900_v47 = vpop.eup %1899  ;;  %1796 = vmatpush3.bf16.msra.mxu0 %v1858_v28 }
 0x606   :  { %v891_v35 = vpack.c.bf16 %v890_v33, %v890_v33  ;;  %v999_v36 = vpop.f32.mrb[28].mxu0  ;;  %v1902_v55 = vpop.eup %1901 }
 0x607   :  { %v1006_v38 = vmul.f32 %v1898_v34, %v999_v36  ;;  %v1759_v40 = vpop.f32.mrb[29].mxu0 }
 0x608   :  { %v893_v41 = vrot.slane %v891_v35, 4  ;;  %v1002_v42 = vpop.f32.mrb[30].mxu0 }
 0x609   :  { %v1007_v43 = vpack.c.bf16 %v1006_v38, %v1006_v38  ;;  %v1760_v45 = vpop.f32.mrb[31].mxu0  ;;  %v1616_v38 = vld [vmem:[#allocation15] ss:$0 sm:$0xff] }
 0x60a   :  { %896 = vst.msk [vmem:[#allocation2] sm:$0xf0] %vm895_vm5, %v893_v41 }
 0x60b   :  { %v1009_v46 = vrot.slane %v1007_v43, 4  ;;  %v1617_v43 = vld [vmem:[#allocation17] ss:$0 sm:$0xff] }
 0x60d   :  { %1010 = vrot.lane.b32.xlu1 %v1009_v46, %s2245_s22 }
 0x60e   :  { %v1117_v48 = vpop.f32.mrb[32].mxu0 }
 0x60f   :  { %v1124_v49 = vmul.f32 %v1900_v47, %v1117_v48  ;;  %v1771_v50 = vpop.f32.mrb[33].mxu0 }
 0x610   :  { %v1120_v51 = vpop.f32.mrb[34].mxu0  ;;  %v1860_v50 = vld [vmem:[#allocation21 + $0x8] sm:$0xff]  }
 0x611   :  { %v1125_v37 = vpack.c.bf16 %v1124_v49, %v1124_v49  ;;  %v1772_v52 = vpop.f32.mrb[35].mxu0  ;;  %v1859_v49 = vld [vmem:[#allocation21] sm:$0xff]   ;;  %v1861_v51 = vld [vmem:[#allocation21 + $0x10] sm:$0xff]  }
 0x612   :  { %v1863_v52 = vld [vmem:[#allocation21 + $0x20] sm:$0xff]  }
 0x613   :  { %v1127_v44 = vrot.slane %v1125_v37, 4  ;;  %v1862_v37 = vld [vmem:[#allocation21 + $0x18] sm:$0xff]  }
 0x615   :  { %1128 = vrot.lane.b32.xlu1 %v1127_v44, %s2265_s3  ;;  %v1864_v44 = vld [vmem:[#allocation21 + $0x28] sm:$0xff]  }
 0x637   :  { %v1235_v56 = vpop.f32.mrb[36].mxu0 }
 0x638   :  { %v1242_v57 = vmul.f32 %v1902_v55, %v1235_v56  ;;  %v1783_v58 = vpop.f32.mrb[37].mxu0  ;;  %v1618_v55 = vld [vmem:[#allocation20] ss:$0 sm:$0xff] }
 0x639   :  { %v1238_v59 = vpop.f32.mrb[38].mxu0 }
 0x63a   :  { %v1243_v60 = vpack.c.bf16 %v1242_v57, %v1242_v57  ;;  %v1784_v61 = vpop.f32.mrb[39].mxu0 }
 0x63c   :  { %v1245_v62 = vrot.slane %v1243_v60, 4 }
 0x63e   :  { %1246 = vrot.lane.b32.xlu1 %v1245_v62, %s2264_s26 }
 0x649   :  { %v544_v63 = vpop.permute.xlu0 %543 }
 0x64a   :  { %547 = vst.msk [vmem:[#allocation2] sm:$0xf] %vm546_vm6, %v544_v63 }
 0x659   :  { %v778_v3 = vpop.permute.xlu0 %777 }
 0x676   :  { %v661_v2 = vpop.permute.xlu1 %660 }
 0x677   :  { %664 = vst.msk [vmem:[#allocation2] sm:$0xf] %vm663_vm7, %v661_v2 }
 0x678   :  { %781 = vst.msk [vmem:[#allocation2] sm:$0xf] %vm780_vm8, %v778_v3 }
 0x67f   :  { %v1011_v39 = vpop.permute.xlu1 %1010 }
 0x680   :  { %1014 = vst.msk [vmem:[#allocation2] sm:$0xf0] %vm1013_vm9, %v1011_v39 }
 0x687   :  { %v1129_v4 = vpop.permute.xlu1 %1128 }
 0x688   :  { %1132 = vst.msk [vmem:[#allocation2] sm:$0xf0] %vm1131_vm10, %v1129_v4 }
 0x6b0   :  { %v1247_v7 = vpop.permute.xlu1 %1246 }
 0x6b1   :  { %1250 = vst.msk [vmem:[#allocation2] sm:$0xf0] %vm1249_vm11, %v1247_v7 }
 0x6b8   :  { %v1251_v6 = vld [vmem:[#allocation2] sm:$0xff] }
 0x6b9   :  { %1790 = vmatmul.mubr.msk.bf16.vlgmr.msra.gmra.mrb[28].mxu1 %vm211_vm0, %v1251_v6 }
 0x6ba   :  { %1817 = vmatprep.mubr.msk.bf16.mxu1 %vm2253_vm1, %v2252_v15  ;;  %1802 = vmatpush3.bf16.msra.mxu1 %v1859_v49 }
 0x6bb   :  { %1803 = vmatprep.subr.bf16.mxu1 %v2252_v15 }
 0x6be   :  { %1804 = vmatpush3.bf16.msra.mxu1 %v1860_v50 }
 0x6bf   :  { %1805 = vmatprep.subr.bf16.mxu1 %v2252_v15 }
 0x6c2   :  { %1806 = vmatpush3.bf16.msra.mxu1 %v1861_v51 }
 0x6c3   :  { %1807 = vmatprep.subr.bf16.mxu1 %v2252_v15 }
 0x6c6   :  { %1808 = vmatpush3.bf16.msra.mxu1 %v1862_v37 }
 0x6c7   :  { %1809 = vmatprep.subr.bf16.mxu1 %v2252_v15 }
 0x6ca   :  { %1810 = vmatpush3.bf16.msra.mxu1 %v1863_v52 }
 0x6cb   :  { %1811 = vmatprep.subr.bf16.mxu1 %v2252_v15 }
 0x6ce   :  { %1812 = vmatpush3.bf16.msra.mxu1 %v1864_v44 }
 0x6cf   :  { %1813 = vmatprep.subr.bf16.mxu1 %v2252_v15 }
 0x6d2   :  { %1814 = vmatpush3.bf16.msra.mxu1 %v1865_v53 }
 0x6d3   :  { %1815 = vmatprep.subr.bf16.mxu1 %v2252_v15 }
 0x6d6   :  { %1816 = vmatpush3.bf16.msra.mxu1 %v1866_v54 }
 0x78c   :  { %v1312_v8 = vpop.f32.mrb[28].mxu1 }
 0x78d   :  { %v1313_v9 = vadd.f32 %v1612_v5, %v1312_v8  ;;  %v1791_v10 = vpop.f32.mrb[29].mxu1 }
 0x78e   :  { %v1315_v11 = vpop.f32.mrb[30].mxu1 }
 0x78f   :  { %v2710_v12 = vadd.f32 %v1313_v9, %v2508_v0  ;;  %v1316_v13 = vadd.f32 %v1612_v5, %v1315_v11  ;;  %v1792_v14 = vpop.f32.mrb[31].mxu1 }
 0x791   :  { %v2713_v16 = vadd.f32 %v1316_v13, %v2510_v1  ;;  %v1323_v17 = vsel %vm211_vm0, %v2710_v12, 0.0 }
 0x792   :  { %1324 = vadd.xlane.f32.xlu0 %v1323_v17 }
 0x793   :  { %v1326_v18 = vsel %vm211_vm0, %v2713_v16, 0.0 }
 0x794   :  { %1327 = vadd.xlane.f32.xlu1 %v1326_v18 }
 0x81f   :  { %v1325_v19 = vpop.xlane.xlu0 %1324 }
 0x820   :  { %v1329_v20 = vmul.f32 0.03125, %v1325_v19 }
 0x821   :  { %v1328_v21 = vpop.xlane.xlu1 %1327 }
 0x822   :  { %v1331_v22 = vsub.f32 %v2710_v12, %v1329_v20  ;;  %v1330_v0 = vmul.f32 0.03125, %v1328_v21  ;;  %v1622_v20 = vld [vmem:[#allocation23] ss:$0 sm:$0xff] }
 0x824   :  { %v1332_v23 = vsub.f32 %v2713_v16, %v1330_v0  ;;  %v1333_v24 = vmul.f32 %v1331_v22, %v1331_v22 }
 0x826   :  { %v1335_v1 = vsel %vm211_vm0, %v1333_v24, 0.0  ;;  %v1334_v25 = vmul.f32 %v1332_v23, %v1332_v23 }
 0x827   :  { %1336 = vadd.xlane.f32.xlu0 %v1335_v1 }
 0x828   :  { %v1338_v26 = vsel %vm211_vm0, %v1334_v25, 0.0 }
 0x82b   :  { %1339 = vadd.xlane.f32.xlu0 %v1338_v26 }
 0x8b4   :  { %v1337_v29 = vpop.xlane.xlu0 %1336 }
 0x8b5   :  { %v1341_v30 = vmul.f32 0.03125, %v1337_v29 }
 0x8b7   :  { %v1343_v31 = vadd.f32 1e-05, %v1341_v30 }
 0x8b8   :  { %v1340_v32 = vpop.xlane.xlu0 %1339 }
 0x8b9   :  { %1903 = vrsqrt.f32 %v1343_v31  ;;  %v1342_v33 = vmul.f32 0.03125, %v1340_v32 }
 0x8bb   :  { %v1344_v34 = vadd.f32 1e-05, %v1342_v33 }
 0x8bd   :  { %1905 = vrsqrt.f32 %v1344_v34 }
 0x8c3   :  { %v1904_v35 = vpop.eup %1903 }
 0x8c4   :  { %v1347_v36 = vmul.f32 %v1904_v35, %v1331_v22 }
 0x8c6   :  { %v1355_v41 = vmul.f32 %v1616_v38, %v1347_v36 }
 0x8c7   :  { %v1906_v40 = vpop.eup %1905 }
 0x8c8   :  { %v1348_v42 = vmul.f32 %v1906_v40, %v1332_v23  ;;  %v1363_v46 = vadd.f32 %v1617_v43, %v1355_v41 }
 0x8ca   :  { %v1356_v45 = vmul.f32 %v1616_v38, %v1348_v42 }
 0x8cc   :  { %v1364_v47 = vadd.f32 %v1617_v43, %v1356_v45 }
 0x8ce   :  { %v1365_v48 = vpack.c.bf16 %v1364_v47, %v1363_v46 }
 0x8d0   :  { %1798 = vmatmul.mubr.msk.bf16.vlgmr.msra.gmra.mrb[40].mxu0 %vm211_vm0, %v1365_v48 }
 0x9a3   :  { %v1426_v56 = vpop.f32.mrb[40].mxu0 }
 0x9a4   :  { %v1427_v57 = vadd.f32 %v1618_v55, %v1426_v56  ;;  %v1799_v58 = vpop.f32.mrb[41].mxu0 }
 0x9a5   :  { %v1429_v59 = vpop.f32.mrb[42].mxu0 }
 0x9a6   :  { %v1435_v60 = vmul.f32 0.044715, %v1427_v57  ;;  %v1430_v61 = vadd.f32 %v1618_v55, %v1429_v59  ;;  %v1800_v62 = vpop.f32.mrb[43].mxu0  ;;  %v1433_v11 = vmul.f32 0.5, %v1427_v57 }
 0x9a8   :  { %v1437_v63 = vmul.f32 %v1435_v60, %v1427_v57  ;;  %v1436_v2 = vmul.f32 0.044715, %v1430_v61  ;;  %v1434_v13 = vmul.f32 0.5, %v1430_v61 }
 0x9aa   :  { %v1439_v3 = vmul.f32 %v1437_v63, %v1427_v57  ;;  %v1438_v39 = vmul.f32 %v1436_v2, %v1430_v61 }
 0x9ac   :  { %v1441_v4 = vadd.f32 %v1439_v3, %v1427_v57  ;;  %v1440_v7 = vmul.f32 %v1438_v39, %v1430_v61 }
 0x9ae   :  { %v1443_v6 = vmul.f32 0.7978846, %v1441_v4  ;;  %v1442_v5 = vadd.f32 %v1440_v7, %v1430_v61 }
 0x9b0   :  { %1907 = vtanh.f32 %v1443_v6  ;;  %v1444_v8 = vmul.f32 0.7978846, %v1442_v5 }
 0x9b2   :  { %1909 = vtanh.f32 %v1444_v8 }
 0x9ba   :  { %v1908_v15 = vpop.eup %1907 }
 0x9bb   :  { %v1447_v9 = vadd.f32 1.0, %v1908_v15 }
 0x9bc   :  { %v1910_v10 = vpop.eup %1909 }
 0x9bd   :  { %v1448_v14 = vadd.f32 1.0, %v1910_v10  ;;  %v1449_v17 = vmul.f32 %v1447_v9, %v1433_v11 }
 0x9bf   :  { %v1450_v18 = vmul.f32 %v1448_v14, %v1434_v13 }
 0x9c1   :  { %v1451_v19 = vpack.c.bf16 %v1450_v18, %v1449_v17 }
 0x9c3   :  { %1818 = vmatmul.mubr.bf16.vlgmr.msra.gmra.mrb[32].mxu1 %v1451_v19 }
 0xa96   :  { %v1557_v21 = vpop.f32.mrb[32].mxu1 }
 0xa97   :  { %v1558_v22 = vadd.f32 %v1622_v20, %v1557_v21  ;;  %v1819_v0 = vpop.f32.mrb[33].mxu1 }
 0xa98   :  { %v1560_v23 = vpop.f32.mrb[34].mxu1 }
 0xa99   :  { %v1564_v24 = vadd.f32 %v1558_v22, %v2710_v12  ;;  %v1561_v1 = vadd.f32 %v1622_v20, %v1560_v23  ;;  %v1820_v25 = vpop.f32.mrb[35].mxu1 }
 0xa9b   :  { %1566 = vst.msk [vmem:[#allocation24] sm:$0xff] %vm211_vm0, %v1564_v24  ;;  %v1565_v26 = vadd.f32 %v1561_v1, %v2713_v16 }
 0xa9d   :  { %1567 = vst.msk [vmem:[#allocation24 + $0x8] sm:$0xff] %vm211_vm0, %v1565_v26 }
 0xa9e   :  { %2208 = shalt.err (!%p2205_p10)
}
 0xa9f   :  { %s2209_s5 = scalar_lea.hbm %s2764_s13, 256 }
 0xaa0   :  { %p2210_p11 = scmp.ne.s32.totalorder %s2764_s13, %s2209_s5  ;;  %p2213_p12 = scmp.lt.u32.totalorder %s2209_s5, %s2764_s13 }
 0xaa2   :  { %p2215_p13 = pnand %p2213_p12, %p2210_p11 }
 0xaa4   :  { %2218 = shalt.err (!%p2215_p13)
}
 0xaa5   :  { %1579 = dma.vmem_to_hbm [thread:$0]  %s1574_s8, 256, %s2764_s13, [#allocation5], %s2244_s11, %s2244_s11, %s2245_s22  }
 0xaa6   :  { %2233 = dma.done.wait [#allocation5], 256  }
 0xaa7   :  { %2234 = vsyncadd [#allocation5], 4294967040 }
 0xaa8   :  { %1583 = vsyncpa [#allocation4], 1 }
 0xaa9   :  { %1584 = vsyncpa [#allocation7], 1 }
 0xaaa   :  { %1585 = vsyncpa [#allocation10], 1 }
 0xaab   :  { %1586 = vsyncpa [#allocation13], 1 }
 0xaac   :  { %1587 = vsyncpa [#allocation16], 1 }
 0xaad   :  { %1588 = vsyncpa [#allocation19], 1 }
 0xaae   :  { %1589 = vsyncpa [#allocation22], 1 }
 0xaaf   :  { %1590 = vsyncpa [#allocation5], 1 }

// kernel: tpu_custom_call.1
= control target key start
LH: loop header
LB: loop body
LE: loop exit
PB: predicated region body
PF: predicated region fallthrough
CT: control target
= control target key end

     0   :  { %18 = vsyncpa [#allocation4], 0  ;;  %s2751_s0 = inlined_call_operand.hbm [shape: f32[2,8,32], index: 0, kind: input, shape index: {}]   ;;  %s2752_s1 = inlined_call_operand.hbm [shape: f32[8,8], index: 1, kind: input, shape index: {}]   ;;  %s2753_s2 = inlined_call_operand.hbm [shape: bf16[32,96], index: 2, kind: input, shape index: {}]   ;;  %s2754_s3 = inlined_call_operand.hbm [shape: bf16[32,32], index: 3, kind: input, shape index: {}]   ;;  %s2755_s4 = inlined_call_operand.hbm [shape: f32[1,32], index: 4, kind: input, shape index: {}]   ;;  %s2756_s5 = inlined_call_operand.hbm [shape: f32[1,32], index: 5, kind: input, shape index: {}]   ;;  %s2757_s6 = inlined_call_operand.hbm [shape: f32[1,32], index: 6, kind: input, shape index: {}]   ;;  %s2758_s7 = inlined_call_operand.hbm [shape: f32[1,32], index: 7, kind: input, shape index: {}]   ;;  %s2759_s8 = inlined_call_operand.hbm [shape: f32[1,32], index: 8, kind: input, shape index: {}]   ;;  %s2760_s9 = inlined_call_operand.hbm [shape: bf16[32,128], index: 9, kind: input, shape index: {}]   ;;  %s2761_s10 = inlined_call_operand.hbm [shape: f32[1,128], index: 10, kind: input, shape index: {}]   ;;  %s2762_s11 = inlined_call_operand.hbm [shape: bf16[128,32], index: 11, kind: input, shape index: {}]   ;;  %s2763_s12 = inlined_call_operand.hbm [shape: f32[1,32], index: 12, kind: input, shape index: {}]   ;;  %s2764_s13 = inlined_call_operand.hbm [shape: f32[2,8,32], index: 13, kind: output, shape index: {}]  }
   0x1   :  { %19 = vsyncpa [#allocation7], 0 }
   0x2   :  { %20 = vsyncpa [#allocation10], 0 }
   0x3   :  { %21 = vsyncpa [#allocation13], 0 }
   0x4   :  { %22 = vsyncpa [#allocation16], 0 }
   0x5   :  { %23 = vsyncpa [#allocation19], 0 }
   0x6   :  { %24 = vsyncpa [#allocation22], 0 }
   0x7   :  { %25 = vsyncpa [#allocation5], 0  ;;  %s2235_s25 = smov [#allocation6]   ;;  %s1911_s29 = scalar_lea.hbm %s2752_s1, 128 }
   0x8   :  { %s44_s26 = sshll.u32 %s2235_s25, 4  ;;  %p1912_p0 = scmp.ne.s32.totalorder %s2752_s1, %s1911_s29  ;;  %s45_s26 = int_to_ptr.vmem [resolvable:$true] %s44_s26 }
   0x9   :  { %p1915_p1 = scmp.lt.u32.totalorder %s1911_s29, %s2752_s1 }
   0xb   :  { %p1917_p2 = pnand %p1915_p1, %p1912_p0 }
   0xd   :  { %1920 = shalt.err (!%p1917_p2)
}
   0xe   :  { %s1921_s17 = scalar_lea.vmem %s45_s26, 128  ;;  %p1926_p4 = scmp.lt.s32.totalorder %s45_s26, %s45_s26 }
   0xf   :  { %p1922_p3 = scmp.ne.s32.totalorder %s45_s26, %s1921_s17  ;;  %p1927_p5 = scmp.lt.s32.totalorder %s1921_s17, %s1921_s17 }
  0x11   :  { %p1928_p6 = por %p1927_p5, %p1926_p4 }
  0x13   :  { %p1929_p7 = pnand %p1928_p6, %p1922_p3 }
  0x15   :  { %1932 = shalt.err (!%p1929_p7)
}
  0x16   :  { %47 = dma.hbm_to_vmem [thread:$0]  %s2752_s1, 128, %s45_s26, [#allocation7]  }
  0x17   :  { %s2236_s20 = smov [#allocation9]   ;;  %s2237_s22 = smov [#allocation12]  }
  0x18   :  { %s65_s21 = sshll.u32 %s2236_s20, 4  ;;  %s88_s23 = sshll.u32 %s2237_s22, 4  ;;  %s66_s21 = int_to_ptr.vmem [resolvable:$true] %s65_s21  ;;  %s89_s23 = int_to_ptr.vmem [resolvable:$true] %s88_s23 }
  0x19   :  { %s1933_s27 = scalar_lea.hbm %s2754_s3, 256 }
  0x1a   :  { %p1934_p8 = scmp.ne.s32.totalorder %s2754_s3, %s1933_s27  ;;  %p1937_p9 = scmp.lt.u32.totalorder %s1933_s27, %s2754_s3 }
  0x1c   :  { %p1939_p10 = pnand %p1937_p9, %p1934_p8 }
  0x1e   :  { %1942 = shalt.err (!%p1939_p10)
}
  0x1f   :  { %s1943_s1 = scalar_lea.vmem %s66_s21, 256  ;;  %p1948_p12 = scmp.lt.s32.totalorder %s66_s21, %s66_s21 }
  0x20   :  { %p1944_p11 = scmp.ne.s32.totalorder %s66_s21, %s1943_s1  ;;  %p1949_p13 = scmp.lt.s32.totalorder %s1943_s1, %s1943_s1 }
  0x22   :  { %p1950_p0 = por %p1949_p13, %p1948_p12 }
  0x24   :  { %p1951_p1 = pnand %p1950_p0, %p1944_p11 }
  0x26   :  { %1954 = shalt.err (!%p1951_p1)
}
  0x27   :  { %s2238_s26 = smov 64   ;;  %s2239_s15 = smov 4  }
  0x28   :  { %71 = dma.hbm_to_vmem [thread:$0]  %s2754_s3, 256, %s66_s21, [#allocation10], %s2238_s26, %s2238_s26, %s2239_s15  }
  0x29   :  { %s1955_s20 = scalar_lea.hbm %s2756_s5, 16 }
  0x2a   :  { %p1956_p2 = scmp.ne.s32.totalorder %s2756_s5, %s1955_s20  ;;  %p1959_p3 = scmp.lt.u32.totalorder %s1955_s20, %s2756_s5 }
  0x2c   :  { %p1961_p4 = pnand %p1959_p3, %p1956_p2 }
  0x2e   :  { %1964 = shalt.err (!%p1961_p4)
}
  0x2f   :  { %s1965_s28 = scalar_lea.vmem %s89_s23, 16  ;;  %s1969_s29 = scalar_lea.vmem %s89_s23, 32 }
  0x30   :  { %p1966_p5 = scmp.ne.s32.totalorder %s89_s23, %s1965_s28  ;;  %p1970_p6 = scmp.lt.s32.totalorder %s89_s23, %s89_s23 }
  0x31   :  { %p1971_p7 = scmp.lt.s32.totalorder %s1969_s29, %s1965_s28 }
  0x33   :  { %p1972_p8 = por %p1971_p7, %p1970_p6 }
  0x35   :  { %p1973_p9 = pnand %p1972_p8, %p1966_p5 }
  0x37   :  { %1976 = shalt.err (!%p1973_p9)
}
  0x38   :  { %91 = dma.hbm_to_vmem [thread:$0]  %s2756_s5, 16, %s89_s23, [#allocation13]  }
  0x39   :  { %s2240_s30 = smov [#allocation15]   ;;  %s2241_s1 = smov [#allocation18]  }
  0x3a   :  { %s108_s14 = sshll.u32 %s2240_s30, 4  ;;  %s127_s16 = sshll.u32 %s2241_s1, 4  ;;  %s109_s14 = int_to_ptr.vmem [resolvable:$true] %s108_s14  ;;  %s128_s16 = int_to_ptr.vmem [resolvable:$true] %s127_s16 }
  0x3b   :  { %s1977_s19 = scalar_lea.hbm %s2758_s7, 16 }
  0x3c   :  { %p1978_p10 = scmp.ne.s32.totalorder %s2758_s7, %s1977_s19  ;;  %p1981_p11 = scmp.lt.u32.totalorder %s1977_s19, %s2758_s7 }
  0x3e   :  { %p1983_p12 = pnand %p1981_p11, %p1978_p10 }
  0x40   :  { %1986 = shalt.err (!%p1983_p12)
}
  0x41   :  { %s1987_s5 = scalar_lea.vmem %s109_s14, 16  ;;  %s1991_s23 = scalar_lea.vmem %s109_s14, 32 }
  0x42   :  { %p1988_p13 = scmp.ne.s32.totalorder %s109_s14, %s1987_s5  ;;  %p1992_p0 = scmp.lt.s32.totalorder %s109_s14, %s109_s14 }
  0x43   :  { %p1993_p1 = scmp.lt.s32.totalorder %s1991_s23, %s1987_s5 }
  0x45   :  { %p1994_p2 = por %p1993_p1, %p1992_p0 }
  0x47   :  { %p1995_p3 = pnand %p1994_p2, %p1988_p13 }
  0x49   :  { %1998 = shalt.err (!%p1995_p3)
}
  0x4a   :  { %111 = dma.hbm_to_vmem [thread:$0]  %s2758_s7, 16, %s109_s14, [#allocation16]  }
  0x4b   :  { %s1999_s21 = scalar_lea.hbm %s2760_s9, 256 }
  0x4c   :  { %p2000_p4 = scmp.ne.s32.totalorder %s2760_s9, %s1999_s21  ;;  %p2003_p5 = scmp.lt.u32.totalorder %s1999_s21, %s2760_s9 }
  0x4e   :  { %p2005_p6 = pnand %p2003_p5, %p2000_p4 }
  0x50   :  { %2008 = shalt.err (!%p2005_p6)
}
  0x51   :  { %s2009_s19 = scalar_lea.vmem %s128_s16, 256  ;;  %p2014_p8 = scmp.lt.s32.totalorder %s128_s16, %s128_s16 }
  0x52   :  { %p2010_p7 = scmp.ne.s32.totalorder %s128_s16, %s2009_s19  ;;  %p2015_p9 = scmp.lt.s32.totalorder %s2009_s19, %s2009_s19 }
  0x54   :  { %p2016_p10 = por %p2015_p9, %p2014_p8 }
  0x56   :  { %p2017_p11 = pnand %p2016_p10, %p2010_p7 }
  0x58   :  { %2020 = shalt.err (!%p2017_p11)
}
  0x59   :  { %133 = dma.hbm_to_vmem [thread:$0]  %s2760_s9, 256, %s128_s16, [#allocation19], %s2238_s26, %s2238_s26, %s2239_s15  }
  0x5a   :  { %s2242_s20 = smov [#allocation21]   ;;  %s2243_s24 = smov [#allocation3]  }
  0x5b   :  { %s149_s22 = sshll.u32 %s2242_s20, 4  ;;  %s31_s25 = sshll.u32 %s2243_s24, 4  ;;  %s150_s22 = int_to_ptr.vmem [resolvable:$true] %s149_s22  ;;  %s32_s25 = int_to_ptr.vmem [resolvable:$true] %s31_s25 }
  0x5c   :  { %s2021_s27 = scalar_lea.hbm %s2762_s11, 1024 }
  0x5d   :  { %p2022_p12 = scmp.ne.s32.totalorder %s2762_s11, %s2021_s27  ;;  %p2025_p13 = scmp.lt.u32.totalorder %s2021_s27, %s2762_s11 }
  0x5f   :  { %p2027_p0 = pnand %p2025_p13, %p2022_p12 }
  0x61   :  { %2030 = shalt.err (!%p2027_p0)
}
  0x62   :  { %s2031_s9 = scalar_lea.vmem %s150_s22, 1024  ;;  %p2036_p2 = scmp.lt.s32.totalorder %s150_s22, %s150_s22 }
  0x63   :  { %p2032_p1 = scmp.ne.s32.totalorder %s150_s22, %s2031_s9  ;;  %p2037_p3 = scmp.lt.s32.totalorder %s2031_s9, %s2031_s9 }
  0x65   :  { %p2038_p4 = por %p2037_p3, %p2036_p2 }
  0x67   :  { %p2039_p5 = pnand %p2038_p4, %p2032_p1 }
  0x69   :  { %2042 = shalt.err (!%p2039_p5)
}
  0x6a   :  { %155 = dma.hbm_to_vmem [thread:$0]  %s2762_s11, 1024, %s150_s22, [#allocation22], %s2238_s26, %s2238_s26, %s2239_s15  }
  0x6b   :  { %s2043_s18 = scalar_lea.hbm %s2751_s0, 256 }
  0x6c   :  { %p2044_p6 = scmp.ne.s32.totalorder %s2751_s0, %s2043_s18  ;;  %p2047_p7 = scmp.lt.u32.totalorder %s2043_s18, %s2751_s0 }
  0x6e   :  { %p2049_p8 = pnand %p2047_p7, %p2044_p6 }
  0x70   :  { %2052 = shalt.err (!%p2049_p8)
}
  0x71   :  { %s2053_s24 = scalar_lea.vmem %s32_s25, 256  ;;  %p2058_p10 = scmp.lt.s32.totalorder %s32_s25, %s32_s25 }
  0x72   :  { %p2054_p9 = scmp.ne.s32.totalorder %s32_s25, %s2053_s24  ;;  %p2059_p11 = scmp.lt.s32.totalorder %s2053_s24, %s2053_s24 }
  0x74   :  { %p2060_p12 = por %p2059_p11, %p2058_p10 }
  0x76   :  { %p2061_p13 = pnand %p2060_p12, %p2054_p9 }
  0x78   :  { %2064 = shalt.err (!%p2061_p13)
}
  0x79   :  { %s2244_s11 = smov 128   ;;  %s2245_s22 = smov 8  }
  0x7a   :  { %37 = dma.hbm_to_vmem [thread:$0]  %s2751_s0, 256, %s32_s25, [#allocation4], %s2244_s11, %s2244_s11, %s2245_s22  }
  0x7b   :  { %s2246_s27 = smov [#allocation8]   ;;  %s2247_s29 = smov [#allocation11]  }
  0x7c   :  { %s53_s28 = sshll.u32 %s2246_s27, 4  ;;  %s78_s3 = sshll.u32 %s2247_s29, 4  ;;  %s54_s28 = int_to_ptr.vmem [resolvable:$true] %s53_s28  ;;  %s79_s3 = int_to_ptr.vmem [resolvable:$true] %s78_s3 }
  0x7d   :  { %s2065_s16 = scalar_lea.hbm %s2753_s2, 256 }
  0x7e   :  { %p2066_p0 = scmp.ne.s32.totalorder %s2753_s2, %s2065_s16  ;;  %p2069_p1 = scmp.lt.u32.totalorder %s2065_s16, %s2753_s2 }
  0x80   :  { %p2071_p2 = pnand %p2069_p1, %p2066_p0 }
  0x82   :  { %2074 = shalt.err (!%p2071_p2)
}
  0x83   :  { %s2075_s0 = scalar_lea.vmem %s54_s28, 256  ;;  %p2080_p4 = scmp.lt.s32.totalorder %s54_s28, %s54_s28 }
  0x84   :  { %p2076_p3 = scmp.ne.s32.totalorder %s54_s28, %s2075_s0  ;;  %p2081_p5 = scmp.lt.s32.totalorder %s2075_s0, %s2075_s0 }
  0x86   :  { %p2082_p6 = por %p2081_p5, %p2080_p4 }
  0x88   :  { %p2083_p7 = pnand %p2082_p6, %p2076_p3 }
  0x8a   :  { %2086 = shalt.err (!%p2083_p7)
}
  0x8b   :  { %59 = dma.hbm_to_vmem [thread:$0]  %s2753_s2, 256, %s54_s28, [#allocation7], %s2238_s26, %s2238_s26, %s2239_s15  }
  0x8c   :  { %s2087_s20 = scalar_lea.hbm %s2755_s4, 16 }
  0x8d   :  { %p2088_p8 = scmp.ne.s32.totalorder %s2755_s4, %s2087_s20  ;;  %p2091_p9 = scmp.lt.u32.totalorder %s2087_s20, %s2755_s4 }
  0x8f   :  { %p2093_p10 = pnand %p2091_p9, %p2088_p8 }
  0x91   :  { %2096 = shalt.err (!%p2093_p10)
}
  0x92   :  { %s2097_s29 = scalar_lea.vmem %s79_s3, 16  ;;  %s2101_s21 = scalar_lea.vmem %s79_s3, 32 }
  0x93   :  { %p2098_p11 = scmp.ne.s32.totalorder %s79_s3, %s2097_s29  ;;  %p2102_p12 = scmp.lt.s32.totalorder %s79_s3, %s79_s3 }
  0x94   :  { %p2103_p13 = scmp.lt.s32.totalorder %s2101_s21, %s2097_s29 }
  0x96   :  { %p2104_p0 = por %p2103_p13, %p2102_p12 }
  0x98   :  { %p2105_p1 = pnand %p2104_p0, %p2098_p11 }
  0x9a   :  { %2108 = shalt.err (!%p2105_p1)
}
  0x9b   :  { %81 = dma.hbm_to_vmem [thread:$0]  %s2755_s4, 16, %s79_s3, [#allocation10]  }
  0x9c   :  { %s2248_s28 = smov [#allocation14]   ;;  %s2249_s16 = smov [#allocation17]  }
  0x9d   :  { %s98_s9 = sshll.u32 %s2248_s28, 4  ;;  %s118_s30 = sshll.u32 %s2249_s16, 4  ;;  %s99_s9 = int_to_ptr.vmem [resolvable:$true] %s98_s9  ;;  %s119_s30 = int_to_ptr.vmem [resolvable:$true] %s118_s30 }
  0x9e   :  { %s2109_s18 = scalar_lea.hbm %s2757_s6, 16 }
  0x9f   :  { %p2110_p2 = scmp.ne.s32.totalorder %s2757_s6, %s2109_s18  ;;  %p2113_p3 = scmp.lt.u32.totalorder %s2109_s18, %s2757_s6 }
  0xa1   :  { %p2115_p4 = pnand %p2113_p3, %p2110_p2 }
  0xa3   :  { %2118 = shalt.err (!%p2115_p4)
}
  0xa4   :  { %s2119_s4 = scalar_lea.vmem %s99_s9, 16  ;;  %s2123_s3 = scalar_lea.vmem %s99_s9, 32 }
  0xa5   :  { %p2120_p5 = scmp.ne.s32.totalorder %s99_s9, %s2119_s4  ;;  %p2124_p6 = scmp.lt.s32.totalorder %s99_s9, %s99_s9 }
  0xa6   :  { %p2125_p7 = scmp.lt.s32.totalorder %s2123_s3, %s2119_s4 }
  0xa8   :  { %p2126_p8 = por %p2125_p7, %p2124_p6 }
  0xaa   :  { %p2127_p9 = pnand %p2126_p8, %p2120_p5 }
  0xac   :  { %2130 = shalt.err (!%p2127_p9)
}
  0xad   :  { %101 = dma.hbm_to_vmem [thread:$0]  %s2757_s6, 16, %s99_s9, [#allocation13]  }
  0xae   :  { %s2131_s23 = scalar_lea.hbm %s2759_s8, 16 }
  0xaf   :  { %p2132_p10 = scmp.ne.s32.totalorder %s2759_s8, %s2131_s23  ;;  %p2135_p11 = scmp.lt.u32.totalorder %s2131_s23, %s2759_s8 }
  0xb1   :  { %p2137_p12 = pnand %p2135_p11, %p2132_p10 }
  0xb3   :  { %2140 = shalt.err (!%p2137_p12)
}
  0xb4   :  { %s2141_s15 = scalar_lea.vmem %s119_s30, 16  ;;  %s2145_s28 = scalar_lea.vmem %s119_s30, 32 }
  0xb5   :  { %p2142_p13 = scmp.ne.s32.totalorder %s119_s30, %s2141_s15  ;;  %p2146_p0 = scmp.lt.s32.totalorder %s119_s30, %s119_s30 }
  0xb6   :  { %p2147_p1 = scmp.lt.s32.totalorder %s2145_s28, %s2141_s15 }
  0xb8   :  { %p2148_p2 = por %p2147_p1, %p2146_p0 }
  0xba   :  { %p2149_p3 = pnand %p2148_p2, %p2142_p13 }
  0xbc   :  { %2152 = shalt.err (!%p2149_p3)
}
  0xbd   :  { %121 = dma.hbm_to_vmem [thread:$0]  %s2759_s8, 16, %s119_s30, [#allocation16]  }
  0xbe   :  { %s2250_s16 = smov [#allocation20]   ;;  %s2251_s17 = smov [#allocation23]  }
  0xbf   :  { %s140_s1 = sshll.u32 %s2250_s16, 4  ;;  %s162_s18 = sshll.u32 %s2251_s17, 4  ;;  %s141_s1 = int_to_ptr.vmem [resolvable:$true] %s140_s1  ;;  %s163_s18 = int_to_ptr.vmem [resolvable:$true] %s162_s18 }
  0xc0   :  { %s2153_s19 = scalar_lea.hbm %s2761_s10, 16 }
  0xc1   :  { %p2154_p4 = scmp.ne.s32.totalorder %s2761_s10, %s2153_s19  ;;  %p2157_p5 = scmp.lt.u32.totalorder %s2153_s19, %s2761_s10 }
  0xc3   :  { %p2159_p6 = pnand %p2157_p5, %p2154_p4 }
  0xc5   :  { %2162 = shalt.err (!%p2159_p6)
}
  0xc6   :  { %s2163_s8 = scalar_lea.vmem %s141_s1, 16  ;;  %s2167_s30 = scalar_lea.vmem %s141_s1, 32 }
  0xc7   :  { %p2164_p7 = scmp.ne.s32.totalorder %s141_s1, %s2163_s8  ;;  %p2168_p8 = scmp.lt.s32.totalorder %s141_s1, %s141_s1 }
  0xc8   :  { %p2169_p9 = scmp.lt.s32.totalorder %s2167_s30, %s2163_s8 }
  0xca   :  { %p2170_p10 = por %p2169_p9, %p2168_p8 }
  0xcc   :  { %p2171_p11 = pnand %p2170_p10, %p2164_p7 }
  0xce   :  { %2174 = shalt.err (!%p2171_p11)
}
  0xcf   :  { %143 = dma.hbm_to_vmem [thread:$0]  %s2761_s10, 16, %s141_s1, [#allocation19]  }
  0xd0   :  { %s2175_s27 = scalar_lea.hbm %s2763_s12, 16 }
  0xd1   :  { %p2176_p12 = scmp.ne.s32.totalorder %s2763_s12, %s2175_s27  ;;  %p2179_p13 = scmp.lt.u32.totalorder %s2175_s27, %s2763_s12 }
  0xd3   :  { %p2181_p0 = pnand %p2179_p13, %p2176_p12 }
  0xd5   :  { %2184 = shalt.err (!%p2181_p0)
}
  0xd6   :  { %s2185_s28 = scalar_lea.vmem %s163_s18, 16  ;;  %s2189_s6 = scalar_lea.vmem %s163_s18, 32 }
  0xd7   :  { %p2186_p1 = scmp.ne.s32.totalorder %s163_s18, %s2185_s28  ;;  %p2190_p2 = scmp.lt.s32.totalorder %s163_s18, %s163_s18 }
  0xd8   :  { %p2191_p3 = scmp.lt.s32.totalorder %s2189_s6, %s2185_s28 }
  0xda   :  { %p2192_p4 = por %p2191_p3, %p2190_p2 }
  0xdc   :  { %p2193_p5 = pnand %p2192_p4, %p2186_p1 }
  0xde   :  { %2196 = shalt.err (!%p2193_p5)
}
  0xdf   :  { %165 = dma.hbm_to_vmem [thread:$0]  %s2763_s12, 16, %s163_s18, [#allocation22]  }
  0xe0   :  { %2219 = dma.done.wait [#allocation4], 256  }
  0xe1   :  { %2220 = vsyncadd [#allocation4], 4294967040 }
  0xe2   :  { %2221 = dma.done.wait [#allocation7], 384  }
  0xe3   :  { %2222 = vsyncadd [#allocation7], 4294966912 }
  0xe4   :  { %2223 = dma.done.wait [#allocation10], 272  }
  0xe5   :  { %2224 = vsyncadd [#allocation10], 4294967024 }
  0xe6   :  { %2225 = dma.done.wait [#allocation13], 32  }
  0xe7   :  { %2226 = vsyncadd [#allocation13], 4294967264 }
  0xe8   :  { %2227 = dma.done.wait [#allocation16], 32  }
  0xe9   :  { %2228 = vsyncadd [#allocation16], 4294967264 }
  0xea   :  { %2229 = dma.done.wait [#allocation19], 272  }
  0xeb   :  { %2230 = vsyncadd [#allocation19], 4294967024 }
  0xec   :  { %2231 = dma.done.wait [#allocation22], 1040  }
  0xed   :  { %2232 = vsyncadd [#allocation22], 4294966256  ;;  %vm211_vm0 = vcmask 261120   ;;  %v2508_v0 = vld [vmem:[#allocation3] sm:$0xff]  ;;  %v2510_v1 = vld [vmem:[#allocation3 + $0x8] sm:$0xff]  ;;  %v2252_v15 = vmov 0.0  }
  0xee   :  { %v212_v2 = vsel %vm211_vm0, %v2508_v0, 0.0  ;;  %v215_v3 = vsel %vm211_vm0, %v2510_v1, 0.0  ;;  %v1853_v14 = vld [vmem:[#allocation8] sm:$0xff]   ;;  %1681 = vmatprep.subr.bf16.mxu0 %v2252_v15  ;;  %1701 = vmatprep.subr.bf16.mxu1 %v2252_v15  ;;  %v1854_v16 = vld [vmem:[#allocation8 + $0x8] sm:$0xff]   ;;  %vm2253_vm1 = vmmov 0   ;;  %s2254_s12 = smov 88  }
  0xef   :  { %213 = vadd.xlane.f32.xlu0 %v212_v2  ;;  %1682 = vmatpush3.bf16.msra.mxu0 %v1853_v14  ;;  %v1591_v25 = vld [vmem:[#allocation12] ss:$0 sm:$0xff]  ;;  %v1592_v29 = vld [vmem:[#allocation14] ss:$0 sm:$0xff]  ;;  %s2255_s16 = smov 96   ;;  %s2256_s1 = smov 120  }
  0xf0   :  { %1685 = vmatprep.mubr.msk.bf16.mxu0 %vm2253_vm1, %v2252_v15  ;;  %1683 = vmatprep.subr.bf16.mxu0 %v2252_v15  ;;  %s2257_s17 = smov 112   ;;  %s2258_s18 = smov 80   ;;  %vm320_vm2 = vcmask 64512   ;;  %vm382_vm3 = vcmask 1043456   ;;  %v208_v2 = vld [vmem:[#allocation6] sm:$0xff]  ;;  %vm429_vm4 = vcmask 60416  }
  0xf1   :  { %1703 = vmatprep.mubr.msk.bf16.mxu1 %vm2253_vm1, %v2252_v15  ;;  %s2259_s0 = smov 104   ;;  %s2260_s25 = smov 72   ;;  %vm895_vm5 = vcmask 64516   ;;  %vm546_vm6 = vcmask 126016   ;;  %vm663_vm7 = vcmask 191616   ;;  %vm780_vm8 = vcmask 257216  }
  0xf2   :  { %s2261_s19 = smov 48   ;;  %s2262_s7 = smov 56   ;;  %vm1013_vm9 = vcmask 130116   ;;  %vm1131_vm10 = vcmask 195716   ;;  %vm1249_vm11 = vcmask 261316  }
  0xf3   :  { %216 = vadd.xlane.f32.xlu0 %v215_v3  ;;  %1684 = vmatpush3.bf16.msra.mxu0 %v1854_v16  ;;  %s2263_s4 = smov 40   ;;  %s2265_s3 = smov 16  }
  0xf4   :  { %1689 = vmatprep.subr.bf16.mxu0 %v2252_v15  ;;  %s2266_s14 = smov [#allocation24]  }
  0xf5   :  { %s1573_s8 = sshll.u32 %s2266_s14, 4  ;;  %s1574_s8 = int_to_ptr.vmem [resolvable:$true] %s1573_s8 }
  0xf6   :  { %s2197_s30 = scalar_lea.vmem %s1574_s8, 256  ;;  %p2202_p7 = scmp.lt.s32.totalorder %s1574_s8, %s1574_s8 }
  0xf7   :  { %p2198_p6 = scmp.ne.s32.totalorder %s1574_s8, %s2197_s30  ;;  %p2203_p8 = scmp.lt.s32.totalorder %s2197_s30, %s2197_s30 }
  0xf9   :  { %p2204_p9 = por %p2203_p8, %p2202_p7 }
  0xfb   :  { %p2205_p10 = pnand %p2204_p9, %p2198_p6 }
 0x17c   :  { %v214_v4 = vpop.xlane.xlu0 %213 }
 0x17d   :  { %v219_v5 = vmul.f32 0.03125, %v214_v4 }
 0x17f   :  { %v221_v6 = vsub.f32 %v2508_v0, %v219_v5 }
 0x180   :  { %v217_v7 = vpop.xlane.xlu0 %216 }
 0x181   :  { %v220_v8 = vmul.f32 0.03125, %v217_v7  ;;  %v223_v9 = vmul.f32 %v221_v6, %v221_v6 }
 0x183   :  { %v222_v10 = vsub.f32 %v2510_v1, %v220_v8  ;;  %v225_v11 = vsel %vm211_vm0, %v223_v9, 0.0 }
 0x184   :  { %226 = vadd.xlane.f32.xlu1 %v225_v11 }
 0x185   :  { %v224_v12 = vmul.f32 %v222_v10, %v222_v10 }
 0x187   :  { %v228_v13 = vsel %vm211_vm0, %v224_v12, 0.0 }
 0x188   :  { %229 = vadd.xlane.f32.xlu1 %v228_v13 }
 0x211   :  { %v227_v17 = vpop.xlane.xlu1 %226 }
 0x212   :  { %v231_v18 = vmul.f32 0.03125, %v227_v17 }
 0x214   :  { %v233_v19 = vadd.f32 1e-05, %v231_v18 }
 0x215   :  { %v230_v20 = vpop.xlane.xlu1 %229 }
 0x216   :  { %1867 = vrsqrt.f32 %v233_v19  ;;  %v232_v21 = vmul.f32 0.03125, %v230_v20 }
 0x218   :  { %v234_v22 = vadd.f32 1e-05, %v232_v21 }
 0x21a   :  { %1869 = vrsqrt.f32 %v234_v22 }
 0x220   :  { %v1868_v23 = vpop.eup %1867 }
 0x221   :  { %v237_v24 = vmul.f32 %v1868_v23, %v221_v6 }
 0x223   :  { %v245_v28 = vmul.f32 %v1591_v25, %v237_v24 }
 0x224   :  { %v1870_v26 = vpop.eup %1869 }
 0x225   :  { %v238_v27 = vmul.f32 %v1870_v26, %v222_v10  ;;  %v253_v31 = vadd.f32 %v1592_v29, %v245_v28 }
 0x227   :  { %v246_v30 = vmul.f32 %v1591_v25, %v238_v27 }
 0x229   :  { %v254_v32 = vadd.f32 %v1592_v29, %v246_v30 }
 0x22b   :  { %v255_v33 = vpack.c.bf16 %v254_v32, %v253_v31 }
 0x22d   :  { %1686 = vmatmul.mubr.msk.bf16.vlgmr.msra.gmra.mrb[0].mxu0 %vm211_vm0, %v255_v33 }
 0x22e   :  { %1691 = vmatprep.mubr.msk.bf16.mxu0 %vm2253_vm1, %v2252_v15 }
 0x300   :  { %v309_v34 = vpop.f32.mrb[0].mxu0 }
 0x301   :  { %v1687_v35 = vpop.f32.mrb[1].mxu0 }
 0x302   :  { %v312_v36 = vpop.f32.mrb[2].mxu0 }
 0x303   :  { %v2531_v37 = vpack.c.bf16 %v312_v36, %v309_v34  ;;  %v1688_v38 = vpop.f32.mrb[3].mxu0 }
 0x305   :  { %433 = vrot.lane.b32.xlu1 %v2531_v37, %s2254_s12  ;;  %318 = vrot.lane.b32.xlu0 %v2531_v37, %s2255_s16  ;;  %v2540_v39 = vrot.slane %v2531_v37, 4 }
 0x309   :  { %431 = vrot.lane.b32.xlu1 %v2531_v37, %s2256_s1  ;;  %548 = vrot.lane.b32.xlu0 %v2531_v37, %s2257_s17 }
 0x30d   :  { %550 = vrot.lane.b32.xlu1 %v2531_v37, %s2258_s18  ;;  %665 = vrot.lane.b32.xlu0 %v2531_v37, %s2259_s0 }
 0x311   :  { %667 = vrot.lane.b32.xlu1 %v2531_v37, %s2260_s25  ;;  %899 = vrot.lane.b32.xlu0 %v2540_v39, %s2254_s12 }
 0x315   :  { %1017 = vrot.lane.b32.xlu0 %v2540_v39, %s2258_s18  ;;  %783 = vrot.lane.b32.xlu1 %v2540_v39, %s2255_s16 }
 0x319   :  { %1135 = vrot.lane.b32.xlu0 %v2540_v39, %s2260_s25  ;;  %897 = vrot.lane.b32.xlu1 %v2540_v39, %s2256_s1 }
 0x31d   :  { %377 = vrot.lane.b32.xlu0 %v2531_v37, %s2238_s26  ;;  %1015 = vrot.lane.b32.xlu1 %v2540_v39, %s2257_s17 }
 0x321   :  { %608 = vrot.lane.b32.xlu0 %v2531_v37, %s2261_s19  ;;  %1133 = vrot.lane.b32.xlu1 %v2540_v39, %s2259_s0 }
 0x325   :  { %491 = vrot.lane.b32.xlu1 %v2531_v37, %s2262_s7 }
 0x377   :  { %v434_v40 = vpop.permute.xlu1 %433  ;;  %v319_v41 = vpop.permute.xlu0 %318 }
 0x378   :  { %v325_v42 = vsel %vm320_vm2, %v319_v41, 0  ;;  %v439_v43 = vsel %vm320_vm2, %v434_v40, 0 }
 0x379   :  { %1690 = vmatpush3.bf16.xpose.msra.mxu0 %v325_v42  ;;  %1702 = vmatpush3.bf16.xpose.msra.mxu1 %v439_v43 }
 0x37a   :  { %1713 = vmatprep.subr.bf16.mxu1 %v2252_v15  ;;  %1695 = vmatprep.subr.bf16.mxu0 %v2252_v15 }
 0x37b   :  { %v432_v44 = vpop.permute.xlu1 %431  ;;  %v549_v45 = vpop.permute.xlu0 %548 }
 0x37f   :  { %v551_v46 = vpop.permute.xlu1 %550  ;;  %v666_v47 = vpop.permute.xlu0 %665 }
 0x380   :  { %v556_v48 = vsel %vm320_vm2, %v551_v46, 0  ;;  %1692 = vmatmul.mubr.msk.bf16.vlgmr.msra.gmra.mrb[4].mxu0 %vm320_vm2, %v2531_v37  ;;  %1704 = vmatmul.mubr.msk.bf16.vlgmr.msra.gmra.mrb[0].mxu1 %vm320_vm2, %v432_v44 }
 0x381   :  { %1714 = vmatpush3.bf16.xpose.msra.mxu1 %v556_v48  ;;  %1715 = vmatprep.mubr.msk.bf16.mxu1 %vm2253_vm1, %v2252_v15 }
 0x382   :  { %1725 = vmatprep.subr.bf16.mxu1 %v2252_v15  ;;  %1697 = vmatprep.mubr.msk.bf16.mxu0 %vm2253_vm1, %v2252_v15 }
 0x383   :  { %v900_v49 = vpop.permute.xlu0 %899  ;;  %v668_v50 = vpop.permute.xlu1 %667 }
 0x384   :  { %v673_v52 = vsel %vm320_vm2, %v668_v50, 0  ;;  %v905_v58 = vsel %vm320_vm2, %v900_v49, 0 }
 0x387   :  { %v1018_v51 = vpop.permute.xlu0 %1017  ;;  %v784_v54 = vpop.permute.xlu1 %783 }
 0x388   :  { %1716 = vmatmul.mubr.msk.bf16.vlgmr.msra.gmra.mrb[4].mxu1 %vm320_vm2, %v549_v45  ;;  %v789_v56 = vsel %vm320_vm2, %v784_v54, 0  ;;  %v1023_v60 = vsel %vm320_vm2, %v1018_v51, 0 }
 0x389   :  { %1726 = vmatpush3.bf16.xpose.msra.mxu1 %v673_v52  ;;  %1727 = vmatprep.mubr.msk.bf16.mxu1 %vm2253_vm1, %v2252_v15 }
 0x38a   :  { %1737 = vmatprep.subr.bf16.mxu1 %v2252_v15 }
 0x38b   :  { %v1136_v53 = vpop.permute.xlu0 %1135  ;;  %v898_v59 = vpop.permute.xlu1 %897 }
 0x38c   :  { %v1141_v62 = vsel %vm320_vm2, %v1136_v53, 0 }
 0x38f   :  { %v378_v55 = vpop.permute.xlu0 %377  ;;  %v1016_v61 = vpop.permute.xlu1 %1015 }
 0x390   :  { %v384_v57 = vsel %vm382_vm3, %v378_v55, 0  ;;  %1728 = vmatmul.mubr.msk.bf16.vlgmr.msra.gmra.mrb[8].mxu1 %vm320_vm2, %v666_v47 }
 0x391   :  { %1696 = vmatpush3.bf16.msra.mxu0 %v384_v57  ;;  %1738 = vmatpush3.bf16.xpose.msra.mxu1 %v789_v56 }
 0x392   :  { %1739 = vmatprep.mubr.msk.bf16.mxu1 %vm2253_vm1, %v2252_v15  ;;  %1749 = vmatprep.subr.bf16.mxu1 %v2252_v15 }
 0x393   :  { %1707 = vmatprep.subr.bf16.mxu0 %v2252_v15  ;;  %v1134_v63 = vpop.permute.xlu1 %1133  ;;  %v609_v53 = vpop.permute.xlu0 %608 }
 0x397   :  { %v492_v54 = vpop.permute.xlu1 %491 }
 0x398   :  { %1740 = vmatmul.mubr.msk.bf16.vlgmr.msra.gmra.mrb[12].mxu1 %vm320_vm2, %v2540_v39 }
 0x399   :  { %1750 = vmatpush3.bf16.xpose.msra.mxu1 %v905_v58  ;;  %1751 = vmatprep.mubr.msk.bf16.mxu1 %vm2253_vm1, %v2252_v15 }
 0x39a   :  { %1761 = vmatprep.subr.bf16.mxu1 %v2252_v15 }
 0x3a0   :  { %1752 = vmatmul.mubr.msk.bf16.vlgmr.msra.gmra.mrb[16].mxu1 %vm320_vm2, %v898_v59 }
 0x3a1   :  { %1762 = vmatpush3.bf16.xpose.msra.mxu1 %v1023_v60  ;;  %1763 = vmatprep.mubr.msk.bf16.mxu1 %vm2253_vm1, %v2252_v15 }
 0x3a2   :  { %1773 = vmatprep.subr.bf16.mxu1 %v2252_v15 }
 0x3a8   :  { %1764 = vmatmul.mubr.msk.bf16.vlgmr.msra.gmra.mrb[20].mxu1 %vm320_vm2, %v1016_v61 }
 0x3a9   :  { %1774 = vmatpush3.bf16.xpose.msra.mxu1 %v1141_v62  ;;  %1775 = vmatprep.mubr.msk.bf16.mxu1 %vm2253_vm1, %v2252_v15 }
 0x3aa   :  { %1785 = vmatprep.subr.bf16.mxu1 %v2252_v15 }
 0x3b0   :  { %1776 = vmatmul.mubr.msk.bf16.vlgmr.msra.gmra.mrb[24].mxu1 %vm320_vm2, %v1134_v63 }
 0x3b1   :  { %1789 = vmatprep.mubr.msk.bf16.mxu1 %vm2253_vm1, %v2252_v15 }
 0x453   :  { %v361_v3 = vpop.f32.mrb[4].mxu0  ;;  %v475_v4 = vpop.f32.mrb[0].mxu1 }
 0x454   :  { %v2600_v5 = vadd.f32 %v361_v3, %v208_v2  ;;  %v2602_v6 = vadd.f32 %v475_v4, %v208_v2  ;;  %v1693_v7 = vpop.f32.mrb[5].mxu0  ;;  %v1705_v8 = vpop.f32.mrb[1].mxu1 }
 0x455   :  { %v364_v9 = vpop.f32.mrb[6].mxu0  ;;  %v478_v10 = vpop.f32.mrb[2].mxu1 }
 0x456   :  { %v1694_v11 = vpop.f32.mrb[7].mxu0  ;;  %v1706_v12 = vpop.f32.mrb[3].mxu1  ;;  %v481_v13 = vsel %vm320_vm2, %v2602_v6, -inf  ;;  %v367_v14 = vsel %vm320_vm2, %v2600_v5, -inf  ;;  %v614_v10 = vsel %vm382_vm3, %v609_v53, 0 }
 0x457   :  { %482 = vmax.xlane.f32.xlu1 %v481_v13  ;;  %368 = vmax.xlane.f32.xlu0 %v367_v14 }
 0x45b   :  { %v592_v16 = vpop.f32.mrb[4].mxu1 }
 0x45c   :  { %v593_v17 = vadd.f32 %v592_v16, %v208_v2  ;;  %v1717_v18 = vpop.f32.mrb[5].mxu1 }
 0x45d   :  { %v595_v19 = vpop.f32.mrb[6].mxu1 }
 0x45e   :  { %v1718_v20 = vpop.f32.mrb[7].mxu1  ;;  %v598_v21 = vsel %vm320_vm2, %v593_v17, -inf }
 0x45f   :  { %599 = vmax.xlane.f32.xlu0 %v598_v21 }
 0x463   :  { %v709_v22 = vpop.f32.mrb[8].mxu1 }
 0x464   :  { %v2609_v23 = vadd.f32 %v709_v22, %v208_v2  ;;  %v1729_v24 = vpop.f32.mrb[9].mxu1 }
 0x465   :  { %v712_v25 = vpop.f32.mrb[10].mxu1 }
 0x466   :  { %v1730_v26 = vpop.f32.mrb[11].mxu1  ;;  %v715_v27 = vsel %vm320_vm2, %v2609_v23, -inf }
 0x467   :  { %716 = vmax.xlane.f32.xlu0 %v715_v27 }
 0x468   :  { %841 = vrot.lane.b32.xlu1 %v2540_v39, %s2238_s26  ;;  %s2264_s26 = smov 24  }
 0x46b   :  { %v825_v28 = vpop.f32.mrb[12].mxu1 }
 0x46c   :  { %v1741_v29 = vpop.f32.mrb[13].mxu1  ;;  %v2620_v48 = vadd.f32 %v825_v28, %v208_v2 }
 0x46d   :  { %v828_v30 = vpop.f32.mrb[14].mxu1 }
 0x46e   :  { %v1742_v31 = vpop.f32.mrb[15].mxu1  ;;  %v831_v50 = vsel %vm320_vm2, %v2620_v48, -inf }
 0x473   :  { %v941_v32 = vpop.f32.mrb[16].mxu1 }
 0x474   :  { %v1753_v33 = vpop.f32.mrb[17].mxu1  ;;  %v2622_v49 = vadd.f32 %v941_v32, %v208_v2 }
 0x475   :  { %v944_v34 = vpop.f32.mrb[18].mxu1 }
 0x476   :  { %v1754_v35 = vpop.f32.mrb[19].mxu1  ;;  %v947_v51 = vsel %vm320_vm2, %v2622_v49, -inf }
 0x47b   :  { %v1059_v36 = vpop.f32.mrb[20].mxu1 }
 0x47c   :  { %v2615_v38 = vadd.f32 %v1059_v36, %v208_v2  ;;  %v1765_v40 = vpop.f32.mrb[21].mxu1 }
 0x47d   :  { %v1062_v41 = vpop.f32.mrb[22].mxu1  ;;  %725 = vrot.lane.b32.xlu0 %v2531_v37, %s2263_s4 }
 0x47e   :  { %v1766_v42 = vpop.f32.mrb[23].mxu1  ;;  %v1065_v37 = vsel %vm320_vm2, %v2615_v38, -inf }
 0x483   :  { %v1177_v43 = vpop.f32.mrb[24].mxu1 }
 0x484   :  { %v2618_v44 = vadd.f32 %v1177_v43, %v208_v2  ;;  %v1777_v45 = vpop.f32.mrb[25].mxu1 }
 0x485   :  { %v1180_v46 = vpop.f32.mrb[26].mxu1 }
 0x486   :  { %v1778_v47 = vpop.f32.mrb[27].mxu1  ;;  %v1183_v52 = vsel %vm320_vm2, %v2618_v44, -inf }
 0x48c   :  { %832 = vmax.xlane.f32.xlu1 %v831_v50 }
 0x490   :  { %948 = vmax.xlane.f32.xlu1 %v947_v51 }
 0x49c   :  { %1066 = vmax.xlane.f32.xlu0 %v1065_v37 }
 0x4a1   :  { %957 = vrot.lane.b32.xlu1 %v2540_v39, %s2262_s7 }
 0x4b2   :  { %1075 = vrot.lane.b32.xlu0 %v2540_v39, %s2261_s19 }
 0x4c5   :  { %1184 = vmax.xlane.f32.xlu1 %v1183_v52 }
 0x4d6   :  { %1193 = vrot.lane.b32.xlu1 %v2540_v39, %s2263_s4 }
 0x4e4   :  { %v483_v55 = vpop.xlane.xlu1 %482  ;;  %v369_v56 = vpop.xlane.xlu0 %368 }
 0x4e5   :  { %v484_v57 = vsub.f32 %v2602_v6, %v483_v55  ;;  %v370_v58 = vsub.f32 %v2600_v5, %v369_v56  ;;  %v497_v6 = vsel %vm382_vm3, %v492_v54, 0 }
 0x4e7   :  { %v485_v59 = vmul.f32 1.442695, %v484_v57  ;;  %v371_v60 = vmul.f32 1.442695, %v370_v58 }
 0x4e9   :  { %1871 = vpow2.f32 %v485_v59 }
 0x4ea   :  { %1873 = vpow2.f32 %v371_v60 }
 0x4ec   :  { %v600_v61 = vpop.xlane.xlu0 %599 }
 0x4ed   :  { %v601_v62 = vsub.f32 %v593_v17, %v600_v61  ;;  %v842_v17 = vpop.permute.xlu1 %841 }
 0x4ee   :  { %v847_v19 = vsel %vm382_vm3, %v842_v17, 0 }
 0x4ef   :  { %v602_v3 = vmul.f32 1.442695, %v601_v62 }
 0x4f1   :  { %1875 = vpow2.f32 %v602_v3 }
 0x4f3   :  { %v1872_v63 = vpop.eup %1871 }
 0x4f4   :  { %v2639_v2 = vpop.eup %1873  ;;  %v487_v39 = vsel %vm320_vm2, %v1872_v63, 0.0  ;;  %v717_v4 = vpop.xlane.xlu0 %716  ;;  %v490_v9 = vpack.c.bf16 %v1872_v63, %v1872_v63 }
 0x4f5   :  { %488 = vadd.xlane.f32.xlu0 %v487_v39  ;;  %v376_v7 = vpack.c.bf16 %v2639_v2, %v2639_v2  ;;  %v718_v5 = vsub.f32 %v2609_v23, %v717_v4  ;;  %v373_v45 = vsel %vm320_vm2, %v2639_v2, 0.0 }
 0x4f7   :  { %1698 = vmatmul.mubr.msk.bf16.vlgmr.msra.gmra.mrb[8].mxu0 %vm320_vm2, %v376_v7  ;;  %v719_v8 = vmul.f32 1.442695, %v718_v5 }
 0x4f8   :  { %1708 = vmatpush3.bf16.msra.mxu0 %v497_v6  ;;  %1709 = vmatprep.mubr.msk.bf16.mxu0 %vm2253_vm1, %v2252_v15  ;;  %v726_v12 = vpop.permute.xlu0 %725 }
 0x4f9   :  { %1719 = vmatprep.subr.bf16.mxu0 %v2252_v15  ;;  %1877 = vpow2.f32 %v719_v8  ;;  %v731_v14 = vsel %vm382_vm3, %v726_v12, 0 }
 0x4fb   :  { %v2655_v11 = vpop.eup %1875 }
 0x4fc   :  { %v607_v13 = vpack.c.bf16 %v2655_v11, %v2655_v11 }
 0x4ff   :  { %1710 = vmatmul.mubr.msk.bf16.vlgmr.msra.gmra.mrb[12].mxu0 %vm320_vm2, %v490_v9 }
 0x500   :  { %1720 = vmatpush3.bf16.msra.mxu0 %v614_v10  ;;  %1721 = vmatprep.mubr.msk.bf16.mxu0 %vm2253_vm1, %v2252_v15 }
 0x501   :  { %1731 = vmatprep.subr.bf16.mxu0 %v2252_v15 }
 0x503   :  { %v1878_v16 = vpop.eup %1877 }
 0x504   :  { %v724_v18 = vpack.c.bf16 %v1878_v16, %v1878_v16  ;;  %v721_v43 = vsel %vm320_vm2, %v1878_v16, 0.0 }
 0x507   :  { %1722 = vmatmul.mubr.msk.bf16.vlgmr.msra.gmra.mrb[16].mxu0 %vm320_vm2, %v607_v13 }
 0x508   :  { %1732 = vmatpush3.bf16.msra.mxu0 %v731_v14  ;;  %1733 = vmatprep.mubr.msk.bf16.mxu0 %vm2253_vm1, %v2252_v15 }
 0x509   :  { %1743 = vmatprep.subr.bf16.mxu0 %v2252_v15 }
 0x50f   :  { %1734 = vmatmul.mubr.msk.bf16.vlgmr.msra.gmra.mrb[20].mxu0 %vm320_vm2, %v724_v18 }
 0x510   :  { %1744 = vmatpush3.bf16.msra.mxu0 %v847_v19  ;;  %1745 = vmatprep.mubr.msk.bf16.mxu0 %vm2253_vm1, %v2252_v15 }
 0x511   :  { %1755 = vmatprep.subr.bf16.mxu0 %v2252_v15 }
 0x519   :  { %v833_v20 = vpop.xlane.xlu1 %832 }
 0x51a   :  { %v834_v21 = vsub.f32 %v2620_v48, %v833_v20 }
 0x51c   :  { %v835_v22 = vmul.f32 1.442695, %v834_v21 }
 0x51d   :  { %v949_v23 = vpop.xlane.xlu1 %948 }
 0x51e   :  { %1879 = vpow2.f32 %v835_v22  ;;  %v950_v24 = vsub.f32 %v2622_v49, %v949_v23 }
 0x520   :  { %v951_v25 = vmul.f32 1.442695, %v950_v24 }
 0x521   :  { %v958_v27 = vpop.permute.xlu1 %957 }
 0x522   :  { %1881 = vpow2.f32 %v951_v25  ;;  %v963_v31 = vsel %vm382_vm3, %v958_v27, 0 }
 0x528   :  { %v1880_v26 = vpop.eup %1879 }
 0x529   :  { %v1067_v28 = vpop.xlane.xlu0 %1066  ;;  %v840_v29 = vpack.c.bf16 %v1880_v26, %v1880_v26  ;;  %v837_v53 = vsel %vm320_vm2, %v1880_v26, 0.0 }
 0x52a   :  { %v1068_v30 = vsub.f32 %v2615_v38, %v1067_v28 }
 0x52b   :  { %1746 = vmatmul.mubr.msk.bf16.vlgmr.msra.gmra.mrb[24].mxu0 %vm320_vm2, %v840_v29 }
 0x52c   :  { %v1882_v32 = vpop.eup %1881  ;;  %v1069_v33 = vmul.f32 1.442695, %v1068_v30  ;;  %1756 = vmatpush3.bf16.msra.mxu0 %v963_v31  ;;  %1757 = vmatprep.mubr.msk.bf16.mxu0 %vm2253_vm1, %v2252_v15 }
 0x52d   :  { %v953_v34 = vsel %vm320_vm2, %v1882_v32, 0.0  ;;  %1767 = vmatprep.subr.bf16.mxu0 %v2252_v15  ;;  %v1076_v35 = vpop.permute.xlu0 %1075  ;;  %v956_v36 = vpack.c.bf16 %v1882_v32, %v1882_v32 }
 0x52e   :  { %1883 = vpow2.f32 %v1069_v33  ;;  %954 = vadd.xlane.f32.xlu0 %v953_v34  ;;  %v1081_v38 = vsel %vm382_vm3, %v1076_v35, 0 }
 0x533   :  { %1758 = vmatmul.mubr.msk.bf16.vlgmr.msra.gmra.mrb[28].mxu0 %vm320_vm2, %v956_v36 }
 0x534   :  { %1768 = vmatpush3.bf16.msra.mxu0 %v1081_v38  ;;  %1769 = vmatprep.mubr.msk.bf16.mxu0 %vm2253_vm1, %v2252_v15 }
 0x535   :  { %1779 = vmatprep.subr.bf16.mxu0 %v2252_v15 }
 0x538   :  { %v1884_v40 = vpop.eup %1883 }
 0x539   :  { %v1071_v41 = vsel %vm320_vm2, %v1884_v40, 0.0  ;;  %v1074_v42 = vpack.c.bf16 %v1884_v40, %v1884_v40 }
 0x53a   :  { %1072 = vadd.xlane.f32.xlu1 %v1071_v41 }
 0x53b   :  { %1770 = vmatmul.mubr.msk.bf16.vlgmr.msra.gmra.mrb[32].mxu0 %vm320_vm2, %v1074_v42 }
 0x53c   :  { %1781 = vmatprep.mubr.msk.bf16.mxu0 %vm2253_vm1, %v2252_v15 }
 0x53e   :  { %722 = vadd.xlane.f32.xlu1 %v721_v43 }
 0x542   :  { %374 = vadd.xlane.f32.xlu1 %v373_v45 }
 0x552   :  { %v1185_v46 = vpop.xlane.xlu1 %1184 }
 0x553   :  { %v1186_v47 = vsub.f32 %v2618_v44, %v1185_v46  ;;  %v604_v44 = vsel %vm320_vm2, %v2655_v11, 0.0 }
 0x555   :  { %v1187_v48 = vmul.f32 1.442695, %v1186_v47 }
 0x556   :  { %v1194_v49 = vpop.permute.xlu1 %1193 }
 0x557   :  { %1885 = vpow2.f32 %v1187_v48  ;;  %v1199_v50 = vsel %vm382_vm3, %v1194_v49, 0 }
 0x558   :  { %1780 = vmatpush3.bf16.msra.mxu0 %v1199_v50 }
 0x559   :  { %1793 = vmatprep.subr.bf16.mxu0 %v2252_v15 }
 0x561   :  { %v1886_v51 = vpop.eup %1885 }
 0x562   :  { %v1189_v37 = vsel %vm320_vm2, %v1886_v51, 0.0  ;;  %v1192_v52 = vpack.c.bf16 %v1886_v51, %v1886_v51 }
 0x563   :  { %1190 = vadd.xlane.f32.xlu0 %v1189_v37 }
 0x564   :  { %1782 = vmatmul.mubr.msk.bf16.vlgmr.msra.gmra.mrb[36].mxu0 %vm320_vm2, %v1192_v52 }
 0x565   :  { %1797 = vmatprep.mubr.msk.bf16.mxu0 %vm2253_vm1, %v2252_v15 }
 0x567   :  { %605 = vadd.xlane.f32.xlu0 %v604_v44 }
 0x56b   :  { %838 = vadd.xlane.f32.xlu0 %v837_v53  ;;  %v1855_v53 = vld [vmem:[#allocation9] sm:$0xff]  }
 0x56c   :  { %1786 = vmatpush3.bf16.msra.mxu1 %v1855_v53  ;;  %v1865_v53 = vld [vmem:[#allocation21 + $0x30] sm:$0xff]  }
 0x56d   :  { %1787 = vmatprep.subr.bf16.mxu1 %v2252_v15 }
 0x582   :  { %v489_v54 = vpop.xlane.xlu0 %488 }
 0x583   :  { %1887 = vrcp.f32 %v489_v54  ;;  %v1856_v54 = vld [vmem:[#allocation9 + $0x8] sm:$0xff]  }
 0x584   :  { %1788 = vmatpush3.bf16.msra.mxu1 %v1856_v54  ;;  %v1866_v54 = vld [vmem:[#allocation21 + $0x38] sm:$0xff]  }
 0x585   :  { %1801 = vmatprep.subr.bf16.mxu1 %v2252_v15 }
 0x58d   :  { %v1888_v62 = vpop.eup %1887 }
 0x5bb   :  { %v955_v21 = vpop.xlane.xlu0 %954 }
 0x5c7   :  { %v1073_v55 = vpop.xlane.xlu1 %1072 }
 0x5ca   :  { %v420_v56 = vpop.f32.mrb[8].mxu0 }
 0x5cb   :  { %v1699_v57 = vpop.f32.mrb[9].mxu0  ;;  %v723_v58 = vpop.xlane.xlu1 %722 }
 0x5cc   :  { %v423_v59 = vpop.f32.mrb[10].mxu0 }
 0x5cd   :  { %v1700_v60 = vpop.f32.mrb[11].mxu0 }
 0x5cf   :  { %v375_v61 = vpop.xlane.xlu1 %374 }
 0x5d0   :  { %1889 = vrcp.f32 %v375_v61 }
 0x5d1   :  { %1891 = vrcp.f32 %v723_v58 }
 0x5d2   :  { %v533_v63 = vpop.f32.mrb[12].mxu0 }
 0x5d3   :  { %v540_v2 = vmul.f32 %v1888_v62, %v533_v63  ;;  %v1711_v3 = vpop.f32.mrb[13].mxu0 }
 0x5d4   :  { %v536_v39 = vpop.f32.mrb[14].mxu0 }
 0x5d5   :  { %v541_v4 = vpack.c.bf16 %v540_v2, %v540_v2  ;;  %v1712_v7 = vpop.f32.mrb[15].mxu0 }
 0x5d7   :  { %543 = vrot.lane.b32.xlu0 %v541_v4, %s2245_s22 }
 0x5da   :  { %v1890_v6 = vpop.eup %1889  ;;  %v650_v5 = vpop.f32.mrb[16].mxu0 }
 0x5db   :  { %v427_v8 = vmul.f32 %v1890_v6, %v420_v56  ;;  %v1723_v9 = vpop.f32.mrb[17].mxu0  ;;  %v1892_v13 = vpop.eup %1891 }
 0x5dc   :  { %v653_v10 = vpop.f32.mrb[18].mxu0 }
 0x5dd   :  { %v1724_v11 = vpop.f32.mrb[19].mxu0  ;;  %v428_v12 = vpack.c.bf16 %v427_v8, %v427_v8 }
 0x5df   :  { %430 = vst.msk [vmem:[#allocation2] sm:$0xf] %vm429_vm4, %v428_v12 }
 0x5e2   :  { %v767_v14 = vpop.f32.mrb[20].mxu0 }
 0x5e3   :  { %v774_v16 = vmul.f32 %v1892_v13, %v767_v14  ;;  %v1735_v17 = vpop.f32.mrb[21].mxu0 }
 0x5e4   :  { %v770_v18 = vpop.f32.mrb[22].mxu0 }
 0x5e5   :  { %v775_v19 = vpack.c.bf16 %v774_v16, %v774_v16  ;;  %v1736_v20 = vpop.f32.mrb[23].mxu0 }
 0x5e7   :  { %777 = vrot.lane.b32.xlu0 %v775_v19, %s2264_s26 }
 0x5f0   :  { %v1191_v22 = vpop.xlane.xlu0 %1190 }
 0x5f4   :  { %v606_v23 = vpop.xlane.xlu0 %605 }
 0x5f5   :  { %1893 = vrcp.f32 %v606_v23 }
 0x5f8   :  { %v839_v24 = vpop.xlane.xlu0 %838 }
 0x5f9   :  { %1895 = vrcp.f32 %v839_v24 }
 0x5fa   :  { %1897 = vrcp.f32 %v955_v21 }
 0x5fb   :  { %1899 = vrcp.f32 %v1073_v55 }
 0x5fc   :  { %1901 = vrcp.f32 %v1191_v22 }
 0x5fe   :  { %v883_v25 = vpop.f32.mrb[24].mxu0 }
 0x5ff   :  { %v1894_v26 = vpop.eup %1893  ;;  %v1747_v27 = vpop.f32.mrb[25].mxu0 }
 0x600   :  { %v886_v28 = vpop.f32.mrb[26].mxu0  ;;  %v657_v29 = vmul.f32 %v1894_v26, %v650_v5  ;;  %v1612_v5 = vld [vmem:[#allocation11] ss:$0 sm:$0xff]  ;;  %v1857_v27 = vld [vmem:[#allocation18] sm:$0xff]  }
 0x601   :  { %v1748_v30 = vpop.f32.mrb[27].mxu0  ;;  %1794 = vmatpush3.bf16.msra.mxu0 %v1857_v27  ;;  %v1858_v28 = vld [vmem:[#allocation18 + $0x8] sm:$0xff]  }
 0x602   :  { %v658_v31 = vpack.c.bf16 %v657_v29, %v657_v29  ;;  %1795 = vmatprep.subr.bf16.mxu0 %v2252_v15 }
 0x603   :  { %v1896_v32 = vpop.eup %1895 }
 0x604   :  { %v890_v33 = vmul.f32 %v1896_v32, %v883_v25  ;;  %660 = vrot.lane.b32.xlu1 %v658_v31, %s2265_s3  ;;  %v1898_v34 = vpop.eup %1897 }
 0x605   :  { %v1900_v47 = vpop.eup %1899  ;;  %1796 = vmatpush3.bf16.msra.mxu0 %v1858_v28 }
 0x606   :  { %v891_v35 = vpack.c.bf16 %v890_v33, %v890_v33  ;;  %v999_v36 = vpop.f32.mrb[28].mxu0  ;;  %v1902_v55 = vpop.eup %1901 }
 0x607   :  { %v1006_v38 = vmul.f32 %v1898_v34, %v999_v36  ;;  %v1759_v40 = vpop.f32.mrb[29].mxu0 }
 0x608   :  { %v893_v41 = vrot.slane %v891_v35, 4  ;;  %v1002_v42 = vpop.f32.mrb[30].mxu0 }
 0x609   :  { %v1007_v43 = vpack.c.bf16 %v1006_v38, %v1006_v38  ;;  %v1760_v45 = vpop.f32.mrb[31].mxu0  ;;  %v1616_v38 = vld [vmem:[#allocation15] ss:$0 sm:$0xff] }
 0x60a   :  { %896 = vst.msk [vmem:[#allocation2] sm:$0xf0] %vm895_vm5, %v893_v41 }
 0x60b   :  { %v1009_v46 = vrot.slane %v1007_v43, 4  ;;  %v1617_v43 = vld [vmem:[#allocation17] ss:$0 sm:$0xff] }
 0x60d   :  { %1010 = vrot.lane.b32.xlu1 %v1009_v46, %s2245_s22 }
 0x60e   :  { %v1117_v48 = vpop.f32.mrb[32].mxu0 }
 0x60f   :  { %v1124_v49 = vmul.f32 %v1900_v47, %v1117_v48  ;;  %v1771_v50 = vpop.f32.mrb[33].mxu0 }
 0x610   :  { %v1120_v51 = vpop.f32.mrb[34].mxu0  ;;  %v1860_v50 = vld [vmem:[#allocation21 + $0x8] sm:$0xff]  }
 0x611   :  { %v1125_v37 = vpack.c.bf16 %v1124_v49, %v1124_v49  ;;  %v1772_v52 = vpop.f32.mrb[35].mxu0  ;;  %v1859_v49 = vld [vmem:[#allocation21] sm:$0xff]   ;;  %v1861_v51 = vld [vmem:[#allocation21 + $0x10] sm:$0xff]  }
 0x612   :  { %v1863_v52 = vld [vmem:[#allocation21 + $0x20] sm:$0xff]  }
 0x613   :  { %v1127_v44 = vrot.slane %v1125_v37, 4  ;;  %v1862_v37 = vld [vmem:[#allocation21 + $0x18] sm:$0xff]  }
 0x615   :  { %1128 = vrot.lane.b32.xlu1 %v1127_v44, %s2265_s3  ;;  %v1864_v44 = vld [vmem:[#allocation21 + $0x28] sm:$0xff]  }
 0x637   :  { %v1235_v56 = vpop.f32.mrb[36].mxu0 }
 0x638   :  { %v1242_v57 = vmul.f32 %v1902_v55, %v1235_v56  ;;  %v1783_v58 = vpop.f32.mrb[37].mxu0  ;;  %v1618_v55 = vld [vmem:[#allocation20] ss:$0 sm:$0xff] }
 0x639   :  { %v1238_v59 = vpop.f32.mrb[38].mxu0 }
 0x63a   :  { %v1243_v60 = vpack.c.bf16 %v1242_v57, %v1242_v57  ;;  %v1784_v61 = vpop.f32.mrb[39].mxu0 }
 0x63c   :  { %v1245_v62 = vrot.slane %v1243_v60, 4 }
 0x63e   :  { %1246 = vrot.lane.b32.xlu1 %v1245_v62, %s2264_s26 }
 0x649   :  { %v544_v63 = vpop.permute.xlu0 %543 }
 0x64a   :  { %547 = vst.msk [vmem:[#allocation2] sm:$0xf] %vm546_vm6, %v544_v63 }
 0x659   :  { %v778_v3 = vpop.permute.xlu0 %777 }
 0x676   :  { %v661_v2 = vpop.permute.xlu1 %660 }
 0x677   :  { %664 = vst.msk [vmem:[#allocation2] sm:$0xf] %vm663_vm7, %v661_v2 }
 0x678   :  { %781 = vst.msk [vmem:[#allocation2] sm:$0xf] %vm780_vm8, %v778_v3 }
 0x67f   :  { %v1011_v39 = vpop.permute.xlu1 %1010 }
 0x680   :  { %1014 = vst.msk [vmem:[#allocation2] sm:$0xf0] %vm1013_vm9, %v1011_v39 }
 0x687   :  { %v1129_v4 = vpop.permute.xlu1 %1128 }
 0x688   :  { %1132 = vst.msk [vmem:[#allocation2] sm:$0xf0] %vm1131_vm10, %v1129_v4 }
 0x6b0   :  { %v1247_v7 = vpop.permute.xlu1 %1246 }
 0x6b1   :  { %1250 = vst.msk [vmem:[#allocation2] sm:$0xf0] %vm1249_vm11, %v1247_v7 }
 0x6b8   :  { %v1251_v6 = vld [vmem:[#allocation2] sm:$0xff] }
 0x6b9   :  { %1790 = vmatmul.mubr.msk.bf16.vlgmr.msra.gmra.mrb[28].mxu1 %vm211_vm0, %v1251_v6 }
 0x6ba   :  { %1817 = vmatprep.mubr.msk.bf16.mxu1 %vm2253_vm1, %v2252_v15  ;;  %1802 = vmatpush3.bf16.msra.mxu1 %v1859_v49 }
 0x6bb   :  { %1803 = vmatprep.subr.bf16.mxu1 %v2252_v15 }
 0x6be   :  { %1804 = vmatpush3.bf16.msra.mxu1 %v1860_v50 }
 0x6bf   :  { %1805 = vmatprep.subr.bf16.mxu1 %v2252_v15 }
 0x6c2   :  { %1806 = vmatpush3.bf16.msra.mxu1 %v1861_v51 }
 0x6c3   :  { %1807 = vmatprep.subr.bf16.mxu1 %v2252_v15 }
 0x6c6   :  { %1808 = vmatpush3.bf16.msra.mxu1 %v1862_v37 }
 0x6c7   :  { %1809 = vmatprep.subr.bf16.mxu1 %v2252_v15 }
 0x6ca   :  { %1810 = vmatpush3.bf16.msra.mxu1 %v1863_v52 }
 0x6cb   :  { %1811 = vmatprep.subr.bf16.mxu1 %v2252_v15 }
 0x6ce   :  { %1812 = vmatpush3.bf16.msra.mxu1 %v1864_v44 }
 0x6cf   :  { %1813 = vmatprep.subr.bf16.mxu1 %v2252_v15 }
 0x6d2   :  { %1814 = vmatpush3.bf16.msra.mxu1 %v1865_v53 }
 0x6d3   :  { %1815 = vmatprep.subr.bf16.mxu1 %v2252_v15 }
 0x6d6   :  { %1816 = vmatpush3.bf16.msra.mxu1 %v1866_v54 }
 0x78c   :  { %v1312_v8 = vpop.f32.mrb[28].mxu1 }
 0x78d   :  { %v1313_v9 = vadd.f32 %v1612_v5, %v1312_v8  ;;  %v1791_v10 = vpop.f32.mrb[29].mxu1 }
 0x78e   :  { %v1315_v11 = vpop.f32.mrb[30].mxu1 }
 0x78f   :  { %v2710_v12 = vadd.f32 %v1313_v9, %v2508_v0  ;;  %v1316_v13 = vadd.f32 %v1612_v5, %v1315_v11  ;;  %v1792_v14 = vpop.f32.mrb[31].mxu1 }
 0x791   :  { %v2713_v16 = vadd.f32 %v1316_v13, %v2510_v1  ;;  %v1323_v17 = vsel %vm211_vm0, %v2710_v12, 0.0 }
 0x792   :  { %1324 = vadd.xlane.f32.xlu0 %v1323_v17 }
 0x793   :  { %v1326_v18 = vsel %vm211_vm0, %v2713_v16, 0.0 }
 0x794   :  { %1327 = vadd.xlane.f32.xlu1 %v1326_v18 }
 0x81f   :  { %v1325_v19 = vpop.xlane.xlu0 %1324 }
 0x820   :  { %v1329_v20 = vmul.f32 0.03125, %v1325_v19 }
 0x821   :  { %v1328_v21 = vpop.xlane.xlu1 %1327 }
 0x822   :  { %v1331_v22 = vsub.f32 %v2710_v12, %v1329_v20  ;;  %v1330_v0 = vmul.f32 0.03125, %v1328_v21  ;;  %v1622_v20 = vld [vmem:[#allocation23] ss:$0 sm:$0xff] }
 0x824   :  { %v1332_v23 = vsub.f32 %v2713_v16, %v1330_v0  ;;  %v1333_v24 = vmul.f32 %v1331_v22, %v1331_v22 }
 0x826   :  { %v1335_v1 = vsel %vm211_vm0, %v1333_v24, 0.0  ;;  %v1334_v25 = vmul.f32 %v1332_v23, %v1332_v23 }
 0x827   :  { %1336 = vadd.xlane.f32.xlu0 %v1335_v1 }
 0x828   :  { %v1338_v26 = vsel %vm211_vm0, %v1334_v25, 0.0 }
 0x82b   :  { %1339 = vadd.xlane.f32.xlu0 %v1338_v26 }
 0x8b4   :  { %v1337_v29 = vpop.xlane.xlu0 %1336 }
 0x8b5   :  { %v1341_v30 = vmul.f32 0.03125, %v1337_v29 }
 0x8b7   :  { %v1343_v31 = vadd.f32 1e-05, %v1341_v30 }
 0x8b8   :  { %v1340_v32 = vpop.xlane.xlu0 %1339 }
 0x8b9   :  { %1903 = vrsqrt.f32 %v1343_v31  ;;  %v1342_v33 = vmul.f32 0.03125, %v1340_v32 }
 0x8bb   :  { %v1344_v34 = vadd.f32 1e-05, %v1342_v33 }
 0x8bd   :  { %1905 = vrsqrt.f32 %v1344_v34 }
 0x8c3   :  { %v1904_v35 = vpop.eup %1903 }
 0x8c4   :  { %v1347_v36 = vmul.f32 %v1904_v35, %v1331_v22 }
 0x8c6   :  { %v1355_v41 = vmul.f32 %v1616_v38, %v1347_v36 }
 0x8c7   :  { %v1906_v40 = vpop.eup %1905 }
 0x8c8   :  { %v1348_v42 = vmul.f32 %v1906_v40, %v1332_v23  ;;  %v1363_v46 = vadd.f32 %v1617_v43, %v1355_v41 }
 0x8ca   :  { %v1356_v45 = vmul.f32 %v1616_v38, %v1348_v42 }
 0x8cc   :  { %v1364_v47 = vadd.f32 %v1617_v43, %v1356_v45 }
 0x8ce   :  { %v1365_v48 = vpack.c.bf16 %v1364_v47, %v1363_v46 }
 0x8d0   :  { %1798 = vmatmul.mubr.msk.bf16.vlgmr.msra.gmra.mrb[40].mxu0 %vm211_vm0, %v1365_v48 }
 0x9a3   :  { %v1426_v56 = vpop.f32.mrb[40].mxu0 }
 0x9a4   :  { %v1427_v57 = vadd.f32 %v1618_v55, %v1426_v56  ;;  %v1799_v58 = vpop.f32.mrb[41].mxu0 }
 0x9a5   :  { %v1429_v59 = vpop.f32.mrb[42].mxu0 }
 0x9a6   :  { %v1435_v60 = vmul.f32 0.044715, %v1427_v57  ;;  %v1430_v61 = vadd.f32 %v1618_v55, %v1429_v59  ;;  %v1800_v62 = vpop.f32.mrb[43].mxu0  ;;  %v1433_v11 = vmul.f32 0.5, %v1427_v57 }
 0x9a8   :  { %v1437_v63 = vmul.f32 %v1435_v60, %v1427_v57  ;;  %v1436_v2 = vmul.f32 0.044715, %v1430_v61  ;;  %v1434_v13 = vmul.f32 0.5, %v1430_v61 }
 0x9aa   :  { %v1439_v3 = vmul.f32 %v1437_v63, %v1427_v57  ;;  %v1438_v39 = vmul.f32 %v1436_v2, %v1430_v61 }
 0x9ac   :  { %v1441_v4 = vadd.f32 %v1439_v3, %v1427_v57  ;;  %v1440_v7 = vmul.f32 %v1438_v39, %v1430_v61 }
 0x9ae   :  { %v1443_v6 = vmul.f32 0.7978846, %v1441_v4  ;;  %v1442_v5 = vadd.f32 %v1440_v7, %v1430_v61 }
 0x9b0   :  { %1907 = vtanh.f32 %v1443_v6  ;;  %v1444_v8 = vmul.f32 0.7978846, %v1442_v5 }
 0x9b2   :  { %1909 = vtanh.f32 %v1444_v8 }
 0x9ba   :  { %v1908_v15 = vpop.eup %1907 }
 0x9bb   :  { %v1447_v9 = vadd.f32 1.0, %v1908_v15 }
 0x9bc   :  { %v1910_v10 = vpop.eup %1909 }
 0x9bd   :  { %v1448_v14 = vadd.f32 1.0, %v1910_v10  ;;  %v1449_v17 = vmul.f32 %v1447_v9, %v1433_v11 }
 0x9bf   :  { %v1450_v18 = vmul.f32 %v1448_v14, %v1434_v13 }
 0x9c1   :  { %v1451_v19 = vpack.c.bf16 %v1450_v18, %v1449_v17 }
 0x9c3   :  { %1818 = vmatmul.mubr.bf16.vlgmr.msra.gmra.mrb[32].mxu1 %v1451_v19 }
 0xa96   :  { %v1557_v21 = vpop.f32.mrb[32].mxu1 }
 0xa97   :  { %v1558_v22 = vadd.f32 %v1622_v20, %v1557_v21  ;;  %v1819_v0 = vpop.f32.mrb[33].mxu1 }
 0xa98   :  { %v1560_v23 = vpop.f32.mrb[34].mxu1 }
 0xa99   :  { %v1564_v24 = vadd.f32 %v1558_v22, %v2710_v12  ;;  %v1561_v1 = vadd.f32 %v1622_v20, %v1560_v23  ;;  %v1820_v25 = vpop.f32.mrb[35].mxu1 }
 0xa9b   :  { %1566 = vst.msk [vmem:[#allocation24] sm:$0xff] %vm211_vm0, %v1564_v24  ;;  %v1565_v26 = vadd.f32 %v1561_v1, %v2713_v16 }
 0xa9d   :  { %1567 = vst.msk [vmem:[#allocation24 + $0x8] sm:$0xff] %vm211_vm0, %v1565_v26 }
 0xa9e   :  { %2208 = shalt.err (!%p2205_p10)
}
 0xa9f   :  { %s2209_s5 = scalar_lea.hbm %s2764_s13, 256 }
 0xaa0   :  { %p2210_p11 = scmp.ne.s32.totalorder %s2764_s13, %s2209_s5  ;;  %p2213_p12 = scmp.lt.u32.totalorder %s2209_s5, %s2764_s13 }
 0xaa2   :  { %p2215_p13 = pnand %p2213_p12, %p2210_p11 }
 0xaa4   :  { %2218 = shalt.err (!%p2215_p13)
}
 0xaa5   :  { %1579 = dma.vmem_to_hbm [thread:$0]  %s1574_s8, 256, %s2764_s13, [#allocation5], %s2244_s11, %s2244_s11, %s2245_s22  }
 0xaa6   :  { %2233 = dma.done.wait [#allocation5], 256  }
 0xaa7   :  { %2234 = vsyncadd [#allocation5], 4294967040 }
 0xaa8   :  { %1583 = vsyncpa [#allocation4], 1 }
 0xaa9   :  { %1584 = vsyncpa [#allocation7], 1 }
 0xaaa   :  { %1585 = vsyncpa [#allocation10], 1 }
 0xaab   :  { %1586 = vsyncpa [#allocation13], 1 }
 0xaac   :  { %1587 = vsyncpa [#allocation16], 1 }
 0xaad   :  { %1588 = vsyncpa [#allocation19], 1 }
 0xaae   :  { %1589 = vsyncpa [#allocation22], 1 }
 0xaaf   :  { %1590 = vsyncpa [#allocation5], 1 }

</bundles_post_ra>
